<compile_context>
chip_gen: v6e
topology: v6e:2x2x1
jax: 0.10.0
libtpu: 0.0.40
codegen_flags: <defaults>
</compile_context>

<pallas_src>
import functools

import numpy as np
import jax
import jax.numpy as jnp
from jax.experimental import pallas as pl
from jax.experimental.pallas import tpu as pltpu


def _tract_kernel(audio_ref, ar_ref, br_ref, al_ref, bl_ref, out_ref, init_ref, *,
                  tract_n, extra_steps, block_batch, audio_len):
    """Waveguide simulation for one batch block, fully unrolled (N + S steps).

    audio_ref : (B_blk, L)      f32  input audio for this batch block
    ar/br/al/bl_ref : (N*B_blk, T) f32  precomputed coefficient slabs
                                      (segment-major rows: row = seg*B_blk + b)
    out_ref   : (B_blk, L)      f32  output audio
    init_ref  : (N*B_blk, L)    f32  VMEM scratch used to build the initial state
    """
    N = tract_n
    Bb = block_batch
    L = audio_len
    R = N * Bb

    # Initial tract_r: audio in segment 0 (rows [0, Bb)), zero elsewhere.
    init_ref[:Bb, :] = audio_ref[...]
    if R > Bb:
        init_ref[Bb:, :] = jnp.zeros((R - Bb, L), jnp.float32)
    tract_r = init_ref[...]
    tract_l = jnp.zeros((R, L), jnp.float32)

    def step(i, tr, tl):
        # Segment shift in segment-major packing: seg -> seg+1 is row -> row+Bb.
        # Wrap-around rows land on seg 0 / seg N-1, where A_r / A_l are zero
        # (boundary masks are folded into the coefficients in the wrapper).
        shifted_r = pltpu.roll(tr, shift=Bb, axis=0)
        shifted_l = pltpu.roll(tl, shift=R - Bb, axis=0)
        # Static (python-constant i) lane slices of the full-time coefficient
        # slabs -- no windowed copies, just an in-VMEM unaligned load per step.
        a_r = ar_ref[:, i:i + L]
        b_r = br_ref[:, i:i + L]
        a_l = al_ref[:, i:i + L]
        b_l = bl_ref[:, i:i + L]
        new_r = shifted_r * a_r - tl * b_r
        new_l = shifted_l * a_l + tr * b_l
        return new_r, new_l

    # Fully unrolled (N + extra_steps short iterations) for LLO visibility.
    for i in range(N):
        tract_r, tract_l = step(i, tract_r, tract_l)

    # output = last tract segment (seg N-1) = last Bb contiguous rows.
    acc = tract_r[R - Bb:, :]                               # (Bb, L)
    if extra_steps:
        lane = jax.lax.broadcasted_iota(jnp.int32, (Bb, L), 1)
    for r in range(extra_steps):
        tract_r, tract_l = step(N + r, tract_r, tract_l)
        last = tract_r[R - Bb:, :]                          # (Bb, L) only
        # torch: output_audio[:, r+1:] += tract_r[:, :L-r-1, -1]
        shifted = pltpu.roll(last, shift=r + 1, axis=1)     # exact lane roll (XLU)
        acc = acc + jnp.where(lane >= r + 1, shifted, 0.0)

    out_ref[...] = acc


def _pick_block_batch(batch):
    """Batch-block size: must divide B and be 8-aligned (or cover all of B)."""
    if batch <= 8:
        return batch
    for cand in (32, 16, 8):
        if batch % cand == 0:
            return cand
    return batch


def tract_forward(in_audio, reflection, fade, *, tract_n, extra_simulation_steps,
                  block_batch=None):
    """JAX/Pallas equivalent of Tract.forward (simulation_double=False)."""
    # TODO(synk): simulation_double=True branch (F.interpolate nearest/linear
    # upsample + stride-2 output decimation) is not implemented (module default).
    B, C, L = in_audio.shape
    assert C == 1
    N = tract_n
    S = extra_simulation_steps

    # pad_admittance: zero-pad the reflection time axis by N + S on the right.
    refl = jnp.pad(reflection.astype(jnp.float32), ((0, 0), (0, 0), (0, N + S)))
    T = refl.shape[2]
    assert T >= L + N + S, f"{T}, {L} + {N} + {S}"

    if block_batch is None:
        block_batch = _pick_block_batch(B)
    Bb = block_batch
    assert B % Bb == 0, (B, Bb)
    assert Bb == B or Bb % 8 == 0, "batch block must be 8-aligned or cover all batches"
    n_blk = B // Bb
    R = N * Bb

    audio = in_audio[:, 0, :].astype(jnp.float32)                     # (B, L)

    # Fold sigmoid(fade) and the segment-boundary masks into 4 coefficient slabs.
    fade_sig = jax.nn.sigmoid(fade.astype(jnp.float32)).reshape(1, N, 1)
    seg = jnp.arange(N).reshape(1, N, 1)
    keep_r = (seg != 0).astype(jnp.float32)
    keep_l = (seg != N - 1).astype(jnp.float32)
    rr = refl[:, :N, :]                                                # (B, N, T)
    rl = refl[:, 1:, :]                                                # (B, N, T)
    a_r = (1.0 - rr) * fade_sig * keep_r
    b_r = rr * fade_sig
    a_l = (1.0 + rl) * fade_sig * keep_l
    b_l = rl * fade_sig

    def pack(x):  # (B, N, T) -> (n_blk * N * Bb, T), segment-major within a block
        return (x.reshape(n_blk, Bb, N, T)
                 .transpose(0, 2, 1, 3)
                 .reshape(n_blk * N * Bb, T))

    a_r, b_r, a_l, b_l = pack(a_r), pack(b_r), pack(a_l), pack(b_l)

    # Per-block VMEM budget (double-buffered I/O + state/temps) with headroom.
    itemsize = 4
    block_io = (Bb * L + 4 * R * T + Bb * L) * itemsize
    state = 3 * R * L * itemsize
    vmem_limit = int(min(max(2 * block_io + 2 * state + (2 << 20), 8 << 20), 64 << 20))

    kernel = functools.partial(_tract_kernel, tract_n=N, extra_steps=S,
                               block_batch=Bb, audio_len=L)
    coeff_spec = pl.BlockSpec((R, T), lambda g: (g, 0))
    # TODO(synk): on v7x, if profiling shows exposed DMA at small blocks, add
    # pipeline_mode=pl.Buffered(3) to the coefficient BlockSpecs.
    out = pl.pallas_call(
        kernel,
        out_shape=jax.ShapeDtypeStruct((B, L), jnp.float32),
        grid_spec=pltpu.PrefetchScalarGridSpec(
            num_scalar_prefetch=0,
            grid=(n_blk,),
            in_specs=[pl.BlockSpec((Bb, L), lambda g: (g, 0)),
                      coeff_spec, coeff_spec, coeff_spec, coeff_spec],
            out_specs=pl.BlockSpec((Bb, L), lambda g: (g, 0)),
            scratch_shapes=[pltpu.VMEM((R, L), jnp.float32)],
        ),
        compiler_params=pltpu.CompilerParams(
            dimension_semantics=("parallel",),
            vmem_limit_bytes=vmem_limit),
    )(audio, a_r, b_r, a_l, b_l)

    return out[:, None, :]                                             # (B, 1, L)


def tract_reference(in_audio, reflection, fade, *, tract_n, extra_simulation_steps):
    """Pure-JAX transcription of the PyTorch forward (for validation)."""
    B, _, L = in_audio.shape
    N, S = tract_n, extra_simulation_steps
    refl = jnp.pad(reflection, ((0, 0), (0, 0), (0, N + S)))
    refl = jnp.transpose(refl, (0, 2, 1))                # (B, T, N+1)
    fade_sig = jax.nn.sigmoid(fade)                      # (1, 1, N)
    tract_r = jnp.zeros((B, L, N)).at[:, :, 0].set(in_audio[:, 0, :])
    tract_l = jnp.zeros((B, L, N))

    def step(i, tr, tl):
        shifted_r = jnp.pad(tr[:, :, :-1], ((0, 0), (0, 0), (1, 0)))
        new_r = shifted_r - (shifted_r + tl) * refl[:, i:i + L, :N]
        shifted_l = jnp.pad(tl[:, :, 1:], ((0, 0), (0, 0), (0, 1)))
        new_l = shifted_l + (shifted_l + tr) * refl[:, i:i + L, 1:]
        return new_r * fade_sig, new_l * fade_sig

    for i in range(N):
        tract_r, tract_l = step(i, tract_r, tract_l)
    out = tract_r[:, :, -1]
    for r in range(S):
        tract_r, tract_l = step(N + r, tract_r, tract_l)
        out = out.at[:, r + 1:].add(tract_r[:, :L - r - 1, -1])
    return out[:, None, :]


if __name__ == "__main__":
    TRACT_N = 8
    EXTRA_STEPS = 2
    B, L = 16, 128          # small, but exercises the batch grid (2 blocks of 8)

    key = jax.random.PRNGKey(0)
    k_audio, k_refl = jax.random.split(key)
    in_audio = jax.random.normal(k_audio, (B, 1, L), dtype=jnp.float32)
    reflection = 0.2 * jax.random.normal(k_refl, (B, TRACT_N + 1, L),
                                         dtype=jnp.float32)
    # deterministic parameter init, as in Tract.__init__: ones((1,1,tract_n)) * 10
    fade = jnp.ones((1, 1, TRACT_N), dtype=jnp.float32) * 10.0

    out = tract_forward(in_audio, reflection, fade,
                        tract_n=TRACT_N, extra_simulation_steps=EXTRA_STEPS,
                        block_batch=8)
    out = jax.block_until_ready(out)
    assert out.shape == (B, 1, L)

    ref = tract_reference(in_audio, reflection, fade,
                          tract_n=TRACT_N, extra_simulation_steps=EXTRA_STEPS)
    # The precomputed-coefficient form reassociates the per-step products, so
    # tolerate a few f32 ulp of drift vs the torch-order reference.
    np.testing.assert_allclose(np.asarray(out), np.asarray(ref),
                               rtol=1e-4, atol=1e-5)

    print("KERNEL_OK")
</pallas_src>

<mosaic_0001>
module attributes {stable_mosaic.version = 11 : i64} {
  func.func @_tract_kernel(%arg0: i32, %arg1: memref<8x128xf32, #tpu.memory_space<vmem>>, %arg2: memref<64x138xf32, #tpu.memory_space<vmem>>, %arg3: memref<64x138xf32, #tpu.memory_space<vmem>>, %arg4: memref<64x138xf32, #tpu.memory_space<vmem>>, %arg5: memref<64x138xf32, #tpu.memory_space<vmem>>, %arg6: memref<8x128xf32, #tpu.memory_space<vmem>>, %arg7: memref<64x128xf32, #tpu.memory_space<vmem>>) attributes {dimension_semantics = [#tpu.dimension_semantics<parallel>], iteration_bounds = array<i64: 2>, scalar_prefetch = 0 : i64, scratch_operands = 1 : i64, tpu.core_type = #tpu.core_type<tc>, window_params = [{transform_indices = @transform_0, window_bounds = array<i64: 8, 128>}, {transform_indices = @transform_1, window_bounds = array<i64: 64, 138>}, {transform_indices = @transform_2, window_bounds = array<i64: 64, 138>}, {transform_indices = @transform_3, window_bounds = array<i64: 64, 138>}, {transform_indices = @transform_4, window_bounds = array<i64: 64, 138>}, {transform_indices = @transform_5, window_bounds = array<i64: 8, 128>}]} {
    %c0 = arith.constant 0 : index
    %c0_0 = arith.constant 0 : index
    %0 = vector.load %arg1[%c0, %c0_0] : memref<8x128xf32, #tpu.memory_space<vmem>>, vector<8x128xf32>
    %c0_1 = arith.constant 0 : index
    %c0_2 = arith.constant 0 : index
    %1 = vector.load %arg7[%c0_1, %c0_2] : memref<64x128xf32, #tpu.memory_space<vmem>>, vector<8x128xf32>
    tpu.vector_store %arg7[%c0_1, %c0_2], %0 {strides = array<i32>} : memref<64x128xf32, #tpu.memory_space<vmem>>, vector<8x128xf32>,
    %cst = arith.constant 0.000000e+00 : f32
    %2 = vector.broadcast %cst : f32 to vector<56x128xf32>
    %c8 = arith.constant 8 : index
    %c0_3 = arith.constant 0 : index
    %3 = vector.load %arg7[%c8, %c0_3] : memref<64x128xf32, #tpu.memory_space<vmem>>, vector<56x128xf32>
    tpu.vector_store %arg7[%c8, %c0_3], %2 {strides = array<i32>} : memref<64x128xf32, #tpu.memory_space<vmem>>, vector<56x128xf32>,
    %c0_4 = arith.constant 0 : index
    %c0_5 = arith.constant 0 : index
    %4 = vector.load %arg7[%c0_4, %c0_5] : memref<64x128xf32, #tpu.memory_space<vmem>>, vector<64x128xf32>
    %cst_6 = arith.constant 0.000000e+00 : f32
    %5 = vector.broadcast %cst_6 : f32 to vector<64x128xf32>
    %c8_i32 = arith.constant 8 : i32
    %6 = tpu.dynamic_rotate %4 by %c8_i32 dim 0 : vector<64x128xf32>, i32 -> vector<64x128xf32>
    %c56_i32 = arith.constant 56 : i32
    %7 = tpu.dynamic_rotate %5 by %c56_i32 dim 0 : vector<64x128xf32>, i32 -> vector<64x128xf32>
    %c0_7 = arith.constant 0 : index
    %c0_8 = arith.constant 0 : index
    %8 = vector.load %arg2[%c0_7, %c0_8] : memref<64x138xf32, #tpu.memory_space<vmem>>, vector<64x128xf32>
    %c0_9 = arith.constant 0 : index
    %c0_10 = arith.constant 0 : index
    %9 = vector.load %arg3[%c0_9, %c0_10] : memref<64x138xf32, #tpu.memory_space<vmem>>, vector<64x128xf32>
    %c0_11 = arith.constant 0 : index
    %c0_12 = arith.constant 0 : index
    %10 = vector.load %arg4[%c0_11, %c0_12] : memref<64x138xf32, #tpu.memory_space<vmem>>, vector<64x128xf32>
    %c0_13 = arith.constant 0 : index
    %c0_14 = arith.constant 0 : index
    %11 = vector.load %arg5[%c0_13, %c0_14] : memref<64x138xf32, #tpu.memory_space<vmem>>, vector<64x128xf32>
    %12 = arith.mulf %6, %8 : vector<64x128xf32>
    %13 = arith.mulf %5, %9 : vector<64x128xf32>
    %14 = arith.subf %12, %13 : vector<64x128xf32>
    %15 = arith.mulf %7, %10 : vector<64x128xf32>
    %16 = arith.mulf %4, %11 : vector<64x128xf32>
    %17 = arith.addf %15, %16 : vector<64x128xf32>
    %c8_i32_15 = arith.constant 8 : i32
    %18 = tpu.dynamic_rotate %14 by %c8_i32_15 dim 0 : vector<64x128xf32>, i32 -> vector<64x128xf32>
    %c56_i32_16 = arith.constant 56 : i32
    %19 = tpu.dynamic_rotate %17 by %c56_i32_16 dim 0 : vector<64x128xf32>, i32 -> vector<64x128xf32>
    %c0_17 = arith.constant 0 : index
    %c1 = arith.constant 1 : index
    %20 = vector.load %arg2[%c0_17, %c1] : memref<64x138xf32, #tpu.memory_space<vmem>>, vector<64x128xf32>
    %c0_18 = arith.constant 0 : index
    %c1_19 = arith.constant 1 : index
    %21 = vector.load %arg3[%c0_18, %c1_19] : memref<64x138xf32, #tpu.memory_space<vmem>>, vector<64x128xf32>
    %c0_20 = arith.constant 0 : index
    %c1_21 = arith.constant 1 : index
    %22 = vector.load %arg4[%c0_20, %c1_21] : memref<64x138xf32, #tpu.memory_space<vmem>>, vector<64x128xf32>
    %c0_22 = arith.constant 0 : index
    %c1_23 = arith.constant 1 : index
    %23 = vector.load %arg5[%c0_22, %c1_23] : memref<64x138xf32, #tpu.memory_space<vmem>>, vector<64x128xf32>
    %24 = arith.mulf %18, %20 : vector<64x128xf32>
    %25 = arith.mulf %17, %21 : vector<64x128xf32>
    %26 = arith.subf %24, %25 : vector<64x128xf32>
    %27 = arith.mulf %19, %22 : vector<64x128xf32>
    %28 = arith.mulf %14, %23 : vector<64x128xf32>
    %29 = arith.addf %27, %28 : vector<64x128xf32>
    %c8_i32_24 = arith.constant 8 : i32
    %30 = tpu.dynamic_rotate %26 by %c8_i32_24 dim 0 : vector<64x128xf32>, i32 -> vector<64x128xf32>
    %c56_i32_25 = arith.constant 56 : i32
    %31 = tpu.dynamic_rotate %29 by %c56_i32_25 dim 0 : vector<64x128xf32>, i32 -> vector<64x128xf32>
    %c0_26 = arith.constant 0 : index
    %c2 = arith.constant 2 : index
    %32 = vector.load %arg2[%c0_26, %c2] : memref<64x138xf32, #tpu.memory_space<vmem>>, vector<64x128xf32>
    %c0_27 = arith.constant 0 : index
    %c2_28 = arith.constant 2 : index
    %33 = vector.load %arg3[%c0_27, %c2_28] : memref<64x138xf32, #tpu.memory_space<vmem>>, vector<64x128xf32>
    %c0_29 = arith.constant 0 : index
    %c2_30 = arith.constant 2 : index
    %34 = vector.load %arg4[%c0_29, %c2_30] : memref<64x138xf32, #tpu.memory_space<vmem>>, vector<64x128xf32>
    %c0_31 = arith.constant 0 : index
    %c2_32 = arith.constant 2 : index
    %35 = vector.load %arg5[%c0_31, %c2_32] : memref<64x138xf32, #tpu.memory_space<vmem>>, vector<64x128xf32>
    %36 = arith.mulf %30, %32 : vector<64x128xf32>
    %37 = arith.mulf %29, %33 : vector<64x128xf32>
    %38 = arith.subf %36, %37 : vector<64x128xf32>
    %39 = arith.mulf %31, %34 : vector<64x128xf32>
    %40 = arith.mulf %26, %35 : vector<64x128xf32>
    %41 = arith.addf %39, %40 : vector<64x128xf32>
    %c8_i32_33 = arith.constant 8 : i32
    %42 = tpu.dynamic_rotate %38 by %c8_i32_33 dim 0 : vector<64x128xf32>, i32 -> vector<64x128xf32>
    %c56_i32_34 = arith.constant 56 : i32
    %43 = tpu.dynamic_rotate %41 by %c56_i32_34 dim 0 : vector<64x128xf32>, i32 -> vector<64x128xf32>
    %c0_35 = arith.constant 0 : index
    %c3 = arith.constant 3 : index
    %44 = vector.load %arg2[%c0_35, %c3] : memref<64x138xf32, #tpu.memory_space<vmem>>, vector<64x128xf32>
    %c0_36 = arith.constant 0 : index
    %c3_37 = arith.constant 3 : index
    %45 = vector.load %arg3[%c0_36, %c3_37] : memref<64x138xf32, #tpu.memory_space<vmem>>, vector<64x128xf32>
    %c0_38 = arith.constant 0 : index
    %c3_39 = arith.constant 3 : index
    %46 = vector.load %arg4[%c0_38, %c3_39] : memref<64x138xf32, #tpu.memory_space<vmem>>, vector<64x128xf32>
    %c0_40 = arith.constant 0 : index
    %c3_41 = arith.constant 3 : index
    %47 = vector.load %arg5[%c0_40, %c3_41] : memref<64x138xf32, #tpu.memory_space<vmem>>, vector<64x128xf32>
    %48 = arith.mulf %42, %44 : vector<64x128xf32>
    %49 = arith.mulf %41, %45 : vector<64x128xf32>
    %50 = arith.subf %48, %49 : vector<64x128xf32>
    %51 = arith.mulf %43, %46 : vector<64x128xf32>
    %52 = arith.mulf %38, %47 : vector<64x128xf32>
    %53 = arith.addf %51, %52 : vector<64x128xf32>
    %c8_i32_42 = arith.constant 8 : i32
    %54 = tpu.dynamic_rotate %50 by %c8_i32_42 dim 0 : vector<64x128xf32>, i32 -> vector<64x128xf32>
    %c56_i32_43 = arith.constant 56 : i32
    %55 = tpu.dynamic_rotate %53 by %c56_i32_43 dim 0 : vector<64x128xf32>, i32 -> vector<64x128xf32>
    %c0_44 = arith.constant 0 : index
    %c4 = arith.constant 4 : index
    %56 = vector.load %arg2[%c0_44, %c4] : memref<64x138xf32, #tpu.memory_space<vmem>>, vector<64x128xf32>
    %c0_45 = arith.constant 0 : index
    %c4_46 = arith.constant 4 : index
    %57 = vector.load %arg3[%c0_45, %c4_46] : memref<64x138xf32, #tpu.memory_space<vmem>>, vector<64x128xf32>
    %c0_47 = arith.constant 0 : index
    %c4_48 = arith.constant 4 : index
    %58 = vector.load %arg4[%c0_47, %c4_48] : memref<64x138xf32, #tpu.memory_space<vmem>>, vector<64x128xf32>
    %c0_49 = arith.constant 0 : index
    %c4_50 = arith.constant 4 : index
    %59 = vector.load %arg5[%c0_49, %c4_50] : memref<64x138xf32, #tpu.memory_space<vmem>>, vector<64x128xf32>
    %60 = arith.mulf %54, %56 : vector<64x128xf32>
    %61 = arith.mulf %53, %57 : vector<64x128xf32>
    %62 = arith.subf %60, %61 : vector<64x128xf32>
    %63 = arith.mulf %55, %58 : vector<64x128xf32>
    %64 = arith.mulf %50, %59 : vector<64x128xf32>
    %65 = arith.addf %63, %64 : vector<64x128xf32>
    %c8_i32_51 = arith.constant 8 : i32
    %66 = tpu.dynamic_rotate %62 by %c8_i32_51 dim 0 : vector<64x128xf32>, i32 -> vector<64x128xf32>
    %c56_i32_52 = arith.constant 56 : i32
    %67 = tpu.dynamic_rotate %65 by %c56_i32_52 dim 0 : vector<64x128xf32>, i32 -> vector<64x128xf32>
    %c0_53 = arith.constant 0 : index
    %c5 = arith.constant 5 : index
    %68 = vector.load %arg2[%c0_53, %c5] : memref<64x138xf32, #tpu.memory_space<vmem>>, vector<64x128xf32>
    %c0_54 = arith.constant 0 : index
    %c5_55 = arith.constant 5 : index
    %69 = vector.load %arg3[%c0_54, %c5_55] : memref<64x138xf32, #tpu.memory_space<vmem>>, vector<64x128xf32>
    %c0_56 = arith.constant 0 : index
    %c5_57 = arith.constant 5 : index
    %70 = vector.load %arg4[%c0_56, %c5_57] : memref<64x138xf32, #tpu.memory_space<vmem>>, vector<64x128xf32>
    %c0_58 = arith.constant 0 : index
    %c5_59 = arith.constant 5 : index
    %71 = vector.load %arg5[%c0_58, %c5_59] : memref<64x138xf32, #tpu.memory_space<vmem>>, vector<64x128xf32>
    %72 = arith.mulf %66, %68 : vector<64x128xf32>
    %73 = arith.mulf %65, %69 : vector<64x128xf32>
    %74 = arith.subf %72, %73 : vector<64x128xf32>
    %75 = arith.mulf %67, %70 : vector<64x128xf32>
    %76 = arith.mulf %62, %71 : vector<64x128xf32>
    %77 = arith.addf %75, %76 : vector<64x128xf32>
    %c8_i32_60 = arith.constant 8 : i32
    %78 = tpu.dynamic_rotate %74 by %c8_i32_60 dim 0 : vector<64x128xf32>, i32 -> vector<64x128xf32>
    %c56_i32_61 = arith.constant 56 : i32
    %79 = tpu.dynamic_rotate %77 by %c56_i32_61 dim 0 : vector<64x128xf32>, i32 -> vector<64x128xf32>
    %c0_62 = arith.constant 0 : index
    %c6 = arith.constant 6 : index
    %80 = vector.load %arg2[%c0_62, %c6] : memref<64x138xf32, #tpu.memory_space<vmem>>, vector<64x128xf32>
    %c0_63 = arith.constant 0 : index
    %c6_64 = arith.constant 6 : index
    %81 = vector.load %arg3[%c0_63, %c6_64] : memref<64x138xf32, #tpu.memory_space<vmem>>, vector<64x128xf32>
    %c0_65 = arith.constant 0 : index
    %c6_66 = arith.constant 6 : index
    %82 = vector.load %arg4[%c0_65, %c6_66] : memref<64x138xf32, #tpu.memory_space<vmem>>, vector<64x128xf32>
    %c0_67 = arith.constant 0 : index
    %c6_68 = arith.constant 6 : index
    %83 = vector.load %arg5[%c0_67, %c6_68] : memref<64x138xf32, #tpu.memory_space<vmem>>, vector<64x128xf32>
    %84 = arith.mulf %78, %80 : vector<64x128xf32>
    %85 = arith.mulf %77, %81 : vector<64x128xf32>
    %86 = arith.subf %84, %85 : vector<64x128xf32>
    %87 = arith.mulf %79, %82 : vector<64x128xf32>
    %88 = arith.mulf %74, %83 : vector<64x128xf32>
    %89 = arith.addf %87, %88 : vector<64x128xf32>
    %c8_i32_69 = arith.constant 8 : i32
    %90 = tpu.dynamic_rotate %86 by %c8_i32_69 dim 0 : vector<64x128xf32>, i32 -> vector<64x128xf32>
    %c56_i32_70 = arith.constant 56 : i32
    %91 = tpu.dynamic_rotate %89 by %c56_i32_70 dim 0 : vector<64x128xf32>, i32 -> vector<64x128xf32>
    %c0_71 = arith.constant 0 : index
    %c7 = arith.constant 7 : index
    %92 = vector.load %arg2[%c0_71, %c7] : memref<64x138xf32, #tpu.memory_space<vmem>>, vector<64x128xf32>
    %c0_72 = arith.constant 0 : index
    %c7_73 = arith.constant 7 : index
    %93 = vector.load %arg3[%c0_72, %c7_73] : memref<64x138xf32, #tpu.memory_space<vmem>>, vector<64x128xf32>
    %c0_74 = arith.constant 0 : index
    %c7_75 = arith.constant 7 : index
    %94 = vector.load %arg4[%c0_74, %c7_75] : memref<64x138xf32, #tpu.memory_space<vmem>>, vector<64x128xf32>
    %c0_76 = arith.constant 0 : index
    %c7_77 = arith.constant 7 : index
    %95 = vector.load %arg5[%c0_76, %c7_77] : memref<64x138xf32, #tpu.memory_space<vmem>>, vector<64x128xf32>
    %96 = arith.mulf %90, %92 : vector<64x128xf32>
    %97 = arith.mulf %89, %93 : vector<64x128xf32>
    %98 = arith.subf %96, %97 : vector<64x128xf32>
    %99 = arith.mulf %91, %94 : vector<64x128xf32>
    %100 = arith.mulf %86, %95 : vector<64x128xf32>
    %101 = arith.addf %99, %100 : vector<64x128xf32>
    %102 = vector.extract_strided_slice %98 {offsets = [56, 0], sizes = [8, 128], strides = [1, 1]} : vector<64x128xf32> to vector<8x128xf32>
    %103 = tpu.iota {dimensions = array<i32: 1>} : vector<8x128xi32>
    %c8_i32_78 = arith.constant 8 : i32
    %104 = tpu.dynamic_rotate %98 by %c8_i32_78 dim 0 : vector<64x128xf32>, i32 -> vector<64x128xf32>
    %c56_i32_79 = arith.constant 56 : i32
    %105 = tpu.dynamic_rotate %101 by %c56_i32_79 dim 0 : vector<64x128xf32>, i32 -> vector<64x128xf32>
    %c0_80 = arith.constant 0 : index
    %c8_81 = arith.constant 8 : index
    %106 = vector.load %arg2[%c0_80, %c8_81] : memref<64x138xf32, #tpu.memory_space<vmem>>, vector<64x128xf32>
    %c0_82 = arith.constant 0 : index
    %c8_83 = arith.constant 8 : index
    %107 = vector.load %arg3[%c0_82, %c8_83] : memref<64x138xf32, #tpu.memory_space<vmem>>, vector<64x128xf32>
    %c0_84 = arith.constant 0 : index
    %c8_85 = arith.constant 8 : index
    %108 = vector.load %arg4[%c0_84, %c8_85] : memref<64x138xf32, #tpu.memory_space<vmem>>, vector<64x128xf32>
    %c0_86 = arith.constant 0 : index
    %c8_87 = arith.constant 8 : index
    %109 = vector.load %arg5[%c0_86, %c8_87] : memref<64x138xf32, #tpu.memory_space<vmem>>, vector<64x128xf32>
    %110 = arith.mulf %104, %106 : vector<64x128xf32>
    %111 = arith.mulf %101, %107 : vector<64x128xf32>
    %112 = arith.subf %110, %111 : vector<64x128xf32>
    %113 = arith.mulf %105, %108 : vector<64x128xf32>
    %114 = arith.mulf %98, %109 : vector<64x128xf32>
    %115 = arith.addf %113, %114 : vector<64x128xf32>
    %116 = vector.extract_strided_slice %112 {offsets = [56, 0], sizes = [8, 128], strides = [1, 1]} : vector<64x128xf32> to vector<8x128xf32>
    %c1_i32 = arith.constant 1 : i32
    %117 = tpu.dynamic_rotate %116 by %c1_i32 dim 1 : vector<8x128xf32>, i32 -> vector<8x128xf32>
    %c1_i32_88 = arith.constant 1 : i32
    %118 = vector.broadcast %c1_i32_88 : i32 to vector<8x128xi32>
    %119 = arith.cmpi sge, %103, %118 : vector<8x128xi32>
    %cst_89 = arith.constant 0.000000e+00 : f32
    %120 = vector.broadcast %cst_89 : f32 to vector<8x128xf32>
    %121 = arith.select %119, %117, %120 : vector<8x128xi1>, vector<8x128xf32>
    %122 = arith.addf %102, %121 : vector<8x128xf32>
    %c8_i32_90 = arith.constant 8 : i32
    %123 = tpu.dynamic_rotate %112 by %c8_i32_90 dim 0 : vector<64x128xf32>, i32 -> vector<64x128xf32>
    %c0_91 = arith.constant 0 : index
    %c9 = arith.constant 9 : index
    %124 = vector.load %arg2[%c0_91, %c9] : memref<64x138xf32, #tpu.memory_space<vmem>>, vector<64x128xf32>
    %c0_92 = arith.constant 0 : index
    %c9_93 = arith.constant 9 : index
    %125 = vector.load %arg3[%c0_92, %c9_93] : memref<64x138xf32, #tpu.memory_space<vmem>>, vector<64x128xf32>
    %126 = arith.mulf %123, %124 : vector<64x128xf32>
    %127 = arith.mulf %115, %125 : vector<64x128xf32>
    %128 = arith.subf %126, %127 : vector<64x128xf32>
    %129 = vector.extract_strided_slice %128 {offsets = [56, 0], sizes = [8, 128], strides = [1, 1]} : vector<64x128xf32> to vector<8x128xf32>
    %c2_i32 = arith.constant 2 : i32
    %130 = tpu.dynamic_rotate %129 by %c2_i32 dim 1 : vector<8x128xf32>, i32 -> vector<8x128xf32>
    %c2_i32_94 = arith.constant 2 : i32
    %131 = vector.broadcast %c2_i32_94 : i32 to vector<8x128xi32>
    %132 = arith.cmpi sge, %103, %131 : vector<8x128xi32>
    %cst_95 = arith.constant 0.000000e+00 : f32
    %133 = vector.broadcast %cst_95 : f32 to vector<8x128xf32>
    %134 = arith.select %132, %130, %133 : vector<8x128xi1>, vector<8x128xf32>
    %135 = arith.addf %122, %134 : vector<8x128xf32>
    %c0_96 = arith.constant 0 : index
    %c0_97 = arith.constant 0 : index
    %136 = vector.load %arg6[%c0_96, %c0_97] : memref<8x128xf32, #tpu.memory_space<vmem>>, vector<8x128xf32>
    tpu.vector_store %arg6[%c0_96, %c0_97], %135 {strides = array<i32>} : memref<8x128xf32, #tpu.memory_space<vmem>>, vector<8x128xf32>,
    return
  }
  func.func @transform_0(%arg0: i32) -> (i32, i32) {
    %c0_i32 = arith.constant 0 : i32
    %c0_i32_0 = arith.constant 0 : i32
    return %arg0, %c0_i32 : i32, i32
  }
  func.func @transform_1(%arg0: i32) -> (i32, i32) {
    %c0_i32 = arith.constant 0 : i32
    %c0_i32_0 = arith.constant 0 : i32
    return %arg0, %c0_i32 : i32, i32
  }
  func.func @transform_2(%arg0: i32) -> (i32, i32) {
    %c0_i32 = arith.constant 0 : i32
    %c0_i32_0 = arith.constant 0 : i32
    return %arg0, %c0_i32 : i32, i32
  }
  func.func @transform_3(%arg0: i32) -> (i32, i32) {
    %c0_i32 = arith.constant 0 : i32
    %c0_i32_0 = arith.constant 0 : i32
    return %arg0, %c0_i32 : i32, i32
  }
  func.func @transform_4(%arg0: i32) -> (i32, i32) {
    %c0_i32 = arith.constant 0 : i32
    %c0_i32_0 = arith.constant 0 : i32
    return %arg0, %c0_i32 : i32, i32
  }
  func.func @transform_5(%arg0: i32) -> (i32, i32) {
    %c0_i32 = arith.constant 0 : i32
    %c0_i32_0 = arith.constant 0 : i32
    return %arg0, %c0_i32 : i32, i32
  }
}

</mosaic_0001>

<bundles_post_ra>
// kernel: tpu_custom_call.1
= control target key start
LH: loop header
LB: loop body
LE: loop exit
PB: predicated region body
PF: predicated region fallthrough
CT: control target
= control target key end

     0   :  { %10 = vsyncpa [#allocation4], 0  ;;  %s5028_s0 = inlined_call_operand.vmem [shape: f32[16,128], index: 0, kind: input, shape index: {}]   ;;  %s5029_s1 = inlined_call_operand.vmem [shape: f32[128,138], index: 1, kind: input, shape index: {}]   ;;  %s5030_s2 = inlined_call_operand.vmem [shape: f32[128,138], index: 2, kind: input, shape index: {}]   ;;  %s5031_s3 = inlined_call_operand.vmem [shape: f32[128,138], index: 3, kind: input, shape index: {}]   ;;  %s5032_s4 = inlined_call_operand.vmem [shape: f32[128,138], index: 4, kind: input, shape index: {}]   ;;  %s5033_s5 = inlined_call_operand.hbm [shape: f32[16,128], index: 5, kind: output, shape index: {}]  }
   0x1   :  { %12 = vsyncpa [#allocation4 + $0x1], 0  ;;  %s2375_s18 = smov 0   ;;  %s2377_s19 = smov 0  }
   0x2   :  { %s2379_s20 = smov 0   ;;  %s2381_s21 = smov 0  }
   0x3 LB: > { %s2396_s22 = sadd.s32 4294967295, %s2331_s21   ;;  %s2126_s23 = sadd.s32 4294967294, %s2331_s21   ;;  %s2331_s21 = sphi %s2381_s21, %s5703_s21   ;;  %s2327_s20 = sphi %s2379_s20, %s5702_s20   ;;  %s2323_s19 = sphi %s2377_s19, %s5701_s19   ;;  %s2319_s18 = sphi %s2375_s18, %s5700_s18  }
   0x4   : > { %s2400_s24 = sadd.s32 1, %s2331_s21   ;;  %s155_s25 = sadd.s32 1, %s2327_s20 }
   0x5   : > { %s152_s26 = ssub.s32 %s2331_s21, %s2400_s24  ;;  %p165_p0 = scmp.ne.s32.totalorder %s2327_s20, %s2323_s19 }
   0x6   : > { %p153_p1 = scmp.eq.s32.totalorder %s152_s26, 0  ;;  %p166_p2 = scmp.eq.s32.totalorder %s2396_s22, 1 }
   0x7   : > { %p171_p3 = scmp.ne.s32.totalorder %s2323_s19, %s2319_s18  ;;  %p172_p4 = scmp.eq.s32.totalorder %s2126_s23, 1 }
   0x8   : > { %s2411_s27 = scalar_select %p153_p1, %s2327_s20, %s155_s25  }
   0x9   : > { %p2413_p5 = por %p166_p2, %p165_p0  ;;  %p2417_p6 = por %p172_p4, %p171_p3 }
   0xa   : > { %p2129_p7 = scmp.ge.s32.totalorder %s2331_s21, 1  ;;  %p237_p8 = scmp.lt.s32.totalorder %s2331_s21, 3 }
   0xc   : > { %p238_p9 = pnand %p2129_p7, %p237_p8 }
   0xe   : > { %241 = sbr.rel (%p238_p9) target bundleno = 1060 (0x424), region = 40 }
  0x13   : > { %s2132_s30 = sshll.u32 %s2396_s22, 3  ;;  %s2333_s10 = smov 127   ;;  %vm497_vm0 = vcmask 1039360   ;;  %vm786_vm1 = vcmask 1031168   ;;  %vm1505_vm2 = vcmask 1006592   ;;  %vm1027_vm3 = vcmask 1022976  }
  0x14   : > { %p293_p10 = scmp.lt.s32.totalorder %s2132_s30, 15  ;;  %s2334_s26 = smov 126   ;;  %vm1268_vm4 = vcmask 1014784   ;;  %vm1708_vm5 = vcmask 998400   ;;  %vm1851_vm6 = vcmask 990208   ;;  %vm1940_vm7 = vcmask 982016  }
  0x15   : > { %s2337_s7 = smov 123   ;;  %s2338_s8 = smov 122   ;;  %vm1987_vm8 = vcmask 973824  }
  0x16   : > { %s5705_s30 = smov (!%p293_p10, %s2132_s30), 15  ;;  %p288_p11 = scmp.lt.s32.totalorder %s2396_s22, 1 }
  0x17   : > { %s2424_s6 = sshll.u32 %s5705_s30, 4  ;;  %s2335_s30 = smov 125  }
  0x18   : > { %s2430_s9 = scalar_lea.vmem %s5029_s1, %s2424_s6  ;;  %s2512_s13 = scalar_lea.vmem %s5030_s2, %s2424_s6 }
  0x19   : > { %v2433_v0 = vld [vmem:[%s2430_s9 + $0x10] sm:$0xff]  ;;  %v2436_v1 = vld [vmem:[%s2430_s9] sm:$0xff]  ;;  %v2443_v2 = vld [vmem:[%s2430_s9 + $0x18] sm:$0xff]  ;;  %s2598_s16 = scalar_lea.vmem %s5031_s3, %s2424_s6  ;;  %s2684_s25 = scalar_lea.vmem %s5032_s4, %s2424_s6 }
  0x1a   : > { %5071 = vst [vmem:[#allocation6_spill] sm:$0xff] %v2436_v1  ;;  %469 = vrot.lane.b32.xlu1 %v2433_v0, %s2333_s10  ;;  %465 = vrot.lane.b32.xlu0 %v2436_v1, %s2333_s10  ;;  %v2446_v3 = vld [vmem:[%s2430_s9 + $0x8] sm:$0xff]  ;;  %v2456_v5 = vld [vmem:[%s2430_s9 + $0x20] sm:$0xff]  ;;  %s2336_s6 = smov 124   ;;  %s2339_s17 = smov 121  }
  0x1b   : > { %v2453_v4 = vld [vmem:[%s2430_s9 + $0x28] sm:$0xff]  ;;  %v2463_v6 = vld [vmem:[%s2430_s9 + $0x38] sm:$0xff]  ;;  %v2466_v7 = vld [vmem:[%s2430_s9 + $0x30] sm:$0xff]  ;;  %s2340_s23 = smov 120  }
  0x1c   : > { %v2473_v8 = vld [vmem:[%s2430_s9 + $0x48] sm:$0xff]  ;;  %v2476_v9 = vld [vmem:[%s2430_s9 + $0x40] sm:$0xff]  ;;  %v2483_v10 = vld [vmem:[%s2430_s9 + $0x58] sm:$0xff] }
  0x1d   : > { %v2486_v11 = vld [vmem:[%s2430_s9 + $0x50] sm:$0xff]  ;;  %v2493_v12 = vld [vmem:[%s2430_s9 + $0x68] sm:$0xff]  ;;  %v2496_v13 = vld [vmem:[%s2430_s9 + $0x60] sm:$0xff] }
  0x1e   : > { %471 = vrot.lane.b32.xlu1 %v2443_v2, %s2333_s10  ;;  %467 = vrot.lane.b32.xlu0 %v2446_v3, %s2333_s10  ;;  %v2503_v14 = vld [vmem:[%s2430_s9 + $0x78] sm:$0xff]  ;;  %v2506_v15 = vld [vmem:[%s2430_s9 + $0x70] sm:$0xff] }
  0x1f   : > { %v2519_v16 = vld [vmem:[%s2512_s13 + $0x8] sm:$0xff]  ;;  %v2522_v17 = vld [vmem:[%s2512_s13] sm:$0xff]  ;;  %v2529_v18 = vld [vmem:[%s2512_s13 + $0x18] sm:$0xff] }
  0x20   : > { %v2532_v19 = vld [vmem:[%s2512_s13 + $0x10] sm:$0xff]  ;;  %v2539_v20 = vld [vmem:[%s2512_s13 + $0x28] sm:$0xff]  ;;  %v2542_v21 = vld [vmem:[%s2512_s13 + $0x20] sm:$0xff] }
  0x21   : > { %v2549_v22 = vld [vmem:[%s2512_s13 + $0x38] sm:$0xff]  ;;  %v2552_v23 = vld [vmem:[%s2512_s13 + $0x30] sm:$0xff]  ;;  %v2559_v24 = vld [vmem:[%s2512_s13 + $0x48] sm:$0xff] }
  0x22   : > { %475 = vrot.lane.b32.xlu1 %v2453_v4, %s2333_s10  ;;  %473 = vrot.lane.b32.xlu0 %v2456_v5, %s2333_s10  ;;  %v2562_v25 = vld [vmem:[%s2512_s13 + $0x40] sm:$0xff]  ;;  %v2569_v26 = vld [vmem:[%s2512_s13 + $0x58] sm:$0xff] }
  0x23   : > { %v2572_v27 = vld [vmem:[%s2512_s13 + $0x50] sm:$0xff]  ;;  %v2579_v28 = vld [vmem:[%s2512_s13 + $0x68] sm:$0xff]  ;;  %v2582_v29 = vld [vmem:[%s2512_s13 + $0x60] sm:$0xff] }
  0x24   : > { %v2589_v30 = vld [vmem:[%s2512_s13 + $0x78] sm:$0xff]  ;;  %v2592_v31 = vld [vmem:[%s2512_s13 + $0x70] sm:$0xff]  ;;  %v2605_v32 = vld [vmem:[%s2598_s16 + $0x8] sm:$0xff] }
  0x25   : > { %v2608_v33 = vld [vmem:[%s2598_s16] sm:$0xff]  ;;  %v2615_v34 = vld [vmem:[%s2598_s16 + $0x18] sm:$0xff]  ;;  %v2618_v35 = vld [vmem:[%s2598_s16 + $0x10] sm:$0xff] }
  0x26   : > { %479 = vrot.lane.b32.xlu1 %v2463_v6, %s2333_s10  ;;  %477 = vrot.lane.b32.xlu0 %v2466_v7, %s2333_s10  ;;  %v2625_v36 = vld [vmem:[%s2598_s16 + $0x28] sm:$0xff]  ;;  %v2628_v37 = vld [vmem:[%s2598_s16 + $0x20] sm:$0xff] }
  0x27   : > { %v2635_v38 = vld [vmem:[%s2598_s16 + $0x38] sm:$0xff]  ;;  %v2638_v39 = vld [vmem:[%s2598_s16 + $0x30] sm:$0xff]  ;;  %v2645_v40 = vld [vmem:[%s2598_s16 + $0x48] sm:$0xff] }
  0x28   : > { %v2648_v41 = vld [vmem:[%s2598_s16 + $0x40] sm:$0xff]  ;;  %v2655_v42 = vld [vmem:[%s2598_s16 + $0x58] sm:$0xff]  ;;  %v2658_v43 = vld [vmem:[%s2598_s16 + $0x50] sm:$0xff] }
  0x29   : > { %v2665_v44 = vld [vmem:[%s2598_s16 + $0x68] sm:$0xff]  ;;  %v2668_v45 = vld [vmem:[%s2598_s16 + $0x60] sm:$0xff]  ;;  %v2675_v46 = vld [vmem:[%s2598_s16 + $0x78] sm:$0xff] }
  0x2a   : > { %483 = vrot.lane.b32.xlu1 %v2473_v8, %s2333_s10  ;;  %481 = vrot.lane.b32.xlu0 %v2476_v9, %s2333_s10  ;;  %v2678_v47 = vld [vmem:[%s2598_s16 + $0x70] sm:$0xff]  ;;  %v2691_v48 = vld [vmem:[%s2684_s25 + $0x8] sm:$0xff] }
  0x2b   : > { %5072 = vst [vmem:[#allocation7_spill] sm:$0xff] %v2691_v48  ;;  %v2694_v49 = vld [vmem:[%s2684_s25] sm:$0xff]  ;;  %v2701_v50 = vld [vmem:[%s2684_s25 + $0x18] sm:$0xff]  ;;  %v2704_v51 = vld [vmem:[%s2684_s25 + $0x10] sm:$0xff] }
  0x2c   : > { %5073 = vst [vmem:[#allocation8_spill] sm:$0xff] %v2694_v49  ;;  %5074 = vst [vmem:[#allocation9_spill] sm:$0xff] %v2701_v50  ;;  %v2711_v52 = vld [vmem:[%s2684_s25 + $0x28] sm:$0xff]  ;;  %v2714_v53 = vld [vmem:[%s2684_s25 + $0x20] sm:$0xff] }
  0x2d   : > { %5075 = vst [vmem:[#allocation10_spill] sm:$0xff] %v2704_v51  ;;  %5076 = vst [vmem:[#allocation11_spill] sm:$0xff] %v2711_v52  ;;  %v2721_v54 = vld [vmem:[%s2684_s25 + $0x38] sm:$0xff]  ;;  %v2724_v55 = vld [vmem:[%s2684_s25 + $0x30] sm:$0xff] }
  0x2e   : > { %487 = vrot.lane.b32.xlu1 %v2483_v10, %s2333_s10  ;;  %485 = vrot.lane.b32.xlu0 %v2486_v11, %s2333_s10  ;;  %5077 = vst [vmem:[#allocation12_spill] sm:$0xff] %v2714_v53  ;;  %5078 = vst [vmem:[#allocation13_spill] sm:$0xff] %v2721_v54  ;;  %v2731_v56 = vld [vmem:[%s2684_s25 + $0x48] sm:$0xff]  ;;  %v2734_v57 = vld [vmem:[%s2684_s25 + $0x40] sm:$0xff] }
  0x2f   : > { %5079 = vst [vmem:[#allocation14_spill] sm:$0xff] %v2724_v55  ;;  %5080 = vst [vmem:[#allocation15_spill] sm:$0xff] %v2731_v56  ;;  %v2741_v58 = vld [vmem:[%s2684_s25 + $0x58] sm:$0xff]  ;;  %v2744_v59 = vld [vmem:[%s2684_s25 + $0x50] sm:$0xff] }
  0x30   : > { %5081 = vst [vmem:[#allocation16_spill] sm:$0xff] %v2734_v57  ;;  %5082 = vst [vmem:[#allocation17_spill] sm:$0xff] %v2741_v58  ;;  %v2755_v62 = vld [vmem:[%s2684_s25 + $0x68] sm:$0xff]  ;;  %v2758_v63 = vld [vmem:[%s2684_s25 + $0x60] sm:$0xff] }
  0x31   : > { %5083 = vst [vmem:[#allocation18_spill] sm:$0xff] %v2744_v59 }
  0x32   : > { %491 = vrot.lane.b32.xlu1 %v2493_v12, %s2333_s10  ;;  %489 = vrot.lane.b32.xlu0 %v2496_v13, %s2333_s10 }
  0x36   : > { %495 = vrot.lane.b32.xlu1 %v2503_v14, %s2333_s10  ;;  %493 = vrot.lane.b32.xlu0 %v2506_v15, %s2333_s10 }
  0x3a   : > { %540 = vrot.lane.b32.xlu1 %v2519_v16, %s2333_s10  ;;  %538 = vrot.lane.b32.xlu0 %v2522_v17, %s2333_s10 }
  0x3e   : > { %544 = vrot.lane.b32.xlu1 %v2529_v18, %s2333_s10  ;;  %542 = vrot.lane.b32.xlu0 %v2532_v19, %s2333_s10 }
  0x42   : > { %548 = vrot.lane.b32.xlu1 %v2539_v20, %s2333_s10  ;;  %546 = vrot.lane.b32.xlu0 %v2542_v21, %s2333_s10 }
  0x46   : > { %552 = vrot.lane.b32.xlu1 %v2549_v22, %s2333_s10  ;;  %550 = vrot.lane.b32.xlu0 %v2552_v23, %s2333_s10 }
  0x4a   : > { %556 = vrot.lane.b32.xlu1 %v2559_v24, %s2333_s10  ;;  %554 = vrot.lane.b32.xlu0 %v2562_v25, %s2333_s10 }
  0x4e   : > { %560 = vrot.lane.b32.xlu1 %v2569_v26, %s2333_s10  ;;  %558 = vrot.lane.b32.xlu0 %v2572_v27, %s2333_s10 }
  0x52   : > { %564 = vrot.lane.b32.xlu1 %v2579_v28, %s2333_s10  ;;  %562 = vrot.lane.b32.xlu0 %v2582_v29, %s2333_s10 }
  0x56   : > { %568 = vrot.lane.b32.xlu1 %v2589_v30, %s2333_s10  ;;  %566 = vrot.lane.b32.xlu0 %v2592_v31, %s2333_s10 }
  0x5a   : > { %620 = vrot.lane.b32.xlu1 %v2605_v32, %s2333_s10  ;;  %618 = vrot.lane.b32.xlu0 %v2608_v33, %s2333_s10 }
  0x5e   : > { %624 = vrot.lane.b32.xlu1 %v2615_v34, %s2333_s10  ;;  %622 = vrot.lane.b32.xlu0 %v2618_v35, %s2333_s10 }
  0x62   : > { %628 = vrot.lane.b32.xlu1 %v2625_v36, %s2333_s10  ;;  %626 = vrot.lane.b32.xlu0 %v2628_v37, %s2333_s10 }
  0x66   : > { %632 = vrot.lane.b32.xlu1 %v2635_v38, %s2333_s10  ;;  %630 = vrot.lane.b32.xlu0 %v2638_v39, %s2333_s10 }
  0x6a   : > { %636 = vrot.lane.b32.xlu1 %v2645_v40, %s2333_s10  ;;  %634 = vrot.lane.b32.xlu0 %v2648_v41, %s2333_s10 }
  0x6e   : > { %640 = vrot.lane.b32.xlu1 %v2655_v42, %s2333_s10  ;;  %638 = vrot.lane.b32.xlu0 %v2658_v43, %s2333_s10 }
  0x72   : > { %644 = vrot.lane.b32.xlu1 %v2665_v44, %s2333_s10  ;;  %642 = vrot.lane.b32.xlu0 %v2668_v45, %s2333_s10 }
  0x76   : > { %648 = vrot.lane.b32.xlu1 %v2675_v46, %s2333_s10  ;;  %646 = vrot.lane.b32.xlu0 %v2678_v47, %s2333_s10 }
  0x7a   : > { %692 = vrot.lane.b32.xlu1 %v2691_v48, %s2333_s10  ;;  %690 = vrot.lane.b32.xlu0 %v2694_v49, %s2333_s10 }
  0x7e   : > { %696 = vrot.lane.b32.xlu1 %v2701_v50, %s2333_s10  ;;  %694 = vrot.lane.b32.xlu0 %v2704_v51, %s2333_s10 }
  0x82   : > { %700 = vrot.lane.b32.xlu1 %v2711_v52, %s2333_s10  ;;  %698 = vrot.lane.b32.xlu0 %v2714_v53, %s2333_s10 }
  0x86   : > { %704 = vrot.lane.b32.xlu1 %v2721_v54, %s2333_s10  ;;  %702 = vrot.lane.b32.xlu0 %v2724_v55, %s2333_s10 }
  0x8a   : > { %708 = vrot.lane.b32.xlu1 %v2731_v56, %s2333_s10  ;;  %706 = vrot.lane.b32.xlu0 %v2734_v57, %s2333_s10 }
  0x8c   : > { %v2746_v60 = vpop.permute.xlu1 %469  ;;  %v2748_v61 = vpop.permute.xlu0 %465 }
  0x8d   : > { %5084 = vst [vmem:[#allocation19_spill] sm:$0xff] %v2746_v60  ;;  %5085 = vst [vmem:[#allocation20_spill] sm:$0xff] %v2748_v61  ;;  %v2769_v61 = vld [vmem:[%s2684_s25 + $0x78] sm:$0xff]  ;;  %v2772_v60 = vld [vmem:[%s2684_s25 + $0x70] sm:$0xff] }
  0x8e   : > { %712 = vrot.lane.b32.xlu1 %v2741_v58, %s2333_s10  ;;  %710 = vrot.lane.b32.xlu0 %v2744_v59, %s2333_s10 }
  0x90   : > { %v2760_v56 = vpop.permute.xlu1 %471  ;;  %v2762_v57 = vpop.permute.xlu0 %467 }
  0x91   : > { %5086 = vst [vmem:[#allocation21_spill] sm:$0xff] %v2760_v56  ;;  %5087 = vst [vmem:[#allocation22_spill] sm:$0xff] %v2762_v57 }
  0x92   : > { %716 = vrot.lane.b32.xlu1 %v2755_v62, %s2333_s10  ;;  %714 = vrot.lane.b32.xlu0 %v2758_v63, %s2333_s10 }
  0x94   : > { %v2774_v58 = vpop.permute.xlu1 %475  ;;  %v2776_v59 = vpop.permute.xlu0 %473 }
  0x95   : > { %5088 = vst [vmem:[#allocation23_spill] sm:$0xff] %v2774_v58  ;;  %5089 = vst [vmem:[#allocation24_spill] sm:$0xff] %v2776_v59 }
  0x96   : > { %720 = vrot.lane.b32.xlu1 %v2769_v61, %s2333_s10  ;;  %718 = vrot.lane.b32.xlu0 %v2772_v60, %s2333_s10  ;;  %s289_s10 = scalar_select %p288_p11, %s2396_s22, 1 }
  0x98   : > { %v2782_v57 = vpop.permute.xlu1 %479  ;;  %v2784_v56 = vpop.permute.xlu0 %477  ;;  %s2131_s11 = sshll.u32 %s289_s10, 3 }
  0x99   : > { %5090 = vst [vmem:[#allocation25_spill] sm:$0xff] %v2782_v57  ;;  %5091 = vst [vmem:[#allocation26_spill] sm:$0xff] %v2784_v56  ;;  %s291_s15 = scalar_lea.vmem %s5028_s0, %s2131_s11 }
  0x9a   : > { %756 = vrot.lane.b32.xlu1 %v2446_v3, %s2334_s26  ;;  %754 = vrot.lane.b32.xlu0 %v2436_v1, %s2334_s26 }
  0x9c   : > { %v2790_v58 = vpop.permute.xlu1 %483  ;;  %v2792_v59 = vpop.permute.xlu0 %481 }
  0x9d   : > { %5092 = vst [vmem:[#allocation27_spill] sm:$0xff] %v2790_v58  ;;  %5093 = vst [vmem:[#allocation28_spill] sm:$0xff] %v2792_v59 }
  0x9e   : > { %760 = vrot.lane.b32.xlu1 %v2443_v2, %s2334_s26  ;;  %758 = vrot.lane.b32.xlu0 %v2433_v0, %s2334_s26 }
  0xa0   : > { %v2798_v57 = vpop.permute.xlu1 %487  ;;  %v2800_v56 = vpop.permute.xlu0 %485 }
  0xa1   : > { %5094 = vst [vmem:[#allocation29_spill] sm:$0xff] %v2798_v57  ;;  %5095 = vst [vmem:[#allocation30_spill] sm:$0xff] %v2800_v56 }
  0xa2   : > { %764 = vrot.lane.b32.xlu1 %v2453_v4, %s2334_s26  ;;  %762 = vrot.lane.b32.xlu0 %v2456_v5, %s2334_s26 }
  0xa4   : > { %v2806_v1 = vpop.permute.xlu1 %491  ;;  %v2808_v58 = vpop.permute.xlu0 %489 }
  0xa5   : > { %5096 = vst [vmem:[#allocation31_spill] sm:$0xff] %v2806_v1  ;;  %5097 = vst [vmem:[#allocation32_spill] sm:$0xff] %v2808_v58 }
  0xa6   : > { %768 = vrot.lane.b32.xlu1 %v2463_v6, %s2334_s26  ;;  %766 = vrot.lane.b32.xlu0 %v2466_v7, %s2334_s26 }
  0xa8   : > { %v2814_v59 = vpop.permute.xlu1 %495  ;;  %v2816_v57 = vpop.permute.xlu0 %493 }
  0xa9   : > { %5098 = vst [vmem:[#allocation33_spill] sm:$0xff] %v2814_v59  ;;  %5099 = vst [vmem:[#allocation34_spill] sm:$0xff] %v2816_v57 }
  0xaa   : > { %772 = vrot.lane.b32.xlu1 %v2473_v8, %s2334_s26  ;;  %770 = vrot.lane.b32.xlu0 %v2476_v9, %s2334_s26 }
  0xac   : > { %v2822_v56 = vpop.permute.xlu1 %540  ;;  %v2824_v1 = vpop.permute.xlu0 %538 }
  0xad   : > { %5100 = vst [vmem:[#allocation35_spill] sm:$0xff] %v2822_v56  ;;  %5101 = vst [vmem:[#allocation36_spill] sm:$0xff] %v2824_v1 }
  0xae   : > { %776 = vrot.lane.b32.xlu1 %v2483_v10, %s2334_s26  ;;  %774 = vrot.lane.b32.xlu0 %v2486_v11, %s2334_s26 }
  0xb0   : > { %v2830_v58 = vpop.permute.xlu1 %544  ;;  %v2832_v59 = vpop.permute.xlu0 %542 }
  0xb1   : > { %5102 = vst [vmem:[#allocation37_spill] sm:$0xff] %v2830_v58  ;;  %5103 = vst [vmem:[#allocation38_spill] sm:$0xff] %v2832_v59 }
  0xb2   : > { %780 = vrot.lane.b32.xlu1 %v2493_v12, %s2334_s26  ;;  %778 = vrot.lane.b32.xlu0 %v2496_v13, %s2334_s26 }
  0xb4   : > { %v2838_v57 = vpop.permute.xlu1 %548  ;;  %v2840_v56 = vpop.permute.xlu0 %546 }
  0xb5   : > { %5104 = vst [vmem:[#allocation39_spill] sm:$0xff] %v2838_v57  ;;  %5105 = vst [vmem:[#allocation40_spill] sm:$0xff] %v2840_v56 }
  0xb6   : > { %784 = vrot.lane.b32.xlu1 %v2503_v14, %s2334_s26  ;;  %782 = vrot.lane.b32.xlu0 %v2506_v15, %s2334_s26 }
  0xb8   : > { %v2846_v1 = vpop.permute.xlu1 %552  ;;  %v2848_v58 = vpop.permute.xlu0 %550 }
  0xb9   : > { %5106 = vst [vmem:[#allocation41_spill] sm:$0xff] %v2846_v1  ;;  %5107 = vst [vmem:[#allocation42_spill] sm:$0xff] %v2848_v58 }
  0xba   : > { %813 = vrot.lane.b32.xlu1 %v2519_v16, %s2334_s26  ;;  %811 = vrot.lane.b32.xlu0 %v2522_v17, %s2334_s26 }
  0xbc   : > { %v2854_v59 = vpop.permute.xlu1 %556  ;;  %v2856_v57 = vpop.permute.xlu0 %554 }
  0xbd   : > { %5108 = vst [vmem:[#allocation43_spill] sm:$0xff] %v2854_v59  ;;  %5109 = vst [vmem:[#allocation44_spill] sm:$0xff] %v2856_v57 }
  0xbe   : > { %817 = vrot.lane.b32.xlu1 %v2529_v18, %s2334_s26  ;;  %815 = vrot.lane.b32.xlu0 %v2532_v19, %s2334_s26 }
  0xc0   : > { %v2862_v56 = vpop.permute.xlu1 %560  ;;  %v2864_v1 = vpop.permute.xlu0 %558 }
  0xc1   : > { %5110 = vst [vmem:[#allocation45_spill] sm:$0xff] %v2862_v56  ;;  %5111 = vst [vmem:[#allocation46_spill] sm:$0xff] %v2864_v1 }
  0xc2   : > { %821 = vrot.lane.b32.xlu1 %v2539_v20, %s2334_s26  ;;  %819 = vrot.lane.b32.xlu0 %v2542_v21, %s2334_s26 }
  0xc4   : > { %v2870_v58 = vpop.permute.xlu1 %564  ;;  %v2872_v59 = vpop.permute.xlu0 %562 }
  0xc5   : > { %5112 = vst [vmem:[#allocation47_spill] sm:$0xff] %v2870_v58  ;;  %5113 = vst [vmem:[#allocation48_spill] sm:$0xff] %v2872_v59 }
  0xc6   : > { %825 = vrot.lane.b32.xlu1 %v2549_v22, %s2334_s26  ;;  %823 = vrot.lane.b32.xlu0 %v2552_v23, %s2334_s26 }
  0xc8   : > { %v2878_v57 = vpop.permute.xlu1 %568  ;;  %v2880_v56 = vpop.permute.xlu0 %566 }
  0xc9   : > { %5114 = vst [vmem:[#allocation49_spill] sm:$0xff] %v2878_v57  ;;  %5115 = vst [vmem:[#allocation50_spill] sm:$0xff] %v2880_v56 }
  0xca   : > { %829 = vrot.lane.b32.xlu1 %v2559_v24, %s2334_s26  ;;  %827 = vrot.lane.b32.xlu0 %v2562_v25, %s2334_s26 }
  0xcc   : > { %v2886_v1 = vpop.permute.xlu1 %620  ;;  %v2888_v58 = vpop.permute.xlu0 %618 }
  0xcd   : > { %5116 = vst [vmem:[#allocation51_spill] sm:$0xff] %v2886_v1  ;;  %5117 = vst [vmem:[#allocation52_spill] sm:$0xff] %v2888_v58 }
  0xce   : > { %833 = vrot.lane.b32.xlu1 %v2569_v26, %s2334_s26  ;;  %831 = vrot.lane.b32.xlu0 %v2572_v27, %s2334_s26 }
  0xd0   : > { %v2894_v59 = vpop.permute.xlu1 %624  ;;  %v2896_v57 = vpop.permute.xlu0 %622 }
  0xd1   : > { %5118 = vst [vmem:[#allocation53_spill] sm:$0xff] %v2894_v59  ;;  %5119 = vst [vmem:[#allocation54_spill] sm:$0xff] %v2896_v57 }
  0xd2   : > { %837 = vrot.lane.b32.xlu1 %v2579_v28, %s2334_s26  ;;  %835 = vrot.lane.b32.xlu0 %v2582_v29, %s2334_s26 }
  0xd4   : > { %v2902_v56 = vpop.permute.xlu1 %628  ;;  %v2904_v1 = vpop.permute.xlu0 %626 }
  0xd5   : > { %5120 = vst [vmem:[#allocation55_spill] sm:$0xff] %v2902_v56  ;;  %5121 = vst [vmem:[#allocation56_spill] sm:$0xff] %v2904_v1 }
  0xd6   : > { %841 = vrot.lane.b32.xlu1 %v2589_v30, %s2334_s26  ;;  %839 = vrot.lane.b32.xlu0 %v2592_v31, %s2334_s26 }
  0xd8   : > { %v2910_v58 = vpop.permute.xlu1 %632  ;;  %v2912_v59 = vpop.permute.xlu0 %630 }
  0xd9   : > { %5122 = vst [vmem:[#allocation57_spill] sm:$0xff] %v2910_v58  ;;  %5123 = vst [vmem:[#allocation58_spill] sm:$0xff] %v2912_v59 }
  0xda   : > { %877 = vrot.lane.b32.xlu1 %v2605_v32, %s2334_s26  ;;  %875 = vrot.lane.b32.xlu0 %v2608_v33, %s2334_s26 }
  0xdc   : > { %v2918_v57 = vpop.permute.xlu1 %636  ;;  %v2920_v56 = vpop.permute.xlu0 %634 }
  0xdd   : > { %5124 = vst [vmem:[#allocation59_spill] sm:$0xff] %v2918_v57  ;;  %5125 = vst [vmem:[#allocation60_spill] sm:$0xff] %v2920_v56 }
  0xde   : > { %881 = vrot.lane.b32.xlu1 %v2615_v34, %s2334_s26  ;;  %879 = vrot.lane.b32.xlu0 %v2618_v35, %s2334_s26 }
  0xe0   : > { %v2926_v1 = vpop.permute.xlu1 %640  ;;  %v2928_v58 = vpop.permute.xlu0 %638 }
  0xe1   : > { %5126 = vst [vmem:[#allocation61_spill] sm:$0xff] %v2926_v1  ;;  %5127 = vst [vmem:[#allocation62_spill] sm:$0xff] %v2928_v58 }
  0xe2   : > { %885 = vrot.lane.b32.xlu1 %v2625_v36, %s2334_s26  ;;  %883 = vrot.lane.b32.xlu0 %v2628_v37, %s2334_s26 }
  0xe4   : > { %v2934_v59 = vpop.permute.xlu1 %644  ;;  %v2936_v57 = vpop.permute.xlu0 %642 }
  0xe5   : > { %5128 = vst [vmem:[#allocation63_spill] sm:$0xff] %v2934_v59  ;;  %5129 = vst [vmem:[#allocation64_spill] sm:$0xff] %v2936_v57 }
  0xe6   : > { %889 = vrot.lane.b32.xlu1 %v2635_v38, %s2334_s26  ;;  %887 = vrot.lane.b32.xlu0 %v2638_v39, %s2334_s26 }
  0xe8   : > { %v2942_v56 = vpop.permute.xlu1 %648  ;;  %v2944_v1 = vpop.permute.xlu0 %646 }
  0xe9   : > { %5130 = vst [vmem:[#allocation65_spill] sm:$0xff] %v2942_v56  ;;  %5131 = vst [vmem:[#allocation66_spill] sm:$0xff] %v2944_v1 }
  0xea   : > { %893 = vrot.lane.b32.xlu1 %v2645_v40, %s2334_s26  ;;  %891 = vrot.lane.b32.xlu0 %v2648_v41, %s2334_s26 }
  0xec   : > { %v2950_v58 = vpop.permute.xlu1 %692  ;;  %v2952_v59 = vpop.permute.xlu0 %690 }
  0xed   : > { %5132 = vst [vmem:[#allocation67_spill] sm:$0xff] %v2950_v58  ;;  %5133 = vst [vmem:[#allocation68_spill] sm:$0xff] %v2952_v59 }
  0xee   : > { %897 = vrot.lane.b32.xlu1 %v2655_v42, %s2334_s26  ;;  %895 = vrot.lane.b32.xlu0 %v2658_v43, %s2334_s26 }
  0xf0   : > { %v2958_v57 = vpop.permute.xlu1 %696  ;;  %v2960_v56 = vpop.permute.xlu0 %694 }
  0xf1   : > { %5134 = vst [vmem:[#allocation69_spill] sm:$0xff] %v2958_v57  ;;  %5135 = vst [vmem:[#allocation70_spill] sm:$0xff] %v2960_v56 }
  0xf2   : > { %901 = vrot.lane.b32.xlu1 %v2665_v44, %s2334_s26  ;;  %899 = vrot.lane.b32.xlu0 %v2668_v45, %s2334_s26 }
  0xf4   : > { %v2966_v1 = vpop.permute.xlu1 %700  ;;  %v2968_v58 = vpop.permute.xlu0 %698 }
  0xf5   : > { %5136 = vst [vmem:[#allocation71_spill] sm:$0xff] %v2966_v1  ;;  %5137 = vst [vmem:[#allocation72_spill] sm:$0xff] %v2968_v58 }
  0xf6   : > { %905 = vrot.lane.b32.xlu1 %v2675_v46, %s2334_s26  ;;  %903 = vrot.lane.b32.xlu0 %v2678_v47, %s2334_s26 }
  0xf8   : > { %v2974_v59 = vpop.permute.xlu1 %704  ;;  %v2976_v57 = vpop.permute.xlu0 %702 }
  0xf9   : > { %5138 = vst [vmem:[#allocation73_spill] sm:$0xff] %v2974_v59  ;;  %5139 = vst [vmem:[#allocation74_spill] sm:$0xff] %v2976_v57 }
  0xfa   : > { %933 = vrot.lane.b32.xlu1 %v2691_v48, %s2334_s26  ;;  %931 = vrot.lane.b32.xlu0 %v2694_v49, %s2334_s26 }
  0xfc   : > { %v2982_v56 = vpop.permute.xlu1 %708  ;;  %v2984_v1 = vpop.permute.xlu0 %706 }
  0xfd   : > { %5140 = vst [vmem:[#allocation75_spill] sm:$0xff] %v2982_v56  ;;  %5141 = vst [vmem:[#allocation76_spill] sm:$0xff] %v2984_v1 }
  0xfe   : > { %937 = vrot.lane.b32.xlu1 %v2701_v50, %s2334_s26  ;;  %935 = vrot.lane.b32.xlu0 %v2704_v51, %s2334_s26 }
 0x100   : > { %v2990_v58 = vpop.permute.xlu1 %712  ;;  %v2992_v59 = vpop.permute.xlu0 %710 }
 0x101   : > { %5142 = vst [vmem:[#allocation77_spill] sm:$0xff] %v2990_v58  ;;  %5143 = vst [vmem:[#allocation78_spill] sm:$0xff] %v2992_v59  ;;  %v5148_v59 = vld [vmem:[#allocation15_spill] sm:$0xff] }
 0x102   : > { %941 = vrot.lane.b32.xlu1 %v2711_v52, %s2334_s26  ;;  %939 = vrot.lane.b32.xlu0 %v2714_v53, %s2334_s26  ;;  %v5149_v52 = vld [vmem:[#allocation16_spill] sm:$0xff] }
 0x104   : > { %v2998_v57 = vpop.permute.xlu1 %716  ;;  %v3000_v56 = vpop.permute.xlu0 %714 }
 0x105   : > { %5144 = vst [vmem:[#allocation79_spill] sm:$0xff] %v2998_v57  ;;  %5145 = vst [vmem:[#allocation80_spill] sm:$0xff] %v3000_v56  ;;  %v5152_v56 = vld [vmem:[#allocation17_spill] sm:$0xff] }
 0x106   : > { %945 = vrot.lane.b32.xlu1 %v2721_v54, %s2334_s26  ;;  %943 = vrot.lane.b32.xlu0 %v2724_v55, %s2334_s26  ;;  %v5153_v54 = vld [vmem:[#allocation18_spill] sm:$0xff] }
 0x108   : > { %v3006_v1 = vpop.permute.xlu1 %720  ;;  %v3008_v58 = vpop.permute.xlu0 %718 }
 0x109   : > { %5146 = vst [vmem:[#allocation81_spill] sm:$0xff] %v3006_v1  ;;  %5147 = vst [vmem:[#allocation82_spill] sm:$0xff] %v3008_v58 }
 0x10a   : > { %949 = vrot.lane.b32.xlu1 %v5148_v59, %s2334_s26  ;;  %947 = vrot.lane.b32.xlu0 %v5149_v52, %s2334_s26 }
 0x10c   : > { %v3014_v53 = vpop.permute.xlu1 %756  ;;  %v3016_v57 = vpop.permute.xlu0 %754 }
 0x10d   : > { %5150 = vst [vmem:[#allocation15_spill] sm:$0xff] %v3014_v53  ;;  %5151 = vst [vmem:[#allocation16_spill] sm:$0xff] %v3016_v57 }
 0x10e   : > { %953 = vrot.lane.b32.xlu1 %v5152_v56, %s2334_s26  ;;  %951 = vrot.lane.b32.xlu0 %v5153_v54, %s2334_s26 }
 0x110   : > { %v3022_v55 = vpop.permute.xlu1 %760  ;;  %v3024_v1 = vpop.permute.xlu0 %758 }
 0x111   : > { %5154 = vst [vmem:[#allocation17_spill] sm:$0xff] %v3022_v55  ;;  %5155 = vst [vmem:[#allocation18_spill] sm:$0xff] %v3024_v1  ;;  %v5160_v1 = vld [vmem:[#allocation6_spill] sm:$0xff] }
 0x112   : > { %957 = vrot.lane.b32.xlu1 %v2755_v62, %s2334_s26  ;;  %955 = vrot.lane.b32.xlu0 %v2758_v63, %s2334_s26 }
 0x114   : > { %v3030_v58 = vpop.permute.xlu1 %764  ;;  %v3032_v53 = vpop.permute.xlu0 %762 }
 0x115   : > { %5156 = vst [vmem:[#allocation83_spill] sm:$0xff] %v3030_v58  ;;  %5157 = vst [vmem:[#allocation84_spill] sm:$0xff] %v3032_v53 }
 0x116   : > { %961 = vrot.lane.b32.xlu1 %v2769_v61, %s2334_s26  ;;  %959 = vrot.lane.b32.xlu0 %v2772_v60, %s2334_s26 }
 0x118   : > { %v3038_v57 = vpop.permute.xlu1 %768  ;;  %v3040_v55 = vpop.permute.xlu0 %766 }
 0x119   : > { %5158 = vst [vmem:[#allocation85_spill] sm:$0xff] %v3038_v57  ;;  %5159 = vst [vmem:[#allocation86_spill] sm:$0xff] %v3040_v55 }
 0x11a   : > { %997 = vrot.lane.b32.xlu1 %v2446_v3, %s2335_s30  ;;  %995 = vrot.lane.b32.xlu0 %v5160_v1, %s2335_s30 }
 0x11c   : > { %v3046_v58 = vpop.permute.xlu1 %772  ;;  %v3048_v53 = vpop.permute.xlu0 %770 }
 0x11d   : > { %5161 = vst [vmem:[#allocation87_spill] sm:$0xff] %v3046_v58  ;;  %5162 = vst [vmem:[#allocation88_spill] sm:$0xff] %v3048_v53 }
 0x11e   : > { %1001 = vrot.lane.b32.xlu1 %v2443_v2, %s2335_s30  ;;  %999 = vrot.lane.b32.xlu0 %v2433_v0, %s2335_s30 }
 0x120   : > { %v3054_v57 = vpop.permute.xlu1 %776  ;;  %v3056_v55 = vpop.permute.xlu0 %774 }
 0x121   : > { %5163 = vst [vmem:[#allocation89_spill] sm:$0xff] %v3054_v57  ;;  %5164 = vst [vmem:[#allocation90_spill] sm:$0xff] %v3056_v55 }
 0x122   : > { %1005 = vrot.lane.b32.xlu1 %v2453_v4, %s2335_s30  ;;  %1003 = vrot.lane.b32.xlu0 %v2456_v5, %s2335_s30 }
 0x124   : > { %v3062_v1 = vpop.permute.xlu1 %780  ;;  %v3064_v58 = vpop.permute.xlu0 %778 }
 0x125   : > { %5165 = vst [vmem:[#allocation91_spill] sm:$0xff] %v3062_v1  ;;  %5166 = vst [vmem:[#allocation92_spill] sm:$0xff] %v3064_v58 }
 0x126   : > { %1009 = vrot.lane.b32.xlu1 %v2463_v6, %s2335_s30  ;;  %1007 = vrot.lane.b32.xlu0 %v2466_v7, %s2335_s30 }
 0x128   : > { %v3070_v53 = vpop.permute.xlu1 %784  ;;  %v3072_v57 = vpop.permute.xlu0 %782 }
 0x129   : > { %5167 = vst [vmem:[#allocation93_spill] sm:$0xff] %v3070_v53  ;;  %5168 = vst [vmem:[#allocation94_spill] sm:$0xff] %v3072_v57 }
 0x12a   : > { %1013 = vrot.lane.b32.xlu1 %v2473_v8, %s2335_s30  ;;  %1011 = vrot.lane.b32.xlu0 %v2476_v9, %s2335_s30 }
 0x12c   : > { %v3078_v55 = vpop.permute.xlu1 %813  ;;  %v3080_v1 = vpop.permute.xlu0 %811 }
 0x12d   : > { %5169 = vst [vmem:[#allocation95_spill] sm:$0xff] %v3078_v55  ;;  %5170 = vst [vmem:[#allocation96_spill] sm:$0xff] %v3080_v1 }
 0x12e   : > { %1017 = vrot.lane.b32.xlu1 %v2483_v10, %s2335_s30  ;;  %1015 = vrot.lane.b32.xlu0 %v2486_v11, %s2335_s30 }
 0x130   : > { %v3086_v58 = vpop.permute.xlu1 %817  ;;  %v3088_v53 = vpop.permute.xlu0 %815 }
 0x131   : > { %5171 = vst [vmem:[#allocation97_spill] sm:$0xff] %v3086_v58  ;;  %5172 = vst [vmem:[#allocation98_spill] sm:$0xff] %v3088_v53 }
 0x132   : > { %1021 = vrot.lane.b32.xlu1 %v2493_v12, %s2335_s30  ;;  %1019 = vrot.lane.b32.xlu0 %v2496_v13, %s2335_s30 }
 0x134   : > { %v3094_v57 = vpop.permute.xlu1 %821  ;;  %v3096_v55 = vpop.permute.xlu0 %819 }
 0x135   : > { %5173 = vst [vmem:[#allocation99_spill] sm:$0xff] %v3094_v57  ;;  %5174 = vst [vmem:[#allocation100_spill] sm:$0xff] %v3096_v55 }
 0x136   : > { %1025 = vrot.lane.b32.xlu1 %v2503_v14, %s2335_s30  ;;  %1023 = vrot.lane.b32.xlu0 %v2506_v15, %s2335_s30 }
 0x138   : > { %v3102_v1 = vpop.permute.xlu1 %825  ;;  %v3104_v58 = vpop.permute.xlu0 %823 }
 0x139   : > { %5175 = vst [vmem:[#allocation101_spill] sm:$0xff] %v3102_v1  ;;  %5176 = vst [vmem:[#allocation102_spill] sm:$0xff] %v3104_v58 }
 0x13a   : > { %1054 = vrot.lane.b32.xlu1 %v2519_v16, %s2335_s30  ;;  %1052 = vrot.lane.b32.xlu0 %v2522_v17, %s2335_s30 }
 0x13c   : > { %v3110_v53 = vpop.permute.xlu1 %829  ;;  %v3112_v57 = vpop.permute.xlu0 %827 }
 0x13d   : > { %5177 = vst [vmem:[#allocation103_spill] sm:$0xff] %v3110_v53  ;;  %5178 = vst [vmem:[#allocation104_spill] sm:$0xff] %v3112_v57 }
 0x13e   : > { %1058 = vrot.lane.b32.xlu1 %v2529_v18, %s2335_s30  ;;  %1056 = vrot.lane.b32.xlu0 %v2532_v19, %s2335_s30 }
 0x140   : > { %v3118_v55 = vpop.permute.xlu1 %833  ;;  %v3120_v1 = vpop.permute.xlu0 %831 }
 0x141   : > { %5179 = vst [vmem:[#allocation105_spill] sm:$0xff] %v3118_v55  ;;  %5180 = vst [vmem:[#allocation106_spill] sm:$0xff] %v3120_v1 }
 0x142   : > { %1062 = vrot.lane.b32.xlu1 %v2539_v20, %s2335_s30  ;;  %1060 = vrot.lane.b32.xlu0 %v2542_v21, %s2335_s30 }
 0x144   : > { %v3126_v58 = vpop.permute.xlu1 %837  ;;  %v3128_v53 = vpop.permute.xlu0 %835 }
 0x145   : > { %5181 = vst [vmem:[#allocation107_spill] sm:$0xff] %v3126_v58  ;;  %5182 = vst [vmem:[#allocation108_spill] sm:$0xff] %v3128_v53 }
 0x146   : > { %1066 = vrot.lane.b32.xlu1 %v2549_v22, %s2335_s30  ;;  %1064 = vrot.lane.b32.xlu0 %v2552_v23, %s2335_s30 }
 0x148   : > { %v3134_v57 = vpop.permute.xlu1 %841  ;;  %v3136_v55 = vpop.permute.xlu0 %839 }
 0x149   : > { %5183 = vst [vmem:[#allocation109_spill] sm:$0xff] %v3134_v57  ;;  %5184 = vst [vmem:[#allocation110_spill] sm:$0xff] %v3136_v55 }
 0x14a   : > { %1070 = vrot.lane.b32.xlu1 %v2559_v24, %s2335_s30  ;;  %1068 = vrot.lane.b32.xlu0 %v2562_v25, %s2335_s30 }
 0x14c   : > { %v3142_v1 = vpop.permute.xlu1 %877  ;;  %v3144_v58 = vpop.permute.xlu0 %875 }
 0x14d   : > { %5185 = vst [vmem:[#allocation111_spill] sm:$0xff] %v3142_v1  ;;  %5186 = vst [vmem:[#allocation112_spill] sm:$0xff] %v3144_v58 }
 0x14e   : > { %1074 = vrot.lane.b32.xlu1 %v2569_v26, %s2335_s30  ;;  %1072 = vrot.lane.b32.xlu0 %v2572_v27, %s2335_s30 }
 0x150   : > { %v3150_v53 = vpop.permute.xlu1 %881  ;;  %v3152_v57 = vpop.permute.xlu0 %879 }
 0x151   : > { %5187 = vst [vmem:[#allocation113_spill] sm:$0xff] %v3150_v53  ;;  %5188 = vst [vmem:[#allocation114_spill] sm:$0xff] %v3152_v57 }
 0x152   : > { %1078 = vrot.lane.b32.xlu1 %v2579_v28, %s2335_s30  ;;  %1076 = vrot.lane.b32.xlu0 %v2582_v29, %s2335_s30 }
 0x154   : > { %v3158_v55 = vpop.permute.xlu1 %885  ;;  %v3160_v1 = vpop.permute.xlu0 %883 }
 0x155   : > { %5189 = vst [vmem:[#allocation115_spill] sm:$0xff] %v3158_v55  ;;  %5190 = vst [vmem:[#allocation116_spill] sm:$0xff] %v3160_v1 }
 0x156   : > { %1082 = vrot.lane.b32.xlu1 %v2589_v30, %s2335_s30  ;;  %1080 = vrot.lane.b32.xlu0 %v2592_v31, %s2335_s30 }
 0x158   : > { %v3166_v58 = vpop.permute.xlu1 %889  ;;  %v3168_v53 = vpop.permute.xlu0 %887 }
 0x159   : > { %5191 = vst [vmem:[#allocation117_spill] sm:$0xff] %v3166_v58  ;;  %5192 = vst [vmem:[#allocation118_spill] sm:$0xff] %v3168_v53 }
 0x15a   : > { %1118 = vrot.lane.b32.xlu1 %v2605_v32, %s2335_s30  ;;  %1116 = vrot.lane.b32.xlu0 %v2608_v33, %s2335_s30 }
 0x15c   : > { %v3174_v57 = vpop.permute.xlu1 %893  ;;  %v3176_v55 = vpop.permute.xlu0 %891 }
 0x15d   : > { %5193 = vst [vmem:[#allocation119_spill] sm:$0xff] %v3174_v57  ;;  %5194 = vst [vmem:[#allocation120_spill] sm:$0xff] %v3176_v55 }
 0x15e   : > { %1122 = vrot.lane.b32.xlu1 %v2615_v34, %s2335_s30  ;;  %1120 = vrot.lane.b32.xlu0 %v2618_v35, %s2335_s30 }
 0x160   : > { %v3182_v1 = vpop.permute.xlu1 %897  ;;  %v3184_v58 = vpop.permute.xlu0 %895 }
 0x161   : > { %5195 = vst [vmem:[#allocation121_spill] sm:$0xff] %v3182_v1  ;;  %5196 = vst [vmem:[#allocation122_spill] sm:$0xff] %v3184_v58 }
 0x162   : > { %1126 = vrot.lane.b32.xlu1 %v2625_v36, %s2335_s30  ;;  %1124 = vrot.lane.b32.xlu0 %v2628_v37, %s2335_s30 }
 0x164   : > { %v3190_v53 = vpop.permute.xlu1 %901  ;;  %v3192_v57 = vpop.permute.xlu0 %899 }
 0x165   : > { %5197 = vst [vmem:[#allocation123_spill] sm:$0xff] %v3190_v53  ;;  %5198 = vst [vmem:[#allocation124_spill] sm:$0xff] %v3192_v57 }
 0x166   : > { %1130 = vrot.lane.b32.xlu1 %v2635_v38, %s2335_s30  ;;  %1128 = vrot.lane.b32.xlu0 %v2638_v39, %s2335_s30 }
 0x168   : > { %v3198_v55 = vpop.permute.xlu1 %905  ;;  %v3200_v1 = vpop.permute.xlu0 %903 }
 0x169   : > { %5199 = vst [vmem:[#allocation125_spill] sm:$0xff] %v3198_v55  ;;  %5200 = vst [vmem:[#allocation126_spill] sm:$0xff] %v3200_v1 }
 0x16a   : > { %1134 = vrot.lane.b32.xlu1 %v2645_v40, %s2335_s30  ;;  %1132 = vrot.lane.b32.xlu0 %v2648_v41, %s2335_s30 }
 0x16c   : > { %v3206_v58 = vpop.permute.xlu1 %933  ;;  %v3208_v53 = vpop.permute.xlu0 %931 }
 0x16d   : > { %5201 = vst [vmem:[#allocation127_spill] sm:$0xff] %v3206_v58  ;;  %5202 = vst [vmem:[#allocation128_spill] sm:$0xff] %v3208_v53 }
 0x16e   : > { %1138 = vrot.lane.b32.xlu1 %v2655_v42, %s2335_s30  ;;  %1136 = vrot.lane.b32.xlu0 %v2658_v43, %s2335_s30 }
 0x170   : > { %v3214_v57 = vpop.permute.xlu1 %937  ;;  %v3216_v55 = vpop.permute.xlu0 %935 }
 0x171   : > { %5203 = vst [vmem:[#allocation129_spill] sm:$0xff] %v3214_v57  ;;  %5204 = vst [vmem:[#allocation130_spill] sm:$0xff] %v3216_v55 }
 0x172   : > { %1142 = vrot.lane.b32.xlu1 %v2665_v44, %s2335_s30  ;;  %1140 = vrot.lane.b32.xlu0 %v2668_v45, %s2335_s30 }
 0x174   : > { %v3222_v1 = vpop.permute.xlu1 %941  ;;  %v3224_v58 = vpop.permute.xlu0 %939 }
 0x175   : > { %5205 = vst [vmem:[#allocation131_spill] sm:$0xff] %v3222_v1  ;;  %5206 = vst [vmem:[#allocation132_spill] sm:$0xff] %v3224_v58 }
 0x176   : > { %1146 = vrot.lane.b32.xlu1 %v2675_v46, %s2335_s30  ;;  %1144 = vrot.lane.b32.xlu0 %v2678_v47, %s2335_s30 }
 0x178   : > { %v3230_v53 = vpop.permute.xlu1 %945  ;;  %v3232_v57 = vpop.permute.xlu0 %943 }
 0x179   : > { %5207 = vst [vmem:[#allocation133_spill] sm:$0xff] %v3230_v53  ;;  %5208 = vst [vmem:[#allocation134_spill] sm:$0xff] %v3232_v57  ;;  %v5213_v57 = vld [vmem:[#allocation11_spill] sm:$0xff] }
 0x17a   : > { %1174 = vrot.lane.b32.xlu1 %v2691_v48, %s2335_s30  ;;  %1172 = vrot.lane.b32.xlu0 %v2694_v49, %s2335_s30  ;;  %v5214_v48 = vld [vmem:[#allocation12_spill] sm:$0xff] }
 0x17c   : > { %v3238_v55 = vpop.permute.xlu1 %949  ;;  %v3240_v1 = vpop.permute.xlu0 %947 }
 0x17d   : > { %5209 = vst [vmem:[#allocation135_spill] sm:$0xff] %v3238_v55  ;;  %5210 = vst [vmem:[#allocation136_spill] sm:$0xff] %v3240_v1  ;;  %v5217_v1 = vld [vmem:[#allocation13_spill] sm:$0xff] }
 0x17e   : > { %1178 = vrot.lane.b32.xlu1 %v2701_v50, %s2335_s30  ;;  %1176 = vrot.lane.b32.xlu0 %v2704_v51, %s2335_s30  ;;  %v5218_v50 = vld [vmem:[#allocation14_spill] sm:$0xff] }
 0x180   : > { %v3246_v58 = vpop.permute.xlu1 %953  ;;  %v3248_v53 = vpop.permute.xlu0 %951 }
 0x181   : > { %5211 = vst [vmem:[#allocation137_spill] sm:$0xff] %v3246_v58  ;;  %5212 = vst [vmem:[#allocation138_spill] sm:$0xff] %v3248_v53 }
 0x182   : > { %1182 = vrot.lane.b32.xlu1 %v5213_v57, %s2335_s30  ;;  %1180 = vrot.lane.b32.xlu0 %v5214_v48, %s2335_s30 }
 0x184   : > { %v3254_v49 = vpop.permute.xlu1 %957  ;;  %v3256_v55 = vpop.permute.xlu0 %955 }
 0x185   : > { %5215 = vst [vmem:[#allocation11_spill] sm:$0xff] %v3254_v49  ;;  %5216 = vst [vmem:[#allocation12_spill] sm:$0xff] %v3256_v55 }
 0x186   : > { %1186 = vrot.lane.b32.xlu1 %v5217_v1, %s2335_s30  ;;  %1184 = vrot.lane.b32.xlu0 %v5218_v50, %s2335_s30 }
 0x188   : > { %v3262_v51 = vpop.permute.xlu1 %961  ;;  %v3264_v58 = vpop.permute.xlu0 %959 }
 0x189   : > { %5219 = vst [vmem:[#allocation13_spill] sm:$0xff] %v3262_v51  ;;  %5220 = vst [vmem:[#allocation14_spill] sm:$0xff] %v3264_v58 }
 0x18a   : > { %1190 = vrot.lane.b32.xlu1 %v5148_v59, %s2335_s30  ;;  %1188 = vrot.lane.b32.xlu0 %v5149_v52, %s2335_s30 }
 0x18c   : > { %v3270_v53 = vpop.permute.xlu1 %997  ;;  %v3272_v49 = vpop.permute.xlu0 %995 }
 0x18d   : > { %5221 = vst [vmem:[#allocation139_spill] sm:$0xff] %v3270_v53  ;;  %5222 = vst [vmem:[#allocation140_spill] sm:$0xff] %v3272_v49 }
 0x18e   : > { %1194 = vrot.lane.b32.xlu1 %v5152_v56, %s2335_s30  ;;  %1192 = vrot.lane.b32.xlu0 %v5153_v54, %s2335_s30 }
 0x190   : > { %v3278_v55 = vpop.permute.xlu1 %1001  ;;  %v3280_v51 = vpop.permute.xlu0 %999 }
 0x191   : > { %5223 = vst [vmem:[#allocation141_spill] sm:$0xff] %v3278_v55  ;;  %5224 = vst [vmem:[#allocation142_spill] sm:$0xff] %v3280_v51  ;;  %v5229_v51 = vld [vmem:[#allocation6_spill] sm:$0xff] }
 0x192   : > { %1198 = vrot.lane.b32.xlu1 %v2755_v62, %s2335_s30  ;;  %1196 = vrot.lane.b32.xlu0 %v2758_v63, %s2335_s30 }
 0x194   : > { %v3286_v58 = vpop.permute.xlu1 %1005  ;;  %v3288_v53 = vpop.permute.xlu0 %1003 }
 0x195   : > { %5225 = vst [vmem:[#allocation143_spill] sm:$0xff] %v3286_v58  ;;  %5226 = vst [vmem:[#allocation144_spill] sm:$0xff] %v3288_v53 }
 0x196   : > { %1202 = vrot.lane.b32.xlu1 %v2769_v61, %s2335_s30  ;;  %1200 = vrot.lane.b32.xlu0 %v2772_v60, %s2335_s30  ;;  %s2145_s30 = sshll.u32 %s2396_s22, 7  ;;  %s2344_s22 = smov [#allocation3]  }
 0x197   : > { %s2017_s11 = scalar_lea.hbm %s5033_s5, %s2145_s30 }
 0x198   : > { %v3294_v49 = vpop.permute.xlu1 %1009  ;;  %v3296_v55 = vpop.permute.xlu0 %1007 }
 0x199   : > { %5227 = vst [vmem:[#allocation145_spill] sm:$0xff] %v3294_v49  ;;  %5228 = vst [vmem:[#allocation146_spill] sm:$0xff] %v3296_v55 }
 0x19a   : > { %1238 = vrot.lane.b32.xlu1 %v2446_v3, %s2336_s6  ;;  %1236 = vrot.lane.b32.xlu0 %v5229_v51, %s2336_s6 }
 0x19c   : > { %v3302_v58 = vpop.permute.xlu1 %1013  ;;  %v3304_v53 = vpop.permute.xlu0 %1011 }
 0x19d   : > { %5230 = vst [vmem:[#allocation6_spill] sm:$0xff] %v3302_v58  ;;  %5231 = vst [vmem:[#allocation147_spill] sm:$0xff] %v3304_v53  ;;  %v3555_v53 = vld [vmem:[%s2430_s9 + $0x8] sm:$0xff]  ;;  %v3560_v58 = vld [vmem:[%s2430_s9] sm:$0xff] }
 0x19e   : > { %1242 = vrot.lane.b32.xlu1 %v2443_v2, %s2336_s6  ;;  %1240 = vrot.lane.b32.xlu0 %v2433_v0, %s2336_s6 }
 0x1a0   : > { %v3310_v49 = vpop.permute.xlu1 %1017  ;;  %v3312_v55 = vpop.permute.xlu0 %1015 }
 0x1a1   : > { %5232 = vst [vmem:[#allocation148_spill] sm:$0xff] %v3310_v49  ;;  %5233 = vst [vmem:[#allocation149_spill] sm:$0xff] %v3312_v55 }
 0x1a2   : > { %1246 = vrot.lane.b32.xlu1 %v2453_v4, %s2336_s6  ;;  %1244 = vrot.lane.b32.xlu0 %v2456_v5, %s2336_s6 }
 0x1a4   : > { %v3318_v3 = vpop.permute.xlu1 %1021  ;;  %v3320_v51 = vpop.permute.xlu0 %1019 }
 0x1a5   : > { %5234 = vst [vmem:[#allocation150_spill] sm:$0xff] %v3318_v3  ;;  %5235 = vst [vmem:[#allocation151_spill] sm:$0xff] %v3320_v51 }
 0x1a6   : > { %1250 = vrot.lane.b32.xlu1 %v2463_v6, %s2336_s6  ;;  %1248 = vrot.lane.b32.xlu0 %v2466_v7, %s2336_s6 }
 0x1a8   : > { %v3326_v0 = vpop.permute.xlu1 %1025  ;;  %v3328_v2 = vpop.permute.xlu0 %1023 }
 0x1a9   : > { %5236 = vst [vmem:[#allocation152_spill] sm:$0xff] %v3326_v0  ;;  %5237 = vst [vmem:[#allocation153_spill] sm:$0xff] %v3328_v2 }
 0x1aa   : > { %1254 = vrot.lane.b32.xlu1 %v2473_v8, %s2336_s6  ;;  %1252 = vrot.lane.b32.xlu0 %v2476_v9, %s2336_s6 }
 0x1ac   : > { %v3334_v4 = vpop.permute.xlu1 %1054  ;;  %v3336_v5 = vpop.permute.xlu0 %1052 }
 0x1ae   : > { %1258 = vrot.lane.b32.xlu1 %v2483_v10, %s2336_s6  ;;  %1256 = vrot.lane.b32.xlu0 %v2486_v11, %s2336_s6 }
 0x1b0   : > { %v3342_v6 = vpop.permute.xlu1 %1058  ;;  %v3344_v7 = vpop.permute.xlu0 %1056 }
 0x1b1   : > { %5238 = vst [vmem:[#allocation154_spill] sm:$0xff] %v3342_v6  ;;  %5239 = vst [vmem:[#allocation155_spill] sm:$0xff] %v3344_v7 }
 0x1b2   : > { %1262 = vrot.lane.b32.xlu1 %v2493_v12, %s2336_s6  ;;  %1260 = vrot.lane.b32.xlu0 %v2496_v13, %s2336_s6 }
 0x1b4   : > { %v3350_v8 = vpop.permute.xlu1 %1062  ;;  %v3352_v9 = vpop.permute.xlu0 %1060 }
 0x1b5   : > { %5240 = vst [vmem:[#allocation156_spill] sm:$0xff] %v3350_v8  ;;  %5241 = vst [vmem:[#allocation157_spill] sm:$0xff] %v3352_v9  ;;  %v5276_v9 = vld [vmem:[#allocation7_spill] sm:$0xff] }
 0x1b6   : > { %1266 = vrot.lane.b32.xlu1 %v2503_v14, %s2336_s6  ;;  %1264 = vrot.lane.b32.xlu0 %v2506_v15, %s2336_s6 }
 0x1b8   : > { %v3358_v10 = vpop.permute.xlu1 %1066  ;;  %v3360_v11 = vpop.permute.xlu0 %1064 }
 0x1b9   : > { %5242 = vst [vmem:[#allocation158_spill] sm:$0xff] %v3358_v10  ;;  %5243 = vst [vmem:[#allocation159_spill] sm:$0xff] %v3360_v11  ;;  %v2236_v11 = vld [vmem:[%s2598_s16 + $0x48] sm:$0xff]  ;;  %v3789_v10 = vld [vmem:[%s2598_s16 + $0x58] sm:$0xff] }
 0x1ba   : > { %1295 = vrot.lane.b32.xlu1 %v2519_v16, %s2336_s6  ;;  %1293 = vrot.lane.b32.xlu0 %v2522_v17, %s2336_s6 }
 0x1bc   : > { %v3366_v12 = vpop.permute.xlu1 %1070  ;;  %v3368_v13 = vpop.permute.xlu0 %1068 }
 0x1bd   : > { %5244 = vst [vmem:[#allocation160_spill] sm:$0xff] %v3366_v12  ;;  %5245 = vst [vmem:[#allocation161_spill] sm:$0xff] %v3368_v13  ;;  %v2206_v13 = vld [vmem:[%s2430_s9 + $0x38] sm:$0xff]  ;;  %v3582_v12 = vld [vmem:[%s2430_s9 + $0x30] sm:$0xff] }
 0x1be   : > { %1299 = vrot.lane.b32.xlu1 %v2529_v18, %s2336_s6  ;;  %1297 = vrot.lane.b32.xlu0 %v2532_v19, %s2336_s6 }
 0x1c0   : > { %v3374_v14 = vpop.permute.xlu1 %1074  ;;  %v3376_v15 = vpop.permute.xlu0 %1072 }
 0x1c1   : > { %5246 = vst [vmem:[#allocation162_spill] sm:$0xff] %v3374_v14  ;;  %5247 = vst [vmem:[#allocation163_spill] sm:$0xff] %v3376_v15  ;;  %v3739_v15 = vld [vmem:[%s2598_s16 + $0x8] sm:$0xff]  ;;  %v3744_v14 = vld [vmem:[%s2598_s16] sm:$0xff] }
 0x1c2   : > { %1303 = vrot.lane.b32.xlu1 %v2539_v20, %s2336_s6  ;;  %1301 = vrot.lane.b32.xlu0 %v2542_v21, %s2336_s6 }
 0x1c4   : > { %v3382_v16 = vpop.permute.xlu1 %1078  ;;  %v3384_v17 = vpop.permute.xlu0 %1076 }
 0x1c5   : > { %5248 = vst [vmem:[#allocation164_spill] sm:$0xff] %v3382_v16  ;;  %5249 = vst [vmem:[#allocation165_spill] sm:$0xff] %v3384_v17 }
 0x1c6   : > { %1307 = vrot.lane.b32.xlu1 %v2549_v22, %s2336_s6  ;;  %1305 = vrot.lane.b32.xlu0 %v2552_v23, %s2336_s6 }
 0x1c8   : > { %v3390_v18 = vpop.permute.xlu1 %1082  ;;  %v3392_v19 = vpop.permute.xlu0 %1080 }
 0x1c9   : > { %5250 = vst [vmem:[#allocation166_spill] sm:$0xff] %v3390_v18  ;;  %5251 = vst [vmem:[#allocation167_spill] sm:$0xff] %v3392_v19 }
 0x1ca   : > { %1311 = vrot.lane.b32.xlu1 %v2559_v24, %s2336_s6  ;;  %1309 = vrot.lane.b32.xlu0 %v2562_v25, %s2336_s6 }
 0x1cc   : > { %v3398_v20 = vpop.permute.xlu1 %1118  ;;  %v3400_v21 = vpop.permute.xlu0 %1116 }
 0x1cd   : > { %5252 = vst [vmem:[#allocation168_spill] sm:$0xff] %v3398_v20  ;;  %5253 = vst [vmem:[#allocation169_spill] sm:$0xff] %v3400_v21 }
 0x1ce   : > { %1315 = vrot.lane.b32.xlu1 %v2569_v26, %s2336_s6  ;;  %1313 = vrot.lane.b32.xlu0 %v2572_v27, %s2336_s6 }
 0x1d0   : > { %v3406_v22 = vpop.permute.xlu1 %1122  ;;  %v3408_v23 = vpop.permute.xlu0 %1120 }
 0x1d1   : > { %5254 = vst [vmem:[#allocation170_spill] sm:$0xff] %v3406_v22  ;;  %5255 = vst [vmem:[#allocation171_spill] sm:$0xff] %v3408_v23  ;;  %v3845_v23 = vld [vmem:[%s2684_s25 + $0x18] sm:$0xff] }
 0x1d2   : > { %1319 = vrot.lane.b32.xlu1 %v2579_v28, %s2336_s6  ;;  %1317 = vrot.lane.b32.xlu0 %v2582_v29, %s2336_s6 }
 0x1d4   : > { %v3414_v24 = vpop.permute.xlu1 %1126  ;;  %v3416_v25 = vpop.permute.xlu0 %1124 }
 0x1d5   : > { %5256 = vst [vmem:[#allocation172_spill] sm:$0xff] %v3414_v24  ;;  %5257 = vst [vmem:[#allocation173_spill] sm:$0xff] %v3416_v25 }
 0x1d6   : > { %1323 = vrot.lane.b32.xlu1 %v2589_v30, %s2336_s6  ;;  %1321 = vrot.lane.b32.xlu0 %v2592_v31, %s2336_s6 }
 0x1d8   : > { %v3422_v26 = vpop.permute.xlu1 %1130  ;;  %v3424_v27 = vpop.permute.xlu0 %1128 }
 0x1d9   : > { %5258 = vst [vmem:[#allocation174_spill] sm:$0xff] %v3422_v26  ;;  %5259 = vst [vmem:[#allocation175_spill] sm:$0xff] %v3424_v27 }
 0x1da   : > { %1359 = vrot.lane.b32.xlu1 %v2605_v32, %s2336_s6  ;;  %1357 = vrot.lane.b32.xlu0 %v2608_v33, %s2336_s6 }
 0x1dc   : > { %v3430_v28 = vpop.permute.xlu1 %1134  ;;  %v3432_v29 = vpop.permute.xlu0 %1132 }
 0x1dd   : > { %5260 = vst [vmem:[#allocation176_spill] sm:$0xff] %v3430_v28  ;;  %5261 = vst [vmem:[#allocation177_spill] sm:$0xff] %v3432_v29 }
 0x1de   : > { %1363 = vrot.lane.b32.xlu1 %v2615_v34, %s2336_s6  ;;  %1361 = vrot.lane.b32.xlu0 %v2618_v35, %s2336_s6 }
 0x1e0   : > { %v3438_v30 = vpop.permute.xlu1 %1138  ;;  %v3440_v31 = vpop.permute.xlu0 %1136 }
 0x1e1   : > { %5262 = vst [vmem:[#allocation178_spill] sm:$0xff] %v3438_v30  ;;  %5263 = vst [vmem:[#allocation179_spill] sm:$0xff] %v3440_v31  ;;  %v5280_v31 = vld [vmem:[#allocation9_spill] sm:$0xff] }
 0x1e2   : > { %1367 = vrot.lane.b32.xlu1 %v2625_v36, %s2336_s6  ;;  %1365 = vrot.lane.b32.xlu0 %v2628_v37, %s2336_s6 }
 0x1e4   : > { %v3446_v32 = vpop.permute.xlu1 %1142  ;;  %v3448_v33 = vpop.permute.xlu0 %1140 }
 0x1e5   : > { %5264 = vst [vmem:[#allocation180_spill] sm:$0xff] %v3446_v32  ;;  %5265 = vst [vmem:[#allocation181_spill] sm:$0xff] %v3448_v33 }
 0x1e6   : > { %1371 = vrot.lane.b32.xlu1 %v2635_v38, %s2336_s6  ;;  %1369 = vrot.lane.b32.xlu0 %v2638_v39, %s2336_s6 }
 0x1e8   : > { %v3454_v34 = vpop.permute.xlu1 %1146  ;;  %v3456_v35 = vpop.permute.xlu0 %1144 }
 0x1e9   : > { %5266 = vst [vmem:[#allocation182_spill] sm:$0xff] %v3454_v34  ;;  %5267 = vst [vmem:[#allocation183_spill] sm:$0xff] %v3456_v35  ;;  %v5392_v35 = vld [vmem:[#allocation22_spill] sm:$0xff] }
 0x1ea   : > { %1375 = vrot.lane.b32.xlu1 %v2645_v40, %s2336_s6  ;;  %1373 = vrot.lane.b32.xlu0 %v2648_v41, %s2336_s6  ;;  %v5423_v34 = vld [vmem:[#allocation34_spill] sm:$0xff] }
 0x1ec   : > { %v3462_v36 = vpop.permute.xlu1 %1174  ;;  %v3464_v37 = vpop.permute.xlu0 %1172 }
 0x1ed   : > { %5268 = vst [vmem:[#allocation184_spill] sm:$0xff] %v3462_v36  ;;  %5269 = vst [vmem:[#allocation185_spill] sm:$0xff] %v3464_v37  ;;  %v3725_v37 = vld [vmem:[%s2512_s13 + $0x78] sm:$0xff]  ;;  %v3730_v36 = vld [vmem:[%s2512_s13 + $0x70] sm:$0xff] }
 0x1ee   : > { %1379 = vrot.lane.b32.xlu1 %v2655_v42, %s2336_s6  ;;  %1377 = vrot.lane.b32.xlu0 %v2658_v43, %s2336_s6 }
 0x1f0   : > { %v3470_v38 = vpop.permute.xlu1 %1178  ;;  %v3472_v39 = vpop.permute.xlu0 %1176 }
 0x1f1   : > { %5270 = vst [vmem:[#allocation186_spill] sm:$0xff] %v3470_v38  ;;  %5271 = vst [vmem:[#allocation187_spill] sm:$0xff] %v3472_v39  ;;  %v2248_v39 = vld [vmem:[%s2684_s25 + $0x28] sm:$0xff] }
 0x1f2   : > { %1383 = vrot.lane.b32.xlu1 %v2665_v44, %s2336_s6  ;;  %1381 = vrot.lane.b32.xlu0 %v2668_v45, %s2336_s6  ;;  %v5277_v44 = vld [vmem:[#allocation8_spill] sm:$0xff] }
 0x1f4   : > { %v3478_v40 = vpop.permute.xlu1 %1182  ;;  %v3480_v41 = vpop.permute.xlu0 %1180 }
 0x1f5   : > { %5272 = vst [vmem:[#allocation188_spill] sm:$0xff] %v3478_v40  ;;  %5273 = vst [vmem:[#allocation189_spill] sm:$0xff] %v3480_v41 }
 0x1f6   : > { %1387 = vrot.lane.b32.xlu1 %v2675_v46, %s2336_s6  ;;  %1385 = vrot.lane.b32.xlu0 %v2678_v47, %s2336_s6  ;;  %v5281_v46 = vld [vmem:[#allocation10_spill] sm:$0xff] }
 0x1f8   : > { %v3486_v42 = vpop.permute.xlu1 %1186  ;;  %v3488_v43 = vpop.permute.xlu0 %1184 }
 0x1f9   : > { %5274 = vst [vmem:[#allocation190_spill] sm:$0xff] %v3486_v42  ;;  %5275 = vst [vmem:[#allocation191_spill] sm:$0xff] %v3488_v43 }
 0x1fa   : > { %1415 = vrot.lane.b32.xlu1 %v5276_v9, %s2336_s6  ;;  %1413 = vrot.lane.b32.xlu0 %v5277_v44, %s2336_s6 }
 0x1fc   : > { %v3494_v45 = vpop.permute.xlu1 %1190  ;;  %v3496_v8 = vpop.permute.xlu0 %1188 }
 0x1fd   : > { %5278 = vst [vmem:[#allocation7_spill] sm:$0xff] %v3494_v45  ;;  %5279 = vst [vmem:[#allocation8_spill] sm:$0xff] %v3496_v8 }
 0x1fe   : > { %1419 = vrot.lane.b32.xlu1 %v5280_v31, %s2336_s6  ;;  %1417 = vrot.lane.b32.xlu0 %v5281_v46, %s2336_s6 }
 0x200   : > { %v3502_v47 = vpop.permute.xlu1 %1194  ;;  %v3504_v30 = vpop.permute.xlu0 %1192 }
 0x201   : > { %5282 = vst [vmem:[#allocation9_spill] sm:$0xff] %v3502_v47  ;;  %5283 = vst [vmem:[#allocation10_spill] sm:$0xff] %v3504_v30 }
 0x202   : > { %1423 = vrot.lane.b32.xlu1 %v5213_v57, %s2336_s6  ;;  %1421 = vrot.lane.b32.xlu0 %v5214_v48, %s2336_s6 }
 0x204   : > { %v3510_v9 = vpop.permute.xlu1 %1198  ;;  %v3512_v44 = vpop.permute.xlu0 %1196 }
 0x205   : > { %5284 = vst [vmem:[#allocation192_spill] sm:$0xff] %v3510_v9  ;;  %5285 = vst [vmem:[#allocation193_spill] sm:$0xff] %v3512_v44  ;;  %v2220_v44 = vld [vmem:[%s2512_s13 + $0x38] sm:$0xff]  ;;  %v3683_v9 = vld [vmem:[%s2512_s13 + $0x48] sm:$0xff] }
 0x206   : > { %1427 = vrot.lane.b32.xlu1 %v5217_v1, %s2336_s6  ;;  %1425 = vrot.lane.b32.xlu0 %v5218_v50, %s2336_s6 }
 0x208   : > { %v3518_v31 = vpop.permute.xlu1 %1202  ;;  %v3520_v46 = vpop.permute.xlu0 %1200 }
 0x209   : > { %5286 = vst [vmem:[#allocation194_spill] sm:$0xff] %v3518_v31  ;;  %5287 = vst [vmem:[#allocation195_spill] sm:$0xff] %v3520_v46  ;;  %v5461_v31 = vld [vmem:[#allocation66_spill] sm:$0xff] }
 0x20a   : > { %1431 = vrot.lane.b32.xlu1 %v5148_v59, %s2336_s6  ;;  %1429 = vrot.lane.b32.xlu0 %v5149_v52, %s2336_s6 }
 0x20c   : > { %v3526_v48 = vpop.permute.xlu1 %1238  ;;  %v3528_v57 = vpop.permute.xlu0 %1236 }
 0x20d   : > { %5288 = vst [vmem:[#allocation196_spill] sm:$0xff] %v3526_v48  ;;  %5289 = vst [vmem:[#allocation197_spill] sm:$0xff] %v3528_v57  ;;  %v3619_v57 = vld [vmem:[%s2430_s9 + $0x68] sm:$0xff]  ;;  %v3624_v48 = vld [vmem:[%s2430_s9 + $0x60] sm:$0xff] }
 0x20e   : > { %1435 = vrot.lane.b32.xlu1 %v5152_v56, %s2336_s6  ;;  %1433 = vrot.lane.b32.xlu0 %v5153_v54, %s2336_s6  ;;  %5306 = vst [vmem:[#allocation214_spill] sm:$0xff] %v3619_v57  ;;  %5307 = vst [vmem:[#allocation215_spill] sm:$0xff] %v3624_v48 }
 0x210   : > { %v3534_v1 = vpop.permute.xlu1 %1242  ;;  %v3536_v50 = vpop.permute.xlu0 %1240 }
 0x211   : > { %5290 = vst [vmem:[#allocation198_spill] sm:$0xff] %v3534_v1  ;;  %5291 = vst [vmem:[#allocation199_spill] sm:$0xff] %v3536_v50 }
 0x212   : > { %1439 = vrot.lane.b32.xlu1 %v2755_v62, %s2336_s6  ;;  %1437 = vrot.lane.b32.xlu0 %v2758_v63, %s2336_s6 }
 0x214   : > { %v3542_v27 = vpop.permute.xlu1 %1246  ;;  %v3544_v26 = vpop.permute.xlu0 %1244 }
 0x215   : > { %5292 = vst [vmem:[#allocation200_spill] sm:$0xff] %v3542_v27  ;;  %5293 = vst [vmem:[#allocation201_spill] sm:$0xff] %v3544_v26 }
 0x216   : > { %1443 = vrot.lane.b32.xlu1 %v2769_v61, %s2336_s6  ;;  %1441 = vrot.lane.b32.xlu0 %v2772_v60, %s2336_s6 }
 0x218   : > { %v3550_v50 = vpop.permute.xlu1 %1250  ;;  %v3552_v1 = vpop.permute.xlu0 %1248 }
 0x219   : > { %5294 = vst [vmem:[#allocation202_spill] sm:$0xff] %v3550_v50  ;;  %5295 = vst [vmem:[#allocation203_spill] sm:$0xff] %v3552_v1  ;;  %v2204_v50 = vld [vmem:[%s2430_s9 + $0x18] sm:$0xff]  ;;  %v3571_v1 = vld [vmem:[%s2430_s9 + $0x10] sm:$0xff] }
 0x21a   : > { %1479 = vrot.lane.b32.xlu1 %v3555_v53, %s2337_s7  ;;  %1477 = vrot.lane.b32.xlu0 %v3560_v58, %s2337_s7 }
 0x21c   : > { %v3564_v30 = vpop.permute.xlu1 %1254  ;;  %v3566_v47 = vpop.permute.xlu0 %1252 }
 0x21d   : > { %5296 = vst [vmem:[#allocation204_spill] sm:$0xff] %v3564_v30  ;;  %5297 = vst [vmem:[#allocation205_spill] sm:$0xff] %v3566_v47  ;;  %v3591_v30 = vld [vmem:[%s2430_s9 + $0x48] sm:$0xff] }
 0x21e   : > { %1483 = vrot.lane.b32.xlu1 %v2204_v50, %s2337_s7  ;;  %1481 = vrot.lane.b32.xlu0 %v3571_v1, %s2337_s7 }
 0x220   : > { %v3575_v43 = vpop.permute.xlu1 %1258  ;;  %v3577_v42 = vpop.permute.xlu0 %1256 }
 0x221   : > { %5298 = vst [vmem:[#allocation206_spill] sm:$0xff] %v3575_v43  ;;  %5299 = vst [vmem:[#allocation207_spill] sm:$0xff] %v3577_v42  ;;  %v3596_v42 = vld [vmem:[%s2430_s9 + $0x40] sm:$0xff] }
 0x222   : > { %1487 = vrot.lane.b32.xlu1 %v2206_v13, %s2337_s7  ;;  %1485 = vrot.lane.b32.xlu0 %v3582_v12, %s2337_s7 }
 0x224   : > { %v3586_v50 = vpop.permute.xlu1 %1262  ;;  %v3588_v47 = vpop.permute.xlu0 %1260 }
 0x225   : > { %5300 = vst [vmem:[#allocation208_spill] sm:$0xff] %v3586_v50  ;;  %5301 = vst [vmem:[#allocation209_spill] sm:$0xff] %v3588_v47  ;;  %v3605_v50 = vld [vmem:[%s2430_s9 + $0x58] sm:$0xff]  ;;  %v3610_v47 = vld [vmem:[%s2430_s9 + $0x50] sm:$0xff] }
 0x226   : > { %1491 = vrot.lane.b32.xlu1 %v3591_v30, %s2337_s7  ;;  %1489 = vrot.lane.b32.xlu0 %v3596_v42, %s2337_s7 }
 0x228   : > { %v3600_v13 = vpop.permute.xlu1 %1266  ;;  %v3602_v43 = vpop.permute.xlu0 %1264 }
 0x229   : > { %5302 = vst [vmem:[#allocation210_spill] sm:$0xff] %v3600_v13  ;;  %5303 = vst [vmem:[#allocation211_spill] sm:$0xff] %v3602_v43 }
 0x22a   : > { %1495 = vrot.lane.b32.xlu1 %v3605_v50, %s2337_s7  ;;  %1493 = vrot.lane.b32.xlu0 %v3610_v47, %s2337_s7 }
 0x22c   : > { %v3614_v26 = vpop.permute.xlu1 %1295  ;;  %v3616_v27 = vpop.permute.xlu0 %1293 }
 0x22d   : > { %5304 = vst [vmem:[#allocation212_spill] sm:$0xff] %v3614_v26  ;;  %5305 = vst [vmem:[#allocation213_spill] sm:$0xff] %v3616_v27  ;;  %v3633_v26 = vld [vmem:[%s2430_s9 + $0x78] sm:$0xff]  ;;  %v3638_v27 = vld [vmem:[%s2430_s9 + $0x70] sm:$0xff] }
 0x22e   : > { %1499 = vrot.lane.b32.xlu1 %v3619_v57, %s2337_s7  ;;  %1497 = vrot.lane.b32.xlu0 %v3624_v48, %s2337_s7 }
 0x230   : > { %v3628_v33 = vpop.permute.xlu1 %1299  ;;  %v3630_v32 = vpop.permute.xlu0 %1297 }
 0x231   : > { %5308 = vst [vmem:[#allocation216_spill] sm:$0xff] %v3628_v33  ;;  %5309 = vst [vmem:[#allocation217_spill] sm:$0xff] %v3630_v32  ;;  %v3647_v33 = vld [vmem:[%s2512_s13 + $0x8] sm:$0xff]  ;;  %v3652_v32 = vld [vmem:[%s2512_s13] sm:$0xff] }
 0x232   : > { %1503 = vrot.lane.b32.xlu1 %v3633_v26, %s2337_s7  ;;  %1501 = vrot.lane.b32.xlu0 %v3638_v27, %s2337_s7 }
 0x234   : > { %v3642_v29 = vpop.permute.xlu1 %1303  ;;  %v3644_v28 = vpop.permute.xlu0 %1301 }
 0x235   : > { %5310 = vst [vmem:[#allocation218_spill] sm:$0xff] %v3642_v29  ;;  %5311 = vst [vmem:[#allocation219_spill] sm:$0xff] %v3644_v28  ;;  %v2218_v29 = vld [vmem:[%s2512_s13 + $0x18] sm:$0xff]  ;;  %v3663_v28 = vld [vmem:[%s2512_s13 + $0x10] sm:$0xff] }
 0x236   : > { %1529 = vrot.lane.b32.xlu1 %v3647_v33, %s2337_s7  ;;  %1527 = vrot.lane.b32.xlu0 %v3652_v32, %s2337_s7 }
 0x238   : > { %v3656_v25 = vpop.permute.xlu1 %1307  ;;  %v3658_v24 = vpop.permute.xlu0 %1305 }
 0x239   : > { %5312 = vst [vmem:[#allocation220_spill] sm:$0xff] %v3656_v25  ;;  %5313 = vst [vmem:[#allocation221_spill] sm:$0xff] %v3658_v24  ;;  %v3674_v25 = vld [vmem:[%s2512_s13 + $0x30] sm:$0xff] }
 0x23a   : > { %1533 = vrot.lane.b32.xlu1 %v2218_v29, %s2337_s7  ;;  %1531 = vrot.lane.b32.xlu0 %v3663_v28, %s2337_s7 }
 0x23c   : > { %v3667_v21 = vpop.permute.xlu1 %1311  ;;  %v3669_v20 = vpop.permute.xlu0 %1309 }
 0x23d   : > { %5314 = vst [vmem:[#allocation222_spill] sm:$0xff] %v3667_v21  ;;  %5315 = vst [vmem:[#allocation223_spill] sm:$0xff] %v3669_v20  ;;  %v3688_v20 = vld [vmem:[%s2512_s13 + $0x40] sm:$0xff] }
 0x23e   : > { %1537 = vrot.lane.b32.xlu1 %v2220_v44, %s2337_s7  ;;  %1535 = vrot.lane.b32.xlu0 %v3674_v25, %s2337_s7 }
 0x240   : > { %v3678_v29 = vpop.permute.xlu1 %1315  ;;  %v3680_v24 = vpop.permute.xlu0 %1313 }
 0x241   : > { %5316 = vst [vmem:[#allocation224_spill] sm:$0xff] %v3678_v29  ;;  %5317 = vst [vmem:[#allocation225_spill] sm:$0xff] %v3680_v24  ;;  %v3697_v29 = vld [vmem:[%s2512_s13 + $0x58] sm:$0xff]  ;;  %v3702_v24 = vld [vmem:[%s2512_s13 + $0x50] sm:$0xff] }
 0x242   : > { %1541 = vrot.lane.b32.xlu1 %v3683_v9, %s2337_s7  ;;  %1539 = vrot.lane.b32.xlu0 %v3688_v20, %s2337_s7 }
 0x244   : > { %v3692_v44 = vpop.permute.xlu1 %1319  ;;  %v3694_v21 = vpop.permute.xlu0 %1317 }
 0x245   : > { %5318 = vst [vmem:[#allocation226_spill] sm:$0xff] %v3692_v44  ;;  %5319 = vst [vmem:[#allocation227_spill] sm:$0xff] %v3694_v21  ;;  %v3711_v44 = vld [vmem:[%s2512_s13 + $0x68] sm:$0xff]  ;;  %v3716_v21 = vld [vmem:[%s2512_s13 + $0x60] sm:$0xff] }
 0x246   : > { %1545 = vrot.lane.b32.xlu1 %v3697_v29, %s2337_s7  ;;  %1543 = vrot.lane.b32.xlu0 %v3702_v24, %s2337_s7  ;;  %5322 = vst [vmem:[#allocation230_spill] sm:$0xff] %v3711_v44  ;;  %5323 = vst [vmem:[#allocation231_spill] sm:$0xff] %v3716_v21 }
 0x248   : > { %v3706_v8 = vpop.permute.xlu1 %1323  ;;  %v3708_v45 = vpop.permute.xlu0 %1321 }
 0x249   : > { %5320 = vst [vmem:[#allocation228_spill] sm:$0xff] %v3706_v8  ;;  %5321 = vst [vmem:[#allocation229_spill] sm:$0xff] %v3708_v45 }
 0x24a   : > { %1549 = vrot.lane.b32.xlu1 %v3711_v44, %s2337_s7  ;;  %1547 = vrot.lane.b32.xlu0 %v3716_v21, %s2337_s7 }
 0x24c   : > { %v3720_v41 = vpop.permute.xlu1 %1359  ;;  %v3722_v40 = vpop.permute.xlu0 %1357 }
 0x24d   : > { %5324 = vst [vmem:[#allocation232_spill] sm:$0xff] %v3720_v41  ;;  %5325 = vst [vmem:[#allocation233_spill] sm:$0xff] %v3722_v40 }
 0x24e   : > { %1553 = vrot.lane.b32.xlu1 %v3725_v37, %s2337_s7  ;;  %1551 = vrot.lane.b32.xlu0 %v3730_v36, %s2337_s7 }
 0x250   : > { %v3734_v19 = vpop.permute.xlu1 %1363  ;;  %v3736_v18 = vpop.permute.xlu0 %1361 }
 0x251   : > { %5326 = vst [vmem:[#allocation234_spill] sm:$0xff] %v3734_v19  ;;  %5327 = vst [vmem:[#allocation235_spill] sm:$0xff] %v3736_v18  ;;  %v3753_v19 = vld [vmem:[%s2598_s16 + $0x18] sm:$0xff]  ;;  %v3758_v18 = vld [vmem:[%s2598_s16 + $0x10] sm:$0xff] }
 0x252   : > { %1585 = vrot.lane.b32.xlu1 %v3739_v15, %s2337_s7  ;;  %1583 = vrot.lane.b32.xlu0 %v3744_v14, %s2337_s7 }
 0x254   : > { %v3748_v2 = vpop.permute.xlu1 %1367  ;;  %v3750_v0 = vpop.permute.xlu0 %1365 }
 0x255   : > { %5328 = vst [vmem:[#allocation236_spill] sm:$0xff] %v3748_v2  ;;  %5329 = vst [vmem:[#allocation237_spill] sm:$0xff] %v3750_v0  ;;  %v2234_v2 = vld [vmem:[%s2598_s16 + $0x28] sm:$0xff]  ;;  %v3769_v0 = vld [vmem:[%s2598_s16 + $0x20] sm:$0xff] }
 0x256   : > { %1589 = vrot.lane.b32.xlu1 %v3753_v19, %s2337_s7  ;;  %1587 = vrot.lane.b32.xlu0 %v3758_v18, %s2337_s7 }
 0x258   : > { %v3762_v40 = vpop.permute.xlu1 %1371  ;;  %v3764_v41 = vpop.permute.xlu0 %1369 }
 0x259   : > { %5330 = vst [vmem:[#allocation238_spill] sm:$0xff] %v3762_v40  ;;  %5331 = vst [vmem:[#allocation239_spill] sm:$0xff] %v3764_v41  ;;  %v3780_v40 = vld [vmem:[%s2598_s16 + $0x40] sm:$0xff] }
 0x25a   : > { %1593 = vrot.lane.b32.xlu1 %v2234_v2, %s2337_s7  ;;  %1591 = vrot.lane.b32.xlu0 %v3769_v0, %s2337_s7 }
 0x25c   : > { %v3773_v43 = vpop.permute.xlu1 %1375  ;;  %v3775_v13 = vpop.permute.xlu0 %1373 }
 0x25d   : > { %5332 = vst [vmem:[#allocation240_spill] sm:$0xff] %v3773_v43  ;;  %5333 = vst [vmem:[#allocation241_spill] sm:$0xff] %v3775_v13  ;;  %v3794_v13 = vld [vmem:[%s2598_s16 + $0x50] sm:$0xff] }
 0x25e   : > { %1597 = vrot.lane.b32.xlu1 %v2236_v11, %s2337_s7  ;;  %1595 = vrot.lane.b32.xlu0 %v3780_v40, %s2337_s7 }
 0x260   : > { %v3784_v2 = vpop.permute.xlu1 %1379  ;;  %v3786_v41 = vpop.permute.xlu0 %1377 }
 0x261   : > { %5334 = vst [vmem:[#allocation242_spill] sm:$0xff] %v3784_v2  ;;  %5335 = vst [vmem:[#allocation243_spill] sm:$0xff] %v3786_v41  ;;  %v3803_v2 = vld [vmem:[%s2598_s16 + $0x68] sm:$0xff]  ;;  %v3808_v41 = vld [vmem:[%s2598_s16 + $0x60] sm:$0xff] }
 0x262   : > { %1601 = vrot.lane.b32.xlu1 %v3789_v10, %s2337_s7  ;;  %1599 = vrot.lane.b32.xlu0 %v3794_v13, %s2337_s7  ;;  %5338 = vst [vmem:[#allocation246_spill] sm:$0xff] %v3803_v2  ;;  %5339 = vst [vmem:[#allocation247_spill] sm:$0xff] %v3808_v41 }
 0x264   : > { %v3798_v11 = vpop.permute.xlu1 %1383  ;;  %v3800_v43 = vpop.permute.xlu0 %1381 }
 0x265   : > { %5336 = vst [vmem:[#allocation244_spill] sm:$0xff] %v3798_v11  ;;  %5337 = vst [vmem:[#allocation245_spill] sm:$0xff] %v3800_v43  ;;  %v3817_v11 = vld [vmem:[%s2598_s16 + $0x78] sm:$0xff]  ;;  %v3822_v43 = vld [vmem:[%s2598_s16 + $0x70] sm:$0xff] }
 0x266   : > { %1605 = vrot.lane.b32.xlu1 %v3803_v2, %s2337_s7  ;;  %1603 = vrot.lane.b32.xlu0 %v3808_v41, %s2337_s7  ;;  %5342 = vst [vmem:[#allocation250_spill] sm:$0xff] %v3817_v11  ;;  %5343 = vst [vmem:[#allocation251_spill] sm:$0xff] %v3822_v43 }
 0x268   : > { %v3812_v55 = vpop.permute.xlu1 %1387  ;;  %v3814_v49 = vpop.permute.xlu0 %1385 }
 0x269   : > { %5340 = vst [vmem:[#allocation248_spill] sm:$0xff] %v3812_v55  ;;  %5341 = vst [vmem:[#allocation249_spill] sm:$0xff] %v3814_v49  ;;  %v3831_v55 = vld [vmem:[%s2684_s25 + $0x8] sm:$0xff]  ;;  %v3836_v49 = vld [vmem:[%s2684_s25] sm:$0xff] }
 0x26a   : > { %1609 = vrot.lane.b32.xlu1 %v3817_v11, %s2337_s7  ;;  %1607 = vrot.lane.b32.xlu0 %v3822_v43, %s2337_s7 }
 0x26c   : > { %v3826_v7 = vpop.permute.xlu1 %1415  ;;  %v3828_v6 = vpop.permute.xlu0 %1413 }
 0x26d   : > { %5344 = vst [vmem:[#allocation252_spill] sm:$0xff] %v3826_v7  ;;  %5345 = vst [vmem:[#allocation253_spill] sm:$0xff] %v3828_v6  ;;  %v3850_v6 = vld [vmem:[%s2684_s25 + $0x10] sm:$0xff] }
 0x26e   : > { %1634 = vrot.lane.b32.xlu1 %v3831_v55, %s2337_s7  ;;  %1632 = vrot.lane.b32.xlu0 %v3836_v49, %s2337_s7 }
 0x270   : > { %v3840_v45 = vpop.permute.xlu1 %1419  ;;  %v3842_v8 = vpop.permute.xlu0 %1417 }
 0x271   : > { %5346 = vst [vmem:[#allocation254_spill] sm:$0xff] %v3840_v45  ;;  %5347 = vst [vmem:[#allocation255_spill] sm:$0xff] %v3842_v8  ;;  %v3861_v45 = vld [vmem:[%s2684_s25 + $0x20] sm:$0xff] }
 0x272   : > { %1638 = vrot.lane.b32.xlu1 %v3845_v23, %s2337_s7  ;;  %1636 = vrot.lane.b32.xlu0 %v3850_v6, %s2337_s7 }
 0x274   : > { %v3854_v7 = vpop.permute.xlu1 %1423  ;;  %v3856_v22 = vpop.permute.xlu0 %1421 }
 0x275   : > { %5348 = vst [vmem:[#allocation256_spill] sm:$0xff] %v3854_v7  ;;  %5349 = vst [vmem:[#allocation257_spill] sm:$0xff] %v3856_v22 }
 0x276   : > { %1642 = vrot.lane.b32.xlu1 %v2248_v39, %s2337_s7  ;;  %1640 = vrot.lane.b32.xlu0 %v3861_v45, %s2337_s7 }
 0x278   : > { %v3865_v8 = vpop.permute.xlu1 %1427  ;;  %v3867_v38 = vpop.permute.xlu0 %1425 }
 0x279   : > { %5350 = vst [vmem:[#allocation258_spill] sm:$0xff] %v3865_v8  ;;  %5351 = vst [vmem:[#allocation259_spill] sm:$0xff] %v3867_v38  ;;  %v2256_v38 = vld [vmem:[%s2684_s25 + $0x30] sm:$0xff] }
 0x27a   : > { %1646 = vrot.lane.b32.xlu1 %v5148_v59, %s2337_s7  ;;  %1644 = vrot.lane.b32.xlu0 %v5149_v52, %s2337_s7 }
 0x27c   : > { %v3873_v7 = vpop.permute.xlu1 %1431  ;;  %v3875_v22 = vpop.permute.xlu0 %1429 }
 0x27d   : > { %5352 = vst [vmem:[#allocation260_spill] sm:$0xff] %v3873_v7  ;;  %5353 = vst [vmem:[#allocation261_spill] sm:$0xff] %v3875_v22 }
 0x27e   : > { %1650 = vrot.lane.b32.xlu1 %v5152_v56, %s2337_s7  ;;  %1648 = vrot.lane.b32.xlu0 %v5153_v54, %s2337_s7 }
 0x280   : > { %v3881_v39 = vpop.permute.xlu1 %1435  ;;  %v3883_v8 = vpop.permute.xlu0 %1433 }
 0x281   : > { %5354 = vst [vmem:[#allocation262_spill] sm:$0xff] %v3881_v39  ;;  %5355 = vst [vmem:[#allocation263_spill] sm:$0xff] %v3883_v8  ;;  %v394_v8 = vmul.f32 0.0, %v3758_v18 }
 0x282   : > { %1654 = vrot.lane.b32.xlu1 %v2755_v62, %s2337_s7  ;;  %1652 = vrot.lane.b32.xlu0 %v2758_v63, %s2337_s7 }
 0x284   : > { %v3889_v52 = vpop.permute.xlu1 %1439  ;;  %v3891_v59 = vpop.permute.xlu0 %1437 }
 0x285   : > { %5356 = vst [vmem:[#allocation264_spill] sm:$0xff] %v3889_v52  ;;  %5357 = vst [vmem:[#allocation265_spill] sm:$0xff] %v3891_v59 }
 0x286   : > { %1658 = vrot.lane.b32.xlu1 %v2769_v61, %s2337_s7  ;;  %1656 = vrot.lane.b32.xlu0 %v2772_v60, %s2337_s7 }
 0x288   : > { %v3897_v54 = vpop.permute.xlu1 %1443  ;;  %v3899_v56 = vpop.permute.xlu0 %1441 }
 0x289   : > { %5358 = vst [vmem:[#allocation266_spill] sm:$0xff] %v3897_v54  ;;  %5359 = vst [vmem:[#allocation267_spill] sm:$0xff] %v3899_v56  ;;  %v404_v56 = vmul.f32 0.0, %v2256_v38  ;;  %v400_v38 = vmul.f32 0.0, %v3822_v43 }
 0x28a   : > { %1690 = vrot.lane.b32.xlu1 %v3555_v53, %s2338_s8  ;;  %1688 = vrot.lane.b32.xlu0 %v3560_v58, %s2338_s8 }
 0x28c   : > { %v3905_v62 = vpop.permute.xlu1 %1479  ;;  %v3907_v63 = vpop.permute.xlu0 %1477 }
 0x28d   : > { %5360 = vst [vmem:[#allocation268_spill] sm:$0xff] %v3905_v62  ;;  %5361 = vst [vmem:[#allocation269_spill] sm:$0xff] %v3907_v63 }
 0x28e   : > { %1694 = vrot.lane.b32.xlu1 %v3591_v30, %s2338_s8  ;;  %1692 = vrot.lane.b32.xlu0 %v3596_v42, %s2338_s8 }
 0x290   : > { %v3913_v60 = vpop.permute.xlu1 %1483  ;;  %v3915_v61 = vpop.permute.xlu0 %1481 }
 0x291   : > { %5362 = vst [vmem:[#allocation270_spill] sm:$0xff] %v3913_v60  ;;  %5363 = vst [vmem:[#allocation271_spill] sm:$0xff] %v3915_v61 }
 0x292   : > { %1698 = vrot.lane.b32.xlu1 %v3605_v50, %s2338_s8  ;;  %1696 = vrot.lane.b32.xlu0 %v3610_v47, %s2338_s8 }
 0x294   : > { %v3921_v53 = vpop.permute.xlu1 %1487  ;;  %v3923_v63 = vpop.permute.xlu0 %1485 }
 0x295   : > { %5364 = vst [vmem:[#allocation272_spill] sm:$0xff] %v3921_v53  ;;  %5365 = vst [vmem:[#allocation273_spill] sm:$0xff] %v3923_v63  ;;  %v372_v63 = vmul.f32 0.0, %v3582_v12  ;;  %v378_v53 = vmul.f32 0.0, %v3663_v28  ;;  %v376_v28 = vmul.f32 0.0, %v3638_v27 }
 0x296   : > { %1702 = vrot.lane.b32.xlu1 %v3619_v57, %s2338_s8  ;;  %1700 = vrot.lane.b32.xlu0 %v3624_v48, %s2338_s8 }
 0x298   : > { %v3929_v30 = vpop.permute.xlu1 %1491  ;;  %v3931_v62 = vpop.permute.xlu0 %1489 }
 0x299   : > { %5366 = vst [vmem:[#allocation274_spill] sm:$0xff] %v3929_v30  ;;  %5367 = vst [vmem:[#allocation275_spill] sm:$0xff] %v3931_v62 }
 0x29a   : > { %1706 = vrot.lane.b32.xlu1 %v3633_v26, %s2338_s8  ;;  %1704 = vrot.lane.b32.xlu0 %v3638_v27, %s2338_s8 }
 0x29c   : > { %v3937_v59 = vpop.permute.xlu1 %1495  ;;  %v3939_v52 = vpop.permute.xlu0 %1493 }
 0x29d   : > { %5368 = vst [vmem:[#allocation276_spill] sm:$0xff] %v3937_v59  ;;  %5369 = vst [vmem:[#allocation277_spill] sm:$0xff] %v3939_v52  ;;  %v2250_v52 = vld [vmem:[%s2430_s9 + $0x20] sm:$0xff] }
 0x29e   : > { %1726 = vrot.lane.b32.xlu1 %v3647_v33, %s2338_s8  ;;  %1724 = vrot.lane.b32.xlu0 %v3652_v32, %s2338_s8  ;;  %v371_v59 = vmul.f32 0.0, %v2250_v52 }
 0x2a0   : > { %v3945_v30 = vpop.permute.xlu1 %1499  ;;  %v3947_v62 = vpop.permute.xlu0 %1497 }
 0x2a1   : > { %5370 = vst [vmem:[#allocation278_spill] sm:$0xff] %v3945_v30  ;;  %5371 = vst [vmem:[#allocation279_spill] sm:$0xff] %v3947_v62 }
 0x2a2   : > { %1730 = vrot.lane.b32.xlu1 %v3683_v9, %s2338_s8  ;;  %1728 = vrot.lane.b32.xlu0 %v3688_v20, %s2338_s8 }
 0x2a4   : > { %v3954_v22 = vpop.permute.xlu1 %1503  ;;  %v3956_v7 = vpop.permute.xlu0 %1501 }
 0x2a5   : > { %5372 = vst [vmem:[#allocation280_spill] sm:$0xff] %v3954_v22  ;;  %5373 = vst [vmem:[#allocation281_spill] sm:$0xff] %v3956_v7 }
 0x2a6   : > { %1738 = vrot.lane.b32.xlu1 %v3711_v44, %s2338_s8  ;;  %1736 = vrot.lane.b32.xlu0 %v3716_v21, %s2338_s8  ;;  %v5390_v44 = vld [vmem:[#allocation21_spill] sm:$0xff] }
 0x2a8   : > { %v3963_v33 = vpop.permute.xlu1 %1529  ;;  %v3965_v62 = vpop.permute.xlu0 %1527 }
 0x2a9   : > { %5374 = vst [vmem:[#allocation282_spill] sm:$0xff] %v3963_v33  ;;  %5375 = vst [vmem:[#allocation283_spill] sm:$0xff] %v3965_v62  ;;  %v320_v33 = vld [vmem:[%s291_s15] sm:$0xff]  ;;  %s2275_s15 = sshll.u32 %s2344_s22, 4  ;;  %s2276_s15 = int_to_ptr.vmem [resolvable:$false] %s2275_s15 }
 0x2aa   : > { %1770 = vrot.lane.b32.xlu1 %v3753_v19, %s2338_s8  ;;  %1768 = vrot.lane.b32.xlu0 %v3758_v18, %s2338_s8  ;;  %v370_v60 = vmul.f32 %v3571_v1, %v320_v33  ;;  %v374_v1 = vmul.f32 0.0, %v3610_v47  ;;  %v399_v18 = vmul.f32 0.0, %v3808_v41 }
 0x2ac   : > { %v3971_v9 = vpop.permute.xlu1 %1533  ;;  %v3973_v30 = vpop.permute.xlu0 %1531  ;;  %v4015_v52 = vsub.f32 %v370_v60, %v378_v53  ;;  %v401_v60 = vmul.f32 %v3836_v49, %v320_v33  ;;  %v398_v33 = vmul.f32 0.0, %v3794_v13 }
 0x2ad   : > { %5376 = vst [vmem:[#allocation284_spill] sm:$0xff] %v3971_v9  ;;  %5377 = vst [vmem:[#allocation285_spill] sm:$0xff] %v3973_v30  ;;  %v377_v30 = vmul.f32 0.0, %v3652_v32  ;;  %v369_v9 = vmul.f32 0.0, %v3560_v58 }
 0x2ae   : > { %1774 = vrot.lane.b32.xlu1 %v3789_v10, %s2338_s8  ;;  %1772 = vrot.lane.b32.xlu0 %v3794_v13, %s2338_s8 }
 0x2af   : > { %v4010_v12 = vsub.f32 %v369_v9, %v377_v30  ;;  %v2253_v30 = vld [vmem:[%s2684_s25 + $0x50] sm:$0xff]  ;;  %v382_v9 = vmul.f32 0.0, %v3702_v24 }
 0x2b0   : > { %v3982_v19 = vpop.permute.xlu1 %1537  ;;  %v3984_v62 = vpop.permute.xlu0 %1535  ;;  %v406_v54 = vmul.f32 0.0, %v2253_v30 }
 0x2b1   : > { %5378 = vst [vmem:[#allocation286_spill] sm:$0xff] %v3982_v19  ;;  %5379 = vst [vmem:[#allocation287_spill] sm:$0xff] %v3984_v62  ;;  %v380_v62 = vmul.f32 0.0, %v3674_v25  ;;  %v2251_v19 = vld [vmem:[%s2512_s13 + $0x20] sm:$0xff]  ;;  %v373_v25 = vmul.f32 0.0, %v3596_v42  ;;  %v384_v42 = vmul.f32 0.0, %v3730_v36 }
 0x2b2   : > { %1782 = vrot.lane.b32.xlu1 %v3817_v11, %s2338_s8  ;;  %1780 = vrot.lane.b32.xlu0 %v3822_v43, %s2338_s8  ;;  %v379_v7 = vmul.f32 0.0, %v2251_v19  ;;  %v4046_v11 = vld [vmem:[%s2684_s25 + $0x78] sm:$0xff]  ;;  %v5393_v43 = vld [vmem:[#allocation20_spill] sm:$0xff] }
 0x2b3   : > { %5386 = vst [vmem:[#allocation294_spill] sm:$0xff] %v4046_v11 }
 0x2b4   : > { %v3990_v10 = vpop.permute.xlu1 %1541  ;;  %v3992_v61 = vpop.permute.xlu0 %1539  ;;  %v4017_v19 = vsub.f32 %v371_v59, %v379_v7  ;;  %v375_v7 = vmul.f32 0.0, %v3624_v48  ;;  %v383_v59 = vmul.f32 0.0, %v3716_v21  ;;  %v5391_v48 = vld [vmem:[#allocation19_spill] sm:$0xff] }
 0x2b5   : > { %5380 = vst [vmem:[#allocation288_spill] sm:$0xff] %v3990_v10  ;;  %5381 = vst [vmem:[#allocation289_spill] sm:$0xff] %v3992_v61  ;;  %v381_v61 = vmul.f32 0.0, %v3688_v20  ;;  %v2252_v10 = vld [vmem:[%s2684_s25 + $0x58] sm:$0xff]  ;;  %v397_v20 = vmul.f32 0.0, %v3780_v40  ;;  %v2255_v40 = vld [vmem:[%s2598_s16 + $0x30] sm:$0xff]  ;;  %v499_v57 = vsel %vm497_vm0, %v5391_v48, %v5390_v44  ;;  %v4093_v44 = vadd.f32 %v406_v54, %v398_v33 }
 0x2b6   : > { %1805 = vrot.lane.b32.xlu1 %v3845_v23, %s2338_s8  ;;  %1803 = vrot.lane.b32.xlu0 %v3850_v6, %s2338_s8  ;;  %v4019_v23 = vsub.f32 %v372_v63, %v380_v62  ;;  %v395_v62 = vmul.f32 0.0, %v3769_v0  ;;  %v393_v63 = vmul.f32 0.0, %v3744_v14  ;;  %v402_v0 = vmul.f32 0.0, %v3850_v6  ;;  %v4057_v6 = vld [vmem:[%s2684_s25 + $0x60] sm:$0xff]  ;;  %v5400_v54 = vld [vmem:[#allocation35_spill] sm:$0xff]  ;;  %v5403_v33 = vld [vmem:[#allocation38_spill] sm:$0xff] }
 0x2b7   : > { %v396_v39 = vmul.f32 0.0, %v2255_v40  ;;  %v4064_v40 = vsub.f32 %v373_v25, %v381_v61 }
 0x2b8   : > { %v4006_v58 = vpop.permute.xlu1 %1545  ;;  %v4008_v32 = vpop.permute.xlu0 %1543  ;;  %v4083_v25 = vadd.f32 %v401_v60, %v393_v63 }
 0x2b9   : > { %5382 = vst [vmem:[#allocation290_spill] sm:$0xff] %v4006_v58  ;;  %5383 = vst [vmem:[#allocation291_spill] sm:$0xff] %v4008_v32  ;;  %v403_v32 = vmul.f32 0.0, %v3861_v45  ;;  %v2254_v58 = vld [vmem:[%s2684_s25 + $0x40] sm:$0xff]  ;;  %v4051_v45 = vld [vmem:[%s2684_s25 + $0x70] sm:$0xff] }
 0x2ba   : > { %1809 = vrot.lane.b32.xlu1 %v2252_v10, %s2338_s8  ;;  %1807 = vrot.lane.b32.xlu0 %v2253_v30, %s2338_s8  ;;  %v405_v22 = vmul.f32 0.0, %v2254_v58  ;;  %5387 = vst [vmem:[#allocation295_spill] sm:$0xff] %v4051_v45  ;;  %v407_v58 = vmul.f32 0.0, %v4057_v6  ;;  %v408_v13 = vmul.f32 0.0, %v4051_v45  ;;  %v4062_v30 = vsub.f32 %v376_v28, %v384_v42  ;;  %v5394_v28 = vld [vmem:[#allocation23_spill] sm:$0xff]  ;;  %v5395_v42 = vld [vmem:[#allocation24_spill] sm:$0xff] }
 0x2bb   : > { %v500_v61 = vsel %vm497_vm0, %v5395_v42, %v5394_v28  ;;  %v5408_v42 = vld [vmem:[#allocation43_spill] sm:$0xff] }
 0x2bc   : > { %v4034_v53 = vpop.permute.xlu1 %1549  ;;  %v4036_v10 = vpop.permute.xlu0 %1547  ;;  %v4091_v48 = vadd.f32 %v405_v22, %v397_v20  ;;  %v5401_v20 = vld [vmem:[#allocation36_spill] sm:$0xff] }
 0x2bd   : > { %5384 = vst [vmem:[#allocation292_spill] sm:$0xff] %v4034_v53  ;;  %5385 = vst [vmem:[#allocation293_spill] sm:$0xff] %v4036_v10  ;;  %v4066_v10 = vsub.f32 %v374_v1, %v382_v9  ;;  %v4068_v53 = vsub.f32 %v375_v7, %v383_v59  ;;  %v410_v1 = vadd.f32 %v402_v0, %v394_v8  ;;  %v5402_v0 = vld [vmem:[#allocation37_spill] sm:$0xff] }
 0x2be   : > { %1817 = vrot.lane.b32.xlu1 %v4046_v11, %s2338_s8  ;;  %1815 = vrot.lane.b32.xlu0 %v4051_v45, %s2338_s8  ;;  %v498_v45 = vsel %vm497_vm0, %v5393_v43, %v5392_v35  ;;  %v411_v9 = vadd.f32 %v403_v32, %v395_v62  ;;  %v4085_v7 = vadd.f32 %v404_v56, %v396_v39  ;;  %v5396_v56 = vld [vmem:[#allocation25_spill] sm:$0xff]  ;;  %v5397_v32 = vld [vmem:[#allocation26_spill] sm:$0xff] }
 0x2bf   : > { %v4095_v35 = vadd.f32 %v407_v58, %v399_v18  ;;  %v4097_v43 = vadd.f32 %v408_v13, %v400_v38  ;;  %v515_v59 = vmul.f32 %v499_v57, %v4010_v12  ;;  %v514_v8 = vmul.f32 %v498_v45, %v4062_v30  ;;  %v5404_v18 = vld [vmem:[#allocation39_spill] sm:$0xff]  ;;  %v5405_v45 = vld [vmem:[#allocation40_spill] sm:$0xff]  ;;  %v5406_v38 = vld [vmem:[#allocation41_spill] sm:$0xff] }
 0x2c0   : > { %v4070_v11 = vpop.permute.xlu1 %1553  ;;  %v4072_v21 = vpop.permute.xlu0 %1551  ;;  %v516_v39 = vmul.f32 %v500_v61, %v4015_v52  ;;  %v501_v62 = vsel %vm497_vm0, %v5397_v32, %v5396_v56  ;;  %v570_v60 = vsel %vm497_vm0, %v5401_v20, %v5400_v54  ;;  %v571_v57 = vsel %vm497_vm0, %v5403_v33, %v5402_v0  ;;  %v5407_v13 = vld [vmem:[#allocation42_spill] sm:$0xff]  ;;  %v5409_v61 = vld [vmem:[#allocation44_spill] sm:$0xff]  ;;  %v5410_v32 = vld [vmem:[#allocation45_spill] sm:$0xff] }
 0x2c1   : > { %5388 = vst [vmem:[#allocation296_spill] sm:$0xff] %v4070_v11  ;;  %5389 = vst [vmem:[#allocation297_spill] sm:$0xff] %v4072_v21  ;;  %v572_v58 = vsel %vm497_vm0, %v5405_v45, %v5404_v18  ;;  %v573_v28 = vsel %vm497_vm0, %v5407_v13, %v5406_v38  ;;  %v574_v56 = vsel %vm497_vm0, %v5409_v61, %v5408_v42  ;;  %v5412_v20 = vld [vmem:[#allocation47_spill] sm:$0xff]  ;;  %v5415_v18 = vld [vmem:[#allocation28_spill] sm:$0xff] }
 0x2c2   : > { %1734 = vrot.lane.b32.xlu1 %v3697_v29, %s2338_s8  ;;  %1732 = vrot.lane.b32.xlu0 %v3702_v24, %s2338_s8  ;;  %v5414_v33 = vld [vmem:[#allocation27_spill] sm:$0xff]  ;;  %v5416_v38 = vld [vmem:[#allocation29_spill] sm:$0xff]  ;;  %v5417_v13 = vld [vmem:[#allocation30_spill] sm:$0xff]  ;;  %v586_v16 = vmul.f32 %v570_v60, %v4083_v25  ;;  %v587_v51 = vmul.f32 %v571_v57, %v410_v1 }
 0x2c3   : > { %v502_v45 = vsel %vm497_vm0, %v5415_v18, %v5414_v33  ;;  %v503_v42 = vsel %vm497_vm0, %v5417_v13, %v5416_v38  ;;  %v5418_v61 = vld [vmem:[#allocation31_spill] sm:$0xff]  ;;  %v5420_v21 = vld [vmem:[#allocation49_spill] sm:$0xff]  ;;  %v588_v33 = vmul.f32 %v572_v58, %v411_v9  ;;  %v589_v38 = vmul.f32 %v573_v28, %v4085_v7  ;;  %v5427_v28 = vld [vmem:[#allocation52_spill] sm:$0xff] }
 0x2c4   : > { %v4105_v63 = vpop.permute.xlu1 %1585  ;;  %v4107_v22 = vpop.permute.xlu0 %1583  ;;  %v5422_v11 = vld [vmem:[#allocation33_spill] sm:$0xff]  ;;  %v590_v13 = vmul.f32 %v574_v56, %v4091_v48  ;;  %v519_v60 = vmul.f32 %v503_v42, %v4064_v40  ;;  %v5426_v58 = vld [vmem:[#allocation51_spill] sm:$0xff] }
 0x2c5   : > { %5398 = vst [vmem:[#allocation21_spill] sm:$0xff] %v4105_v63  ;;  %5399 = vst [vmem:[#allocation19_spill] sm:$0xff] %v4107_v22  ;;  %v5411_v22 = vld [vmem:[#allocation46_spill] sm:$0xff]  ;;  %v5413_v63 = vld [vmem:[#allocation48_spill] sm:$0xff]  ;;  %v505_v17 = vsel %vm497_vm0, %v5423_v34, %v5422_v11  ;;  %v518_v34 = vmul.f32 %v502_v45, %v4019_v23  ;;  %v650_v56 = vsel %vm497_vm0, %v5427_v28, %v5426_v58 }
 0x2c6   : > { %v575_v54 = vsel %vm497_vm0, %v5411_v22, %v5410_v32  ;;  %v576_v0 = vsel %vm497_vm0, %v5413_v63, %v5412_v20  ;;  %1742 = vrot.lane.b32.xlu1 %v3725_v37, %s2338_s8  ;;  %1740 = vrot.lane.b32.xlu0 %v3730_v36, %s2338_s8  ;;  %v5419_v22 = vld [vmem:[#allocation32_spill] sm:$0xff]  ;;  %v5421_v63 = vld [vmem:[#allocation50_spill] sm:$0xff]  ;;  %v521_v45 = vmul.f32 %v505_v17, %v4068_v53 }
 0x2c7   : > { %v504_v32 = vsel %vm497_vm0, %v5419_v22, %v5418_v61  ;;  %v577_v20 = vsel %vm497_vm0, %v5421_v63, %v5420_v21  ;;  %v591_v61 = vmul.f32 %v575_v54, %v4093_v44  ;;  %v592_v21 = vmul.f32 %v576_v0, %v4095_v35  ;;  %v5428_v54 = vld [vmem:[#allocation53_spill] sm:$0xff] }
 0x2c8   : > { %v4150_v18 = vpop.permute.xlu1 %1589  ;;  %v4152_v3 = vpop.permute.xlu0 %1587  ;;  %v517_v22 = vmul.f32 %v501_v62, %v4017_v19  ;;  %v593_v11 = vmul.f32 %v577_v20, %v4097_v43  ;;  %v520_v57 = vmul.f32 %v504_v32, %v4066_v10  ;;  %v5429_v62 = vld [vmem:[#allocation54_spill] sm:$0xff]  ;;  %v4174_v63 = vsub.f32 %v514_v8, %v586_v16 }
 0x2c9   : > { %5424 = vst [vmem:[#allocation22_spill] sm:$0xff] %v4150_v18  ;;  %5425 = vst [vmem:[#allocation20_spill] sm:$0xff] %v4152_v3  ;;  %v651_v0 = vsel %vm497_vm0, %v5429_v62, %v5428_v54  ;;  %v4176_v20 = vsub.f32 %v515_v59, %v587_v51  ;;  %v4178_v3 = vsub.f32 %v516_v39, %v588_v33  ;;  %v5432_v51 = vld [vmem:[#allocation55_spill] sm:$0xff]  ;;  %v5433_v59 = vld [vmem:[#allocation56_spill] sm:$0xff] }
 0x2ca   : > { %1766 = vrot.lane.b32.xlu1 %v3739_v15, %s2338_s8  ;;  %1764 = vrot.lane.b32.xlu0 %v3744_v14, %s2338_s8  ;;  %v4184_v32 = vsub.f32 %v517_v22, %v589_v38  ;;  %v4186_v46 = vsub.f32 %v518_v34, %v590_v13  ;;  %v4188_v58 = vsub.f32 %v519_v60, %v591_v61  ;;  %v5434_v39 = vld [vmem:[#allocation57_spill] sm:$0xff]  ;;  %v5435_v33 = vld [vmem:[#allocation58_spill] sm:$0xff]  ;;  %v5436_v13 = vld [vmem:[#allocation59_spill] sm:$0xff] }
 0x2cb   : > { %v4190_v28 = vsub.f32 %v520_v57, %v592_v21  ;;  %v666_v54 = vmul.f32 %v650_v56, %v410_v1  ;;  %v667_v17 = vmul.f32 %v651_v0, %v411_v9  ;;  %v4192_v16 = vsub.f32 %v521_v45, %v593_v11  ;;  %v5437_v61 = vld [vmem:[#allocation60_spill] sm:$0xff]  ;;  %v5438_v9 = vld [vmem:[#allocation67_spill] sm:$0xff]  ;;  %v5440_v34 = vld [vmem:[#allocation69_spill] sm:$0xff] }
 0x2cc   : > { %v4180_v18 = vpop.permute.xlu1 %1593  ;;  %v4182_v42 = vpop.permute.xlu0 %1591  ;;  %v652_v8 = vsel %vm497_vm0, %v5433_v59, %v5432_v51  ;;  %v653_v38 = vsel %vm497_vm0, %v5435_v33, %v5434_v39  ;;  %v654_v1 = vsel %vm497_vm0, %v5437_v61, %v5436_v13  ;;  %v5439_v21 = vld [vmem:[#allocation68_spill] sm:$0xff]  ;;  %v5441_v11 = vld [vmem:[#allocation70_spill] sm:$0xff]  ;;  %v5442_v57 = vld [vmem:[#allocation71_spill] sm:$0xff] }
 0x2cd   : > { %5430 = vst [vmem:[#allocation23_spill] sm:$0xff] %v4180_v18  ;;  %5431 = vst [vmem:[#allocation24_spill] sm:$0xff] %v4182_v42  ;;  %v722_v22 = vsel %vm497_vm0, %v5439_v21, %v5438_v9  ;;  %v723_v60 = vsel %vm497_vm0, %v5441_v11, %v5440_v34  ;;  %v5443_v56 = vld [vmem:[#allocation72_spill] sm:$0xff]  ;;  %v5444_v0 = vld [vmem:[#allocation73_spill] sm:$0xff] }
 0x2ce   : > { %1778 = vrot.lane.b32.xlu1 %v3803_v2, %s2338_s8  ;;  %1776 = vrot.lane.b32.xlu0 %v3808_v41, %s2338_s8  ;;  %v724_v62 = vsel %vm497_vm0, %v5443_v56, %v5442_v57  ;;  %v5445_v45 = vld [vmem:[#allocation74_spill] sm:$0xff]  ;;  %v5446_v59 = vld [vmem:[#allocation75_spill] sm:$0xff]  ;;  %v5447_v39 = vld [vmem:[#allocation76_spill] sm:$0xff] }
 0x2cf   : > { %v725_v51 = vsel %vm497_vm0, %v5445_v45, %v5444_v0  ;;  %v726_v33 = vsel %vm497_vm0, %v5447_v39, %v5446_v59  ;;  %v5450_v9 = vld [vmem:[#allocation61_spill] sm:$0xff]  ;;  %v5451_v21 = vld [vmem:[#allocation62_spill] sm:$0xff]  ;;  %v5454_v56 = vld [vmem:[#allocation79_spill] sm:$0xff] }
 0x2d0   : > { %v4222_v13 = vpop.permute.xlu1 %1597  ;;  %v4224_v61 = vpop.permute.xlu0 %1595  ;;  %v655_v34 = vsel %vm497_vm0, %v5451_v21, %v5450_v9  ;;  %v5452_v11 = vld [vmem:[#allocation77_spill] sm:$0xff]  ;;  %v5453_v42 = vld [vmem:[#allocation78_spill] sm:$0xff]  ;;  %v5455_v18 = vld [vmem:[#allocation80_spill] sm:$0xff]  ;;  %v738_v21 = vmul.f32 %v722_v22, %v4010_v12 }
 0x2d1   : > { %5448 = vst [vmem:[#allocation25_spill] sm:$0xff] %v4222_v13  ;;  %5449 = vst [vmem:[#allocation26_spill] sm:$0xff] %v4224_v61  ;;  %v727_v57 = vsel %vm497_vm0, %v5453_v42, %v5452_v11  ;;  %v728_v0 = vsel %vm497_vm0, %v5455_v18, %v5454_v56  ;;  %v5456_v45 = vld [vmem:[#allocation81_spill] sm:$0xff]  ;;  %v5457_v41 = vld [vmem:[#allocation82_spill] sm:$0xff]  ;;  %v739_v18 = vmul.f32 %v723_v60, %v4015_v52 }
 0x2d2   : > { %v729_v59 = vsel %vm497_vm0, %v5457_v41, %v5456_v45  ;;  %v5458_v39 = vld [vmem:[#allocation63_spill] sm:$0xff]  ;;  %v5459_v13 = vld [vmem:[#allocation64_spill] sm:$0xff]  ;;  %v5460_v2 = vld [vmem:[#allocation65_spill] sm:$0xff]  ;;  %1801 = vrot.lane.b32.xlu1 %v3831_v55, %s2338_s8  ;;  %1799 = vrot.lane.b32.xlu0 %v3836_v49, %s2338_s8  ;;  %v740_v41 = vmul.f32 %v724_v62, %v4017_v19  ;;  %v741_v42 = vmul.f32 %v725_v51, %v4019_v23 }
 0x2d3   : > { %v656_v61 = vsel %vm497_vm0, %v5459_v13, %v5458_v39  ;;  %v657_v9 = vsel %vm497_vm0, %v5461_v31, %v5460_v2  ;;  %v742_v13 = vmul.f32 %v726_v33, %v4064_v40  ;;  %v668_v31 = vmul.f32 %v652_v8, %v4085_v7  ;;  %v5462_v60 = vld [vmem:[#allocation15_spill] sm:$0xff]  ;;  %v5463_v40 = vld [vmem:[#allocation16_spill] sm:$0xff]  ;;  %v5464_v33 = vld [vmem:[#allocation17_spill] sm:$0xff] }
 0x2d4   : > { %v743_v2 = vmul.f32 %v727_v57, %v4066_v10  ;;  %v744_v12 = vmul.f32 %v728_v0, %v4068_v53  ;;  %v745_v22 = vmul.f32 %v729_v59, %v4062_v30  ;;  %v4257_v11 = vpop.permute.xlu1 %1601  ;;  %v4259_v56 = vpop.permute.xlu0 %1599  ;;  %v669_v52 = vmul.f32 %v653_v38, %v4091_v48  ;;  %v4272_v30 = vld [vmem:[%s2684_s25 + $0x68] sm:$0xff]  ;;  %v5467_v57 = vld [vmem:[#allocation84_spill] sm:$0xff]  ;;  %v5468_v45 = vld [vmem:[#allocation87_spill] sm:$0xff]  ;;  %s285_s25 = sand.u32 1, %s2323_s19  }
 0x2d5   : > { %v670_v19 = vmul.f32 %v654_v1, %v4093_v44  ;;  %v671_v23 = vmul.f32 %v655_v34, %v4095_v35  ;;  %v787_v7 = vsel %vm786_vm1, %v5463_v40, %v5462_v60  ;;  %v672_v10 = vmul.f32 %v656_v61, %v4097_v43  ;;  %v5466_v34 = vld [vmem:[#allocation83_spill] sm:$0xff]  ;;  %v5469_v59 = vld [vmem:[#allocation88_spill] sm:$0xff]  ;;  %v5479_v60 = vld [vmem:[#allocation90_spill] sm:$0xff]  ;;  %s2130_s26 = sshll.u32 %s285_s25, 3  ;;  %s2006_s12 = scalar_lea.sflag [#allocation4], %s285_s25 }
 0x2d6   : > { %v673_v53 = vmul.f32 %v657_v9, %v4083_v25  ;;  %v4269_v8 = vadd.f32 %v738_v21, %v666_v54  ;;  %1813 = vrot.lane.b32.xlu1 %v4272_v30, %s2338_s8  ;;  %1811 = vrot.lane.b32.xlu0 %v4057_v6, %s2338_s8  ;;  %v747_v48 = vadd.f32 %v739_v18, %v667_v17  ;;  %v5465_v17 = vld [vmem:[#allocation18_spill] sm:$0xff]  ;;  %v5470_v9 = vld [vmem:[#allocation95_spill] sm:$0xff]  ;;  %v5471_v21 = vld [vmem:[#allocation96_spill] sm:$0xff]  ;;  %s287_s6 = scalar_lea.vmem [#allocation3], %s2130_s26 }
 0x2d7   : > { %v4278_v44 = vadd.f32 %v740_v41, %v668_v31  ;;  %v4280_v35 = vadd.f32 %v741_v42, %v669_v52  ;;  %v4282_v38 = vadd.f32 %v742_v13, %v670_v19  ;;  %v803_v43 = vmul.f32 %v787_v7, %v4192_v16  ;;  %v5472_v41 = vld [vmem:[#allocation97_spill] sm:$0xff]  ;;  %v5473_v42 = vld [vmem:[#allocation98_spill] sm:$0xff]  ;;  %v5474_v31 = vld [vmem:[#allocation99_spill] sm:$0xff]  ;;  %s2019_s7 = sshll.u32 %s287_s6, 4  ;;  %s2020_s7 = int_to_ptr.vmem [resolvable:$true] %s2019_s7 }
 0x2d8   : > { %v4285_v25 = vadd.f32 %v743_v2, %v671_v23  ;;  %v4287_v54 = vadd.f32 %v744_v12, %v672_v10  ;;  %v4289_v1 = vadd.f32 %v745_v22, %v673_v53  ;;  %v4291_v62 = vpop.permute.xlu1 %1605  ;;  %v4293_v51 = vpop.permute.xlu0 %1603  ;;  %v788_v61 = vsel %vm786_vm1, %v5465_v17, %v5464_v33  ;;  %v5475_v2 = vld [vmem:[#allocation100_spill] sm:$0xff]  ;;  %v5476_v22 = vld [vmem:[#allocation103_spill] sm:$0xff]  ;;  %v5478_v23 = vld [vmem:[#allocation89_spill] sm:$0xff]  ;;  %s2271_s14 = scalar_lea.vmem %s2020_s7, 128  ;;  %p2278_p1 = scmp.lt.s32.totalorder %s2020_s7, %s2276_s15 }
 0x2d9   : > { %v789_v0 = vsel %vm786_vm1, %v5467_v57, %v5466_v34  ;;  %v791_v39 = vsel %vm786_vm1, %v5469_v59, %v5468_v45  ;;  %v843_v18 = vsel %vm786_vm1, %v5471_v21, %v5470_v9  ;;  %v844_v13 = vsel %vm786_vm1, %v5473_v42, %v5472_v41  ;;  %v5477_v52 = vld [vmem:[#allocation104_spill] sm:$0xff]  ;;  %v5480_v7 = vld [vmem:[#allocation105_spill] sm:$0xff]  ;;  %v5481_v10 = vld [vmem:[#allocation106_spill] sm:$0xff]  ;;  %p2272_p12 = scmp.ne.s32.totalorder %s2020_s7, %s2271_s14 }
 0x2da   : > { %v845_v12 = vsel %vm786_vm1, %v5475_v2, %v5474_v31  ;;  %v847_v19 = vsel %vm786_vm1, %v5477_v52, %v5476_v22  ;;  %1841 = vrot.lane.b32.xlu1 %v3605_v50, %s2339_s17  ;;  %1839 = vrot.lane.b32.xlu0 %v3610_v47, %s2339_s17  ;;  %v792_v40 = vsel %vm786_vm1, %v5479_v60, %v5478_v23  ;;  %v5482_v33 = vld [vmem:[#allocation107_spill] sm:$0xff]  ;;  %v5483_v17 = vld [vmem:[#allocation108_spill] sm:$0xff]  ;;  %v5484_v57 = vld [vmem:[#allocation109_spill] sm:$0xff] }
 0x2db   : > { %v848_v53 = vsel %vm786_vm1, %v5481_v10, %v5480_v7  ;;  %v849_v34 = vsel %vm786_vm1, %v5483_v17, %v5482_v33  ;;  %v5485_v45 = vld [vmem:[#allocation110_spill] sm:$0xff]  ;;  %v5486_v50 = vld [vmem:[#allocation91_spill] sm:$0xff]  ;;  %v5487_v9 = vld [vmem:[#allocation92_spill] sm:$0xff]  ;;  %v859_v31 = vmul.f32 %v843_v18, %v4269_v8  ;;  %v860_v52 = vmul.f32 %v844_v13, %v747_v48  ;;  %p2273_p13 = pnand %p2272_p12, %p2413_p5 }
 0x2dc   : > { %v850_v59 = vsel %vm786_vm1, %v5485_v45, %v5484_v57  ;;  %v793_v47 = vsel %vm786_vm1, %v5487_v9, %v5486_v50  ;;  %v5488_v21 = vld [vmem:[#allocation93_spill] sm:$0xff]  ;;  %v5489_v41 = vld [vmem:[#allocation94_spill] sm:$0xff]  ;;  %v1610_v2 = vpop.permute.xlu1 %1609  ;;  %v1608_v22 = vpop.permute.xlu0 %1607  ;;  %v861_v23 = vmul.f32 %v845_v12, %v4278_v44  ;;  %v863_v60 = vmul.f32 %v847_v19, %v4282_v38  ;;  %v5490_v57 = vld [vmem:[#allocation111_spill] sm:$0xff] }
 0x2dd   : > { %v794_v42 = vsel %vm786_vm1, %v5489_v41, %v5488_v21  ;;  %v4342_v7 = vsel %vm1505_vm2, %v1608_v22, %v1610_v2  ;;  %v864_v10 = vmul.f32 %v848_v53, %v4285_v25  ;;  %v865_v33 = vmul.f32 %v849_v34, %v4287_v54  ;;  %v5491_v45 = vld [vmem:[#allocation112_spill] sm:$0xff]  ;;  %v5492_v41 = vld [vmem:[#allocation113_spill] sm:$0xff]  ;;  %v5494_v2 = vld [vmem:[#allocation127_spill] sm:$0xff]  ;;  %p2274_p0 = pneg %p2273_p13 }
 0x2de   : > { %v866_v17 = vmul.f32 %v850_v59, %v4289_v1  ;;  %1849 = vrot.lane.b32.xlu1 %v3633_v26, %s2339_s17  ;;  %1847 = vrot.lane.b32.xlu0 %v3638_v27, %s2339_s17  ;;  %v804_v18 = vmul.f32 %v788_v61, %v4174_v63  ;;  %v805_v13 = vmul.f32 %v789_v0, %v4176_v20  ;;  %v5495_v22 = vld [vmem:[#allocation128_spill] sm:$0xff] }
 0x2df   : > { %v807_v12 = vmul.f32 %v791_v39, %v4184_v32  ;;  %v808_v19 = vmul.f32 %v792_v40, %v4186_v46  ;;  %v809_v53 = vmul.f32 %v793_v47, %v4188_v58  ;;  %v810_v34 = vmul.f32 %v794_v42, %v4190_v28  ;;  %v5493_v42 = vld [vmem:[#allocation114_spill] sm:$0xff] }
 0x2e0   : > { %v907_v59 = vsel %vm786_vm1, %v5491_v45, %v5490_v57  ;;  %v4360_v26 = vsub.f32 %v803_v43, %v859_v31  ;;  %v1635_v50 = vpop.permute.xlu1 %1634  ;;  %v1633_v27 = vpop.permute.xlu0 %1632  ;;  %v4362_v9 = vsub.f32 %v804_v18, %v860_v52  ;;  %v4364_v61 = vsub.f32 %v805_v13, %v861_v23  ;;  %v5496_v23 = vld [vmem:[#allocation129_spill] sm:$0xff]  ;;  %v5501_v13 = vld [vmem:[#allocation118_spill] sm:$0xff] }
 0x2e1   : > { %v4366_v0 = vsub.f32 %v807_v12, %v863_v60  ;;  %v4369_v39 = vsel %vm1505_vm2, %v1633_v27, %v1635_v50  ;;  %v4371_v40 = vsub.f32 %v810_v34, %v866_v17  ;;  %v4373_v47 = vsub.f32 %v808_v19, %v864_v10  ;;  %v5497_v60 = vld [vmem:[#allocation130_spill] sm:$0xff]  ;;  %v5499_v17 = vld [vmem:[#allocation116_spill] sm:$0xff]  ;;  %v5500_v18 = vld [vmem:[#allocation117_spill] sm:$0xff] }
 0x2e2   : > { %v4375_v21 = vsub.f32 %v809_v53, %v865_v33  ;;  %1863 = vrot.lane.b32.xlu1 %v3697_v29, %s2339_s17  ;;  %1861 = vrot.lane.b32.xlu0 %v3702_v24, %s2339_s17  ;;  %v923_v43 = vmul.f32 %v907_v59, %v747_v48  ;;  %v908_v31 = vsel %vm786_vm1, %v5493_v42, %v5492_v41  ;;  %v5498_v33 = vld [vmem:[#allocation115_spill] sm:$0xff]  ;;  %v5503_v12 = vld [vmem:[#allocation132_spill] sm:$0xff]  ;;  %v5504_v53 = vld [vmem:[#allocation133_spill] sm:$0xff] }
 0x2e3   : > { %v963_v52 = vsel %vm786_vm1, %v5495_v22, %v5494_v2  ;;  %v964_v10 = vsel %vm786_vm1, %v5497_v60, %v5496_v23  ;;  %v909_v29 = vsel %vm786_vm1, %v5499_v17, %v5498_v33  ;;  %v910_v24 = vsel %vm786_vm1, %v5501_v13, %v5500_v18  ;;  %v5502_v48 = vld [vmem:[#allocation131_spill] sm:$0xff]  ;;  %v5505_v34 = vld [vmem:[#allocation134_spill] sm:$0xff]  ;;  %v5506_v50 = vld [vmem:[#allocation121_spill] sm:$0xff] }
 0x2e4   : > { %v965_v19 = vsel %vm786_vm1, %v5503_v12, %v5502_v48  ;;  %v966_v57 = vsel %vm786_vm1, %v5505_v34, %v5504_v53  ;;  %v1639_v45 = vpop.permute.xlu1 %1638  ;;  %v1637_v59 = vpop.permute.xlu0 %1636  ;;  %v5507_v27 = vld [vmem:[#allocation122_spill] sm:$0xff]  ;;  %v5508_v42 = vld [vmem:[#allocation123_spill] sm:$0xff]  ;;  %v5509_v2 = vld [vmem:[#allocation124_spill] sm:$0xff]  ;;  %v979_v12 = vmul.f32 %v963_v52, %v4174_v63  ;;  %v980_v53 = vmul.f32 %v964_v10, %v4176_v20 }
 0x2e5   : > { %v912_v41 = vsel %vm786_vm1, %v5507_v27, %v5506_v50  ;;  %v913_v22 = vsel %vm786_vm1, %v5509_v2, %v5508_v42  ;;  %v5510_v23 = vld [vmem:[#allocation137_spill] sm:$0xff]  ;;  %v5511_v60 = vld [vmem:[#allocation138_spill] sm:$0xff]  ;;  %v4412_v17 = vsel %vm1505_vm2, %v1637_v59, %v1639_v45  ;;  %v924_v34 = vmul.f32 %v908_v31, %v4278_v44  ;;  %v5514_v50 = vld [vmem:[#allocation11_spill] sm:$0xff] }
 0x2e6   : > { %v968_v33 = vsel %vm786_vm1, %v5511_v60, %v5510_v23  ;;  %v5512_v18 = vld [vmem:[#allocation125_spill] sm:$0xff]  ;;  %v5513_v13 = vld [vmem:[#allocation126_spill] sm:$0xff]  ;;  %1871 = vrot.lane.b32.xlu1 %v3725_v37, %s2339_s17  ;;  %1869 = vrot.lane.b32.xlu0 %v3730_v36, %s2339_s17  ;;  %v981_v45 = vmul.f32 %v965_v19, %v4178_v3  ;;  %v982_v59 = vmul.f32 %v966_v57, %v4184_v32  ;;  %v5515_v27 = vld [vmem:[#allocation12_spill] sm:$0xff] }
 0x2e7   : > { %v914_v48 = vsel %vm786_vm1, %v5513_v13, %v5512_v18  ;;  %v969_v42 = vsel %vm786_vm1, %v5515_v27, %v5514_v50  ;;  %v925_v63 = vmul.f32 %v909_v29, %v4280_v35  ;;  %v926_v20 = vmul.f32 %v910_v24, %v4282_v38  ;;  %v5519_v57 = vld [vmem:[#allocation195_spill] sm:$0xff]  ;;  %v5524_v13 = vld [vmem:[#allocation164_spill] sm:$0xff] }
 0x2e8   : > { %v928_v52 = vmul.f32 %v912_v41, %v4287_v54  ;;  %v984_v37 = vmul.f32 %v968_v33, %v4188_v58  ;;  %v1643_v10 = vpop.permute.xlu1 %1642  ;;  %v1641_v36 = vpop.permute.xlu0 %1640  ;;  %v929_v44 = vmul.f32 %v913_v22, %v4289_v1  ;;  %v930_v31 = vmul.f32 %v914_v48, %v4269_v8  ;;  %v5516_v58 = vld [vmem:[#allocation13_spill] sm:$0xff]  ;;  %v5517_v8 = vld [vmem:[#allocation14_spill] sm:$0xff]  ;;  %v5521_v41 = vld [vmem:[#allocation140_spill] sm:$0xff] }
 0x2e9   : > { %v1084_v32 = vsel %vm1027_vm3, %v3336_v5, %v3334_v4  ;;  %v4439_v19 = vsel %vm1505_vm2, %v1641_v36, %v1643_v10  ;;  %v985_v29 = vmul.f32 %v969_v42, %v4190_v28  ;;  %v987_v38 = vadd.f32 %v979_v12, %v923_v43  ;;  %v5518_v5 = vld [vmem:[#allocation194_spill] sm:$0xff]  ;;  %v5520_v43 = vld [vmem:[#allocation139_spill] sm:$0xff]  ;;  %v5525_v48 = vld [vmem:[#allocation165_spill] sm:$0xff] }
 0x2ea   : > { %v4442_v24 = vadd.f32 %v980_v53, %v924_v34  ;;  %1887 = vrot.lane.b32.xlu1 %v3739_v15, %s2339_s17  ;;  %1885 = vrot.lane.b32.xlu0 %v3744_v14, %s2339_s17  ;;  %v970_v54 = vsel %vm786_vm1, %v5517_v8, %v5516_v58  ;;  %v4451_v1 = vadd.f32 %v981_v45, %v925_v63  ;;  %v5522_v15 = vld [vmem:[#allocation150_spill] sm:$0xff]  ;;  %v5523_v22 = vld [vmem:[#allocation151_spill] sm:$0xff] }
 0x2eb   : > { %v4453_v4 = vadd.f32 %v982_v59, %v926_v20  ;;  %v1211_v28 = vsel %vm1027_vm3, %v5519_v57, %v5518_v5  ;;  %v1028_v2 = vsel %vm1027_vm3, %v5521_v41, %v5520_v43  ;;  %v1034_v14 = vsel %vm1027_vm3, %v5523_v22, %v5522_v15  ;;  %v5526_v53 = vld [vmem:[#allocation182_spill] sm:$0xff]  ;;  %v5527_v34 = vld [vmem:[#allocation183_spill] sm:$0xff]  ;;  %v5534_v5 = vld [vmem:[#allocation145_spill] sm:$0xff] }
 0x2ec   : > { %v1100_v23 = vmul.f32 %v1084_v32, %v987_v38  ;;  %v4464_v60 = vadd.f32 %v984_v37, %v928_v52  ;;  %v1647_v33 = vpop.permute.xlu1 %1646  ;;  %v1645_v18 = vpop.permute.xlu0 %1644  ;;  %v1090_v12 = vsel %vm1027_vm3, %v5525_v48, %v5524_v13  ;;  %v1155_v45 = vsel %vm1027_vm3, %v5527_v34, %v5526_v53  ;;  %v5528_v59 = vld [vmem:[#allocation186_spill] sm:$0xff]  ;;  %v5529_v50 = vld [vmem:[#allocation187_spill] sm:$0xff]  ;;  %v5532_v32 = vld [vmem:[#allocation141_spill] sm:$0xff] }
 0x2ed   : > { %v1205_v27 = vsel %vm1027_vm3, %v5529_v50, %v5528_v59  ;;  %v4476_v42 = vsel %vm1505_vm2, %v1645_v18, %v1647_v33  ;;  %v986_v63 = vmul.f32 %v970_v54, %v4192_v16  ;;  %v4479_v20 = vadd.f32 %v985_v29, %v929_v44  ;;  %v5530_v37 = vld [vmem:[#allocation246_spill] sm:$0xff]  ;;  %v5531_v10 = vld [vmem:[#allocation247_spill] sm:$0xff]  ;;  %v5538_v33 = vld [vmem:[#allocation228_spill] sm:$0xff] }
 0x2ee   : > { %v1227_v52 = vmul.f32 %v1211_v28, %v4371_v40  ;;  %1891 = vrot.lane.b32.xlu1 %v5530_v37, %s2339_s17  ;;  %1889 = vrot.lane.b32.xlu0 %v5531_v10, %s2339_s17  ;;  %v1044_v36 = vmul.f32 %v1028_v2, %v4371_v40  ;;  %v5533_v58 = vld [vmem:[#allocation142_spill] sm:$0xff]  ;;  %v5537_v29 = vld [vmem:[#allocation171_spill] sm:$0xff]  ;;  %v1050_v28 = vmul.f32 %v1034_v14, %v4373_v47  ;;  %v5539_v18 = vld [vmem:[#allocation229_spill] sm:$0xff] }
 0x2ef   : > { %v1029_v8 = vsel %vm1027_vm3, %v5533_v58, %v5532_v32  ;;  %v5535_v57 = vld [vmem:[#allocation146_spill] sm:$0xff]  ;;  %v1106_v43 = vmul.f32 %v1090_v12, %v4479_v20  ;;  %v1171_v41 = vmul.f32 %v1155_v45, %v987_v38  ;;  %v1221_v15 = vmul.f32 %v1205_v27, %v4362_v9  ;;  %v5540_v48 = vld [vmem:[#allocation252_spill] sm:$0xff]  ;;  %v5541_v53 = vld [vmem:[#allocation253_spill] sm:$0xff] }
 0x2f0   : > { %v1031_v16 = vsel %vm1027_vm3, %v5535_v57, %v5534_v5  ;;  %v5536_v44 = vld [vmem:[#allocation170_spill] sm:$0xff]  ;;  %v1651_v40 = vpop.permute.xlu1 %1650  ;;  %v1649_v2 = vpop.permute.xlu0 %1648  ;;  %v4499_v22 = vsub.f32 %v1044_v36, %v1100_v23  ;;  %v1332_v13 = vsel %vm1268_vm4, %v5539_v18, %v5538_v33  ;;  %v1445_v34 = vsel %vm1268_vm4, %v5541_v53, %v5540_v48  ;;  %v5543_v12 = vld [vmem:[#allocation155_spill] sm:$0xff]  ;;  %v5544_v23 = vld [vmem:[#allocation148_spill] sm:$0xff] }
 0x2f1   : > { %v1149_v54 = vsel %vm1027_vm3, %v5537_v29, %v5536_v44  ;;  %v4508_v59 = vsel %vm1505_vm2, %v1649_v2, %v1651_v40  ;;  %v5542_v14 = vld [vmem:[#allocation154_spill] sm:$0xff]  ;;  %v4514_v50 = vadd.f32 %v1227_v52, %v1171_v41  ;;  %v5545_v27 = vld [vmem:[#allocation149_spill] sm:$0xff]  ;;  %v5547_v36 = vld [vmem:[#allocation159_spill] sm:$0xff] }
 0x2f2   : > { %v1085_v38 = vsel %vm1027_vm3, %v5543_v12, %v5542_v14  ;;  %v1165_v45 = vmul.f32 %v1149_v54, %v4451_v1  ;;  %1908 = vrot.lane.b32.xlu1 %v3831_v55, %s2339_s17  ;;  %1906 = vrot.lane.b32.xlu0 %v3836_v49, %s2339_s17  ;;  %v1033_v37 = vsel %vm1027_vm3, %v5545_v27, %v5544_v23  ;;  %v5546_v10 = vld [vmem:[#allocation158_spill] sm:$0xff]  ;;  %v5549_v5 = vld [vmem:[#allocation211_spill] sm:$0xff]  ;;  %v5550_v52 = vld [vmem:[#allocation232_spill] sm:$0xff] }
 0x2f3   : > { %v1087_v32 = vsel %vm1027_vm3, %v5547_v36, %v5546_v10  ;;  %v5548_v58 = vld [vmem:[#allocation210_spill] sm:$0xff]  ;;  %v5551_v44 = vld [vmem:[#allocation233_spill] sm:$0xff]  ;;  %v4532_v55 = vsub.f32 %v1050_v28, %v1106_v43  ;;  %v1348_v49 = vmul.f32 %v1332_v13, %v4514_v50  ;;  %v1461_v41 = vmul.f32 %v1445_v34, %v4499_v22  ;;  %v5552_v33 = vld [vmem:[#allocation152_spill] sm:$0xff] }
 0x2f4   : > { %v1276_v57 = vsel %vm1268_vm4, %v5549_v5, %v5548_v58  ;;  %v1389_v29 = vsel %vm1268_vm4, %v5551_v44, %v5550_v52  ;;  %v4534_v54 = vadd.f32 %v1221_v15, %v1165_v45  ;;  %v1655_v40 = vpop.permute.xlu1 %1654  ;;  %v1653_v2 = vpop.permute.xlu0 %1652  ;;  %v5553_v18 = vld [vmem:[#allocation153_spill] sm:$0xff]  ;;  %v1101_v53 = vmul.f32 %v1085_v38, %v4442_v24  ;;  %v5554_v28 = vld [vmem:[#allocation162_spill] sm:$0xff]  ;;  %v5555_v43 = vld [vmem:[#allocation163_spill] sm:$0xff] }
 0x2f5   : > { %v1035_v48 = vsel %vm1027_vm3, %v5553_v18, %v5552_v33  ;;  %v994_v14 = vadd.f32 %v986_v63, %v930_v31  ;;  %v4543_v12 = vsel %vm1505_vm2, %v1653_v2, %v1655_v40  ;;  %v1089_v15 = vsel %vm1027_vm3, %v5555_v43, %v5554_v28  ;;  %v5556_v27 = vld [vmem:[#allocation166_spill] sm:$0xff]  ;;  %v5557_v10 = vld [vmem:[#allocation167_spill] sm:$0xff]  ;;  %v5561_v44 = vld [vmem:[#allocation188_spill] sm:$0xff] }
 0x2f6   : > { %v1292_v13 = vmul.f32 %v1276_v57, %v4532_v55  ;;  %v1405_v34 = vmul.f32 %v1389_v29, %v4534_v54  ;;  %1912 = vrot.lane.b32.xlu1 %v4272_v30, %s2339_s17  ;;  %1910 = vrot.lane.b32.xlu0 %v4057_v6, %s2339_s17  ;;  %v1045_v38 = vmul.f32 %v1029_v8, %v4360_v26  ;;  %v5559_v57 = vld [vmem:[#allocation184_spill] sm:$0xff]  ;;  %v5562_v29 = vld [vmem:[#allocation189_spill] sm:$0xff]  ;;  %v5563_v2 = vld [vmem:[#allocation214_spill] sm:$0xff] }
 0x2f7   : > { %v1047_v31 = vmul.f32 %v1031_v16, %v4364_v61  ;;  %v1049_v63 = vmul.f32 %v1033_v37, %v4366_v0  ;;  %v1103_v45 = vmul.f32 %v1087_v32, %v4453_v4  ;;  %v1051_v23 = vmul.f32 %v1035_v48, %v4375_v21  ;;  %v5560_v16 = vld [vmem:[#allocation185_spill] sm:$0xff]  ;;  %v5564_v33 = vld [vmem:[#allocation215_spill] sm:$0xff]  ;;  %v5567_v43 = vld [vmem:[#allocation192_spill] sm:$0xff] }
 0x2f8   : > { %v1091_v36 = vsel %vm1027_vm3, %v5557_v10, %v5556_v27  ;;  %v4562_v58 = vsub.f32 %v1292_v13, %v1348_v49  ;;  %v4564_v30 = vadd.f32 %v1461_v41, %v1405_v34  ;;  %v1659_v5 = vpop.permute.xlu1 %1658  ;;  %v1657_v6 = vpop.permute.xlu0 %1656  ;;  %v1105_v8 = vmul.f32 %v1089_v15, %v4464_v60  ;;  %v5565_v48 = vld [vmem:[#allocation7_spill] sm:$0xff]  ;;  %v5568_v15 = vld [vmem:[#allocation193_spill] sm:$0xff]  ;;  %v5571_v10 = vld [vmem:[#allocation172_spill] sm:$0xff] }
 0x2f9   : > { %v1204_v37 = vsel %vm1027_vm3, %v5560_v16, %v5559_v57  ;;  %v4570_v52 = vsub.f32 %v1045_v38, %v1101_v53  ;;  %v1666_v32 = vsel %vm1505_vm2, %v1657_v6, %v1659_v5  ;;  %v1206_v40 = vsel %vm1027_vm3, %v5562_v29, %v5561_v44  ;;  %v5566_v53 = vld [vmem:[#allocation8_spill] sm:$0xff]  ;;  %v5570_v38 = vld [vmem:[#allocation169_spill] sm:$0xff] }
 0x2fa   : > { %5558 = vst [vmem:[#allocation35_spill] sm:$0xff] %v4562_v58  ;;  %v1631_v49 = vmul.f32 %v4342_v7, %v4564_v30  ;;  %v1680_v41 = vmul.f32 %v1666_v32, %v4562_v58  ;;  %1845 = vrot.lane.b32.xlu1 %v5563_v2, %s2339_s17  ;;  %1843 = vrot.lane.b32.xlu0 %v5564_v33, %s2339_s17  ;;  %v5569_v7 = vld [vmem:[#allocation168_spill] sm:$0xff]  ;;  %v5572_v5 = vld [vmem:[#allocation173_spill] sm:$0xff] }
 0x2fb   : > { %v1107_v18 = vmul.f32 %v1091_v36, %v994_v14  ;;  %v1208_v28 = vsel %vm1027_vm3, %v5566_v53, %v5565_v48  ;;  %v1210_v13 = vsel %vm1027_vm3, %v5568_v15, %v5567_v43  ;;  %v4589_v34 = vsub.f32 %v1047_v31, %v1103_v45  ;;  %v5573_v57 = vld [vmem:[#allocation176_spill] sm:$0xff]  ;;  %v5574_v36 = vld [vmem:[#allocation177_spill] sm:$0xff] }
 0x2fc   : > { %v1148_v27 = vsel %vm1027_vm3, %v5570_v38, %v5569_v7  ;;  %v1150_v6 = vsel %vm1027_vm3, %v5572_v5, %v5571_v10  ;;  %v1152_v16 = vsel %vm1027_vm3, %v5574_v36, %v5573_v57  ;;  %v1691_v32 = vpop.permute.xlu1 %1690  ;;  %v1689_v44 = vpop.permute.xlu0 %1688  ;;  %v4600_v29 = vadd.f32 %v1680_v41, %v1631_v49  ;;  %v5575_v2 = vld [vmem:[#allocation180_spill] sm:$0xff]  ;;  %v5576_v33 = vld [vmem:[#allocation181_spill] sm:$0xff]  ;;  %v5577_v49 = vld [vmem:[#allocation230_spill] sm:$0xff] }
 0x2fd   : > { %v1154_v31 = vsel %vm1027_vm3, %v5576_v33, %v5575_v2  ;;  %v1220_v45 = vmul.f32 %v1204_v37, %v4360_v26  ;;  %v1222_v48 = vmul.f32 %v1206_v40, %v4364_v61  ;;  %v4608_v53 = vsel %vm1708_vm5, %v1689_v44, %v1691_v32  ;;  %v5578_v41 = vld [vmem:[#allocation231_spill] sm:$0xff]  ;;  %v5579_v37 = vld [vmem:[#allocation196_spill] sm:$0xff]  ;;  %v5580_v40 = vld [vmem:[#allocation197_spill] sm:$0xff] }
 0x2fe   : > { %v1224_v43 = vmul.f32 %v1208_v28, %v4366_v0  ;;  %v1226_v15 = vmul.f32 %v1210_v13, %v4375_v21  ;;  %v4612_v7 = vsub.f32 %v1049_v63, %v1105_v8  ;;  %1867 = vrot.lane.b32.xlu1 %v5577_v49, %s2339_s17  ;;  %1865 = vrot.lane.b32.xlu0 %v5578_v41, %s2339_s17  ;;  %v5581_v63 = vld [vmem:[#allocation200_spill] sm:$0xff]  ;;  %v5582_v8 = vld [vmem:[#allocation201_spill] sm:$0xff]  ;;  %v5587_v44 = vld [vmem:[#allocation250_spill] sm:$0xff] }
 0x2ff   : > { %v1164_v38 = vmul.f32 %v1148_v27, %v4442_v24  ;;  %v1166_v26 = vmul.f32 %v1150_v6, %v4453_v4  ;;  %v1115_v61 = vsub.f32 %v1051_v23, %v1107_v18  ;;  %v1269_v10 = vsel %vm1268_vm4, %v5580_v40, %v5579_v37  ;;  %v5583_v13 = vld [vmem:[#allocation212_spill] sm:$0xff]  ;;  %v5584_v5 = vld [vmem:[#allocation213_spill] sm:$0xff]  ;;  %v5588_v2 = vld [vmem:[#allocation251_spill] sm:$0xff] }
 0x300   : > { %v1168_v0 = vmul.f32 %v1152_v16, %v4464_v60  ;;  %v1170_v21 = vmul.f32 %v1154_v31, %v994_v14  ;;  %v1271_v28 = vsel %vm1268_vm4, %v5582_v8, %v5581_v63  ;;  %v1325_v57 = vsel %vm1268_vm4, %v5584_v5, %v5583_v13  ;;  %v1695_v36 = vpop.permute.xlu1 %1694  ;;  %v1693_v24 = vpop.permute.xlu0 %1692  ;;  %v5585_v27 = vld [vmem:[#allocation204_spill] sm:$0xff]  ;;  %v5586_v4 = vld [vmem:[#allocation205_spill] sm:$0xff]  ;;  %v5589_v49 = vld [vmem:[#allocation226_spill] sm:$0xff] }
 0x301   : > { %v1273_v23 = vsel %vm1268_vm4, %v5586_v4, %v5585_v27  ;;  %v1228_v18 = vadd.f32 %v1220_v45, %v1164_v38  ;;  %v1230_v6 = vadd.f32 %v1222_v48, %v1166_v26  ;;  %v4634_v32 = vsel %vm1708_vm5, %v1693_v24, %v1695_v36  ;;  %v5590_v41 = vld [vmem:[#allocation227_spill] sm:$0xff]  ;;  %v5591_v48 = vld [vmem:[#allocation266_spill] sm:$0xff]  ;;  %v5594_v37 = vld [vmem:[#allocation209_spill] sm:$0xff] }
 0x302   : > { %v1285_v60 = vmul.f32 %v1269_v10, %v1115_v61  ;;  %v1232_v14 = vadd.f32 %v1224_v43, %v1168_v0  ;;  %v1234_v16 = vadd.f32 %v1226_v15, %v1170_v21  ;;  %1895 = vrot.lane.b32.xlu1 %v5587_v44, %s2339_s17  ;;  %1893 = vrot.lane.b32.xlu0 %v5588_v2, %s2339_s17  ;;  %v5592_v38 = vld [vmem:[#allocation267_spill] sm:$0xff]  ;;  %v5593_v15 = vld [vmem:[#allocation208_spill] sm:$0xff]  ;;  %v5595_v10 = vld [vmem:[#allocation218_spill] sm:$0xff] }
 0x303   : > { %v1287_v33 = vmul.f32 %v1271_v28, %v4570_v52  ;;  %v1341_v31 = vmul.f32 %v1325_v57, %v1228_v18  ;;  %v1331_v45 = vsel %vm1268_vm4, %v5590_v41, %v5589_v49  ;;  %v1452_v26 = vsel %vm1268_vm4, %v5592_v38, %v5591_v48  ;;  %v5596_v0 = vld [vmem:[#allocation219_spill] sm:$0xff]  ;;  %v5597_v63 = vld [vmem:[#allocation254_spill] sm:$0xff]  ;;  %v5603_v44 = vld [vmem:[#allocation248_spill] sm:$0xff] }
 0x304   : > { %v1289_v43 = vmul.f32 %v1273_v23, %v4589_v34  ;;  %v1275_v40 = vsel %vm1268_vm4, %v5594_v37, %v5593_v15  ;;  %v1327_v21 = vsel %vm1268_vm4, %v5596_v0, %v5595_v10  ;;  %v5598_v8 = vld [vmem:[#allocation255_spill] sm:$0xff]  ;;  %v1699_v13 = vpop.permute.xlu1 %1698  ;;  %v1697_v5 = vpop.permute.xlu0 %1696  ;;  %v5599_v57 = vld [vmem:[#allocation222_spill] sm:$0xff]  ;;  %v5604_v2 = vld [vmem:[#allocation249_spill] sm:$0xff]  ;;  %v1347_v48 = vmul.f32 %v1331_v45, %v1234_v16 }
 0x305   : > { %v1446_v28 = vsel %vm1268_vm4, %v5598_v8, %v5597_v63  ;;  %v5600_v36 = vld [vmem:[#allocation223_spill] sm:$0xff]  ;;  %v5601_v27 = vld [vmem:[#allocation234_spill] sm:$0xff]  ;;  %v1396_v49 = vsel %vm1268_vm4, %v5604_v2, %v5603_v44  ;;  %v4667_v41 = vsel %vm1708_vm5, %v1697_v5, %v1699_v13  ;;  %v1468_v10 = vmul.f32 %v1452_v26, %v1115_v61  ;;  %v5613_v58 = vld [vmem:[#allocation296_spill] sm:$0xff] }
 0x306   : > { %v1329_v24 = vsel %vm1268_vm4, %v5600_v36, %v5599_v57  ;;  %v5602_v4 = vld [vmem:[#allocation235_spill] sm:$0xff]  ;;  %v5605_v38 = vld [vmem:[#allocation258_spill] sm:$0xff]  ;;  %v1291_v8 = vmul.f32 %v1275_v40, %v4612_v7  ;;  %v1343_v57 = vmul.f32 %v1327_v21, %v1230_v6  ;;  %v1462_v36 = vmul.f32 %v1446_v28, %v4570_v52  ;;  %v5614_v52 = vld [vmem:[#allocation297_spill] sm:$0xff] }
 0x307   : > { %v1390_v23 = vsel %vm1268_vm4, %v5602_v4, %v5601_v27  ;;  %v5606_v15 = vld [vmem:[#allocation259_spill] sm:$0xff]  ;;  %v5607_v0 = vld [vmem:[#allocation294_spill] sm:$0xff]  ;;  %v4678_v13 = vsub.f32 %v1285_v60, %v1341_v31  ;;  %v1345_v45 = vmul.f32 %v1329_v24, %v1232_v14  ;;  %v1412_v26 = vmul.f32 %v1396_v49, %v1228_v18  ;;  %v2261_v49 = vld [vmem:[%s2430_s9 + $0x68] sm:$0xff] }
 0x308   : > { %v1448_v37 = vsel %vm1268_vm4, %v5606_v15, %v5605_v38  ;;  %1916 = vrot.lane.b32.xlu1 %v5607_v0, %s2339_s17  ;;  %v5608_v63 = vld [vmem:[#allocation295_spill] sm:$0xff]  ;;  %v1406_v5 = vmul.f32 %v1390_v23, %v1230_v6  ;;  %v5609_v27 = vld [vmem:[#allocation238_spill] sm:$0xff]  ;;  %v1703_v44 = vpop.permute.xlu1 %1702  ;;  %v1701_v2 = vpop.permute.xlu0 %1700  ;;  %v1561_v60 = vsel %vm1505_vm2, %v5614_v52, %v5613_v58  ;;  %v1355_v18 = vsub.f32 %v1291_v8, %v1347_v48 }
 0x309   : > { %1914 = vrot.lane.b32.xlu0 %v5608_v63, %s2339_s17  ;;  %v5610_v4 = vld [vmem:[#allocation239_spill] sm:$0xff]  ;;  %v1464_v38 = vmul.f32 %v1448_v37, %v4589_v34  ;;  %v5611_v15 = vld [vmem:[#allocation262_spill] sm:$0xff]  ;;  %v4691_v31 = vsel %vm1708_vm5, %v1701_v2, %v1703_v44  ;;  %v1476_v23 = vadd.f32 %v1468_v10, %v1412_v26  ;;  %v2262_v34 = vld [vmem:[%s2430_s9 + $0x60] sm:$0xff]  ;;  %s2277_s17 = scalar_lea.vmem %s2276_s15, 256 }
 0x30a   : > { %v1392_v61 = vsel %vm1268_vm4, %v5610_v4, %v5609_v27  ;;  %v5612_v40 = vld [vmem:[#allocation263_spill] sm:$0xff]  ;;  %v5615_v6 = vld [vmem:[#allocation242_spill] sm:$0xff]  ;;  %v5617_v27 = vld [vmem:[#allocation280_spill] sm:$0xff]  ;;  %v4703_v44 = vadd.f32 %v1462_v36, %v1406_v5  ;;  %v1353_v36 = vsub.f32 %v1289_v43, %v1345_v45  ;;  %p2279_p2 = scmp.lt.s32.totalorder %s2277_s17, %s2271_s14 }
 0x30b   : > { %v1450_v21 = vsel %vm1268_vm4, %v5612_v40, %v5611_v15  ;;  %v5616_v28 = vld [vmem:[#allocation243_spill] sm:$0xff]  ;;  %v1408_v37 = vmul.f32 %v1392_v61, %v1232_v14  ;;  %v5618_v4 = vld [vmem:[#allocation281_spill] sm:$0xff]  ;;  %v5621_v8 = vld [vmem:[#allocation286_spill] sm:$0xff]  ;;  %v1575_v52 = vmul.f32 %v1561_v60, %v1476_v23  ;;  %v1674_v14 = vmul.f32 %v4369_v39, %v4678_v13 }
 0x30c   : > { %v1394_v24 = vsel %vm1268_vm4, %v5616_v28, %v5615_v6  ;;  %1934 = vrot.lane.b32.xlu1 %v2261_v49, %s2340_s23  ;;  %v1512_v58 = vsel %vm1505_vm2, %v5618_v4, %v5617_v27  ;;  %v5619_v2 = vld [vmem:[#allocation21_spill] sm:$0xff]  ;;  %v5620_v15 = vld [vmem:[#allocation19_spill] sm:$0xff]  ;;  %v1466_v10 = vmul.f32 %v1450_v21, %v4612_v7  ;;  %v1707_v61 = vpop.permute.xlu1 %1706  ;;  %v1705_v6 = vpop.permute.xlu0 %1704  ;;  %v2264_v60 = vld [vmem:[%s2512_s13 + $0x60] sm:$0xff]  ;;  %v1351_v39 = vsub.f32 %v1287_v33, %v1343_v57  ;;  %p2280_p3 = por %p2279_p2, %p2278_p1 }
 0x30d   : > { %1932 = vrot.lane.b32.xlu0 %v2262_v34, %s2340_s23  ;;  %v1611_v48 = vsel %vm1505_vm2, %v5620_v15, %v5619_v2  ;;  %v5622_v26 = vld [vmem:[#allocation287_spill] sm:$0xff]  ;;  %v1410_v28 = vmul.f32 %v1394_v24, %v1234_v16  ;;  %v1472_v5 = vadd.f32 %v1464_v38, %v1408_v37  ;;  %v4715_v49 = vsel %vm1708_vm5, %v1705_v6, %v1707_v61  ;;  %v5623_v34 = vld [vmem:[#allocation272_spill] sm:$0xff]  ;;  %v5624_v27 = vld [vmem:[#allocation273_spill] sm:$0xff] }
 0x30e   : > { %v1557_v40 = vsel %vm1505_vm2, %v5622_v26, %v5621_v8  ;;  %v1508_v7 = vsel %vm1505_vm2, %v5624_v27, %v5623_v34  ;;  %v1526_v21 = vmul.f32 %v1512_v58, %v1355_v18  ;;  %v1625_v4 = vmul.f32 %v1611_v48, %v4703_v44  ;;  %v2263_v2 = vld [vmem:[%s2512_s13 + $0x68] sm:$0xff]  ;;  %v5626_v45 = vld [vmem:[#allocation26_spill] sm:$0xff]  ;;  %v5627_v61 = vld [vmem:[#allocation276_spill] sm:$0xff]  ;;  %p2281_p4 = pnand %p2280_p3, %p2274_p0 }
 0x30f   : > { %v1571_v16 = vmul.f32 %v1557_v40, %v1472_v5  ;;  %v5625_v43 = vld [vmem:[#allocation25_spill] sm:$0xff]  ;;  %v1474_v24 = vadd.f32 %v1466_v10, %v1410_v28  ;;  %v1677_v37 = vmul.f32 %v4476_v42, %v1353_v36  ;;  %v1522_v26 = vmul.f32 %v1508_v7, %v1351_v39  ;;  %v5629_v57 = vld [vmem:[#allocation290_spill] sm:$0xff]  ;;  %v5630_v40 = vld [vmem:[#allocation291_spill] sm:$0xff] }
 0x310   : > { %1949 = vrot.lane.b32.xlu1 %v2263_v2, %s2340_s23  ;;  %v1614_v38 = vsel %vm1505_vm2, %v5626_v45, %v5625_v43  ;;  %v4729_v58 = vsub.f32 %v1526_v21, %v1575_v52  ;;  %v1727_v15 = vpop.permute.xlu1 %1726  ;;  %v1725_v48 = vpop.permute.xlu0 %1724  ;;  %v4731_v8 = vadd.f32 %v1674_v14, %v1625_v4  ;;  %v5628_v6 = vld [vmem:[#allocation277_spill] sm:$0xff]  ;;  %v1559_v34 = vsel %vm1505_vm2, %v5630_v40, %v5629_v57  ;;  %v2265_v14 = vld [vmem:[%s2598_s16 + $0x78] sm:$0xff]  ;;  %v2266_v28 = vld [vmem:[%s2598_s16 + $0x70] sm:$0xff]  ;;  %s2343_s16 = smov 2  }
 0x311   : > { %1947 = vrot.lane.b32.xlu0 %v2264_v60, %s2340_s23  ;;  %v1510_v33 = vsel %vm1505_vm2, %v5628_v6, %v5627_v61  ;;  %v1744_v27 = vsel %vm1708_vm5, %v1725_v48, %v1727_v15  ;;  %v1628_v10 = vmul.f32 %v1614_v38, %v1474_v24  ;;  %v1616_v7 = vsel %vm1505_vm2, %v4293_v51, %v4291_v62  ;;  %v5631_v62 = vld [vmem:[#allocation23_spill] sm:$0xff]  ;;  %v5632_v51 = vld [vmem:[#allocation24_spill] sm:$0xff] }
 0x312   : > { %v4742_v42 = vmul.f32 %v4608_v53, %v4729_v58  ;;  %v4745_v52 = vmul.f32 %v1744_v27, %v4731_v8  ;;  %v1578_v21 = vsub.f32 %v1522_v26, %v1571_v16  ;;  %v1573_v4 = vmul.f32 %v1559_v34, %v1474_v24  ;;  %v2267_v27 = vld [vmem:[%s2430_s9 + $0x78] sm:$0xff] }
 0x313   : > { %v1679_v2 = vmul.f32 %v4543_v12, %v1355_v18  ;;  %v1684_v43 = vadd.f32 %v1677_v37, %v1628_v10  ;;  %v1524_v38 = vmul.f32 %v1510_v33, %v1353_v36  ;;  %v1630_v48 = vmul.f32 %v1616_v7, %v1476_v23  ;;  %v5633_v37 = vld [vmem:[#allocation101_spill] sm:$0xff]  ;;  %v5636_v33 = vld [vmem:[#allocation136_spill] sm:$0xff]  ;;  %v2268_v10 = vld [vmem:[%s2430_s9 + $0x70] sm:$0xff]  ;;  %s2341_s9 = smov 119  }
 0x314   : > { %1965 = vrot.lane.b32.xlu1 %v2265_v14, %s2340_s23  ;;  %v1731_v60 = vpop.permute.xlu1 %1730  ;;  %v1729_v53 = vpop.permute.xlu0 %1728  ;;  %v1759_v45 = vsub.f32 %v4742_v42, %v4745_v52  ;;  %v4759_v61 = vmul.f32 %v4634_v32, %v1578_v21  ;;  %v1613_v12 = vsel %vm1505_vm2, %v5632_v51, %v5631_v62  ;;  %v1676_v18 = vmul.f32 %v4439_v19, %v1351_v39  ;;  %v5637_v14 = vld [vmem:[#allocation85_spill] sm:$0xff]  ;;  %v5639_v21 = vld [vmem:[#allocation119_spill] sm:$0xff] }
 0x315   : > { %1963 = vrot.lane.b32.xlu0 %v2266_v28, %s2340_s23  ;;  %v1745_v15 = vsel %vm1708_vm5, %v1729_v53, %v1731_v60  ;;  %v4771_v23 = vsub.f32 %v1524_v38, %v1573_v4  ;;  %v1686_v16 = vadd.f32 %v1679_v2, %v1630_v48  ;;  %v1627_v34 = vmul.f32 %v1613_v12, %v1472_v5  ;;  %v5638_v28 = vld [vmem:[#allocation86_spill] sm:$0xff]  ;;  %v5640_v4 = vld [vmem:[#allocation120_spill] sm:$0xff]  ;;  %v2269_v12 = vld [vmem:[%s2512_s13 + $0x78] sm:$0xff] }
 0x316   : > { %v4761_v6 = vmul.f32 %v1745_v15, %v1684_v43  ;;  %v790_v7 = vsel %vm786_vm1, %v5638_v28, %v5637_v14  ;;  %v911_v5 = vsel %vm786_vm1, %v5640_v4, %v5639_v21  ;;  %v5649_v14 = vld [vmem:[#allocation284_spill] sm:$0xff]  ;;  %v5650_v28 = vld [vmem:[#allocation285_spill] sm:$0xff]  ;;  %v5651_v4 = vld [vmem:[#allocation6_spill] sm:$0xff] }
 0x317   : > { %v1722_v19 = vmul.f32 %v4691_v31, %v4771_v23  ;;  %v1683_v43 = vadd.f32 %v1676_v18, %v1627_v34  ;;  %v806_v48 = vmul.f32 %v790_v7, %v4178_v3  ;;  %v927_v62 = vmul.f32 %v911_v5, %v4285_v25  ;;  %v5647_v34 = vld [vmem:[#allocation9_spill] sm:$0xff]  ;;  %v5652_v5 = vld [vmem:[#allocation147_spill] sm:$0xff] }
 0x318   : > { %1972 = vrot.lane.b32.xlu1 %v5607_v0, %s2340_s23  ;;  %v1739_v32 = vpop.permute.xlu1 %1738  ;;  %v1737_v36 = vpop.permute.xlu0 %1736  ;;  %v1760_v24 = vsub.f32 %v4759_v61, %v4761_v6  ;;  %v5634_v0 = vld [vmem:[#allocation102_spill] sm:$0xff]  ;;  %v1556_v7 = vsel %vm1505_vm2, %v5650_v28, %v5649_v14 }
 0x319   : > { %1970 = vrot.lane.b32.xlu0 %v5608_v63, %s2340_s23  ;;  %v846_v26 = vsel %vm786_vm1, %v5634_v0, %v5633_v37  ;;  %v5635_v63 = vld [vmem:[#allocation135_spill] sm:$0xff]  ;;  %v1747_v40 = vsel %vm1708_vm5, %v1737_v36, %v1739_v32  ;;  %v2270_v32 = vld [vmem:[%s2512_s13 + $0x70] sm:$0xff]  ;;  %v5643_v0 = vld [vmem:[#allocation160_spill] sm:$0xff]  ;;  %s2342_s13 = smov 1  }
 0x31a   : > { %v967_v57 = vsel %vm786_vm1, %v5636_v33, %v5635_v63  ;;  %v1757_v39 = vmul.f32 %v1747_v40, %v1686_v16  ;;  %v862_v2 = vmul.f32 %v846_v26, %v4280_v35  ;;  %v5642_v35 = vld [vmem:[#allocation144_spill] sm:$0xff]  ;;  %v5644_v26 = vld [vmem:[#allocation161_spill] sm:$0xff]  ;;  %v5645_v33 = vld [vmem:[#allocation190_spill] sm:$0xff] }
 0x31b   : > { %v983_v31 = vmul.f32 %v967_v57, %v4186_v46  ;;  %v5641_v46 = vld [vmem:[#allocation143_spill] sm:$0xff]  ;;  %v1088_v3 = vsel %vm1027_vm3, %v5644_v26, %v5643_v0 }
 0x31c   : > { %1938 = vrot.lane.b32.xlu1 %v2267_v27, %s2340_s23  ;;  %v1771_v60 = vpop.permute.xlu1 %1770  ;;  %v1769_v53 = vpop.permute.xlu0 %1768  ;;  %v4796_v38 = vsub.f32 %v1722_v19, %v1757_v39  ;;  %v1030_v18 = vsel %vm1027_vm3, %v5642_v35, %v5641_v46  ;;  %v870_v36 = vsub.f32 %v806_v48, %v862_v2  ;;  %v5646_v57 = vld [vmem:[#allocation191_spill] sm:$0xff]  ;;  %v5648_v19 = vld [vmem:[#allocation10_spill] sm:$0xff]  ;;  %v1032_v2 = vsel %vm1027_vm3, %v5652_v5, %v5651_v4 }
 0x31d   : > { %1936 = vrot.lane.b32.xlu0 %v2268_v10, %s2340_s23  ;;  %v1785_v15 = vsel %vm1708_vm5, %v1769_v53, %v1771_v60  ;;  %v991_v37 = vadd.f32 %v983_v31, %v927_v62  ;;  %v1207_v40 = vsel %vm1027_vm3, %v5646_v57, %v5645_v33  ;;  %v1209_v39 = vsel %vm1027_vm3, %v5648_v19, %v5647_v34  ;;  %v5653_v31 = vld [vmem:[#allocation174_spill] sm:$0xff]  ;;  %v5654_v60 = vld [vmem:[#allocation175_spill] sm:$0xff] }
 0x31e   : > { %v4801_v51 = vmul.f32 %v1785_v15, %v1683_v43  ;;  %v1151_v53 = vsel %vm1027_vm3, %v5654_v60, %v5653_v31  ;;  %v5655_v48 = vld [vmem:[#allocation178_spill] sm:$0xff]  ;;  %v5656_v62 = vld [vmem:[#allocation179_spill] sm:$0xff]  ;;  %v1223_v57 = vmul.f32 %v1207_v40, %v870_v36  ;;  %v1570_v34 = vmul.f32 %v1556_v7, %v4703_v44  ;;  %v5661_v40 = vld [vmem:[#allocation224_spill] sm:$0xff] }
 0x31f   : > { %v1104_v15 = vmul.f32 %v1088_v3, %v991_v37  ;;  %v1153_v46 = vsel %vm1027_vm3, %v5656_v62, %v5655_v48  ;;  %v5657_v35 = vld [vmem:[#allocation270_spill] sm:$0xff]  ;;  %v5658_v0 = vld [vmem:[#allocation271_spill] sm:$0xff]  ;;  %v1046_v3 = vmul.f32 %v1030_v18, %v4362_v9  ;;  %v1048_v19 = vmul.f32 %v1032_v2, %v870_v36  ;;  %v5663_v18 = vld [vmem:[#allocation260_spill] sm:$0xff] }
 0x320   : > { %1953 = vrot.lane.b32.xlu1 %v2269_v12, %s2340_s23  ;;  %v1775_v63 = vpop.permute.xlu1 %1774  ;;  %v1773_v25 = vpop.permute.xlu0 %1772  ;;  %v1507_v26 = vsel %vm1505_vm2, %v5658_v0, %v5657_v35  ;;  %v1167_v14 = vmul.f32 %v1151_v53, %v991_v37  ;;  %v5664_v36 = vld [vmem:[#allocation261_spill] sm:$0xff]  ;;  %v5667_v60 = vld [vmem:[#allocation206_spill] sm:$0xff] }
 0x321   : > { %1951 = vrot.lane.b32.xlu0 %v2270_v32, %s2340_s23  ;;  %v1786_v21 = vsel %vm1708_vm5, %v1773_v25, %v1775_v63  ;;  %v5659_v63 = vld [vmem:[#allocation156_spill] sm:$0xff]  ;;  %v5660_v25 = vld [vmem:[#allocation157_spill] sm:$0xff]  ;;  %v1521_v4 = vmul.f32 %v1507_v26, %v4678_v13  ;;  %v1112_v44 = vsub.f32 %v1048_v19, %v1104_v15  ;;  %v1449_v37 = vsel %vm1268_vm4, %v5664_v36, %v5663_v18 }
 0x322   : > { %v4829_v43 = vmul.f32 %v1786_v21, %v1686_v16  ;;  %v1086_v33 = vsel %vm1027_vm3, %v5660_v25, %v5659_v63  ;;  %v1225_v16 = vmul.f32 %v1209_v39, %v4373_v47  ;;  %v1169_v21 = vmul.f32 %v1153_v46, %v4479_v20  ;;  %v5662_v39 = vld [vmem:[#allocation225_spill] sm:$0xff]  ;;  %v5665_v20 = vld [vmem:[#allocation220_spill] sm:$0xff]  ;;  %v5673_v63 = vld [vmem:[#allocation202_spill] sm:$0xff] }
 0x323   : > { %v1102_v47 = vmul.f32 %v1086_v33, %v4451_v1  ;;  %v1330_v9 = vsel %vm1268_vm4, %v5662_v39, %v5661_v40  ;;  %v1231_v7 = vadd.f32 %v1223_v57, %v1167_v14  ;;  %v5666_v2 = vld [vmem:[#allocation221_spill] sm:$0xff]  ;;  %v5668_v1 = vld [vmem:[#allocation207_spill] sm:$0xff]  ;;  %v5669_v15 = vld [vmem:[#allocation240_spill] sm:$0xff] }
 0x324   : > { %1985 = vrot.lane.b32.xlu1 %v2267_v27, %s2341_s9  ;;  %v1783_v27 = vpop.permute.xlu1 %1782  ;;  %v1328_v13 = vsel %vm1268_vm4, %v5666_v2, %v5665_v20  ;;  %v1274_v53 = vsel %vm1268_vm4, %v5668_v1, %v5667_v60  ;;  %v5670_v48 = vld [vmem:[#allocation241_spill] sm:$0xff]  ;;  %v5671_v46 = vld [vmem:[#allocation264_spill] sm:$0xff]  ;;  %v5674_v25 = vld [vmem:[#allocation203_spill] sm:$0xff] }
 0x325   : > { %1983 = vrot.lane.b32.xlu0 %v2268_v10, %s2341_s9  ;;  %v1781_v10 = vpop.permute.xlu0 %1780  ;;  %v1393_v62 = vsel %vm1268_vm4, %v5670_v48, %v5669_v15  ;;  %v5672_v35 = vld [vmem:[#allocation265_spill] sm:$0xff]  ;;  %v1272_v33 = vsel %vm1268_vm4, %v5674_v25, %v5673_v63  ;;  %v1110_v14 = vsub.f32 %v1046_v3, %v1102_v47  ;;  %v1290_v39 = vmul.f32 %v1274_v53, %v1112_v44  ;;  %v5681_v3 = vld [vmem:[#allocation288_spill] sm:$0xff] }
 0x326   : > { %v1788_v28 = vsel %vm1708_vm5, %v1781_v10, %v1783_v27  ;;  %v1451_v0 = vsel %vm1268_vm4, %v5672_v35, %v5671_v46  ;;  %v5675_v27 = vld [vmem:[#allocation198_spill] sm:$0xff]  ;;  %v5676_v10 = vld [vmem:[#allocation199_spill] sm:$0xff]  ;;  %v5682_v47 = vld [vmem:[#allocation289_spill] sm:$0xff] }
 0x327   : > { %v4847_v5 = vmul.f32 %v1788_v28, %v4731_v8  ;;  %v1233_v8 = vadd.f32 %v1225_v16, %v1169_v21  ;;  %v1465_v16 = vmul.f32 %v1449_v37, %v1112_v44  ;;  %v1270_v19 = vsel %vm1268_vm4, %v5676_v10, %v5675_v27  ;;  %v5677_v21 = vld [vmem:[#allocation244_spill] sm:$0xff]  ;;  %v5686_v46 = vld [vmem:[#allocation275_spill] sm:$0xff] }
 0x328   : > { %1993 = vrot.lane.b32.xlu1 %v2269_v12, %s2341_s9  ;;  %v1806_v31 = vpop.permute.xlu1 %1805  ;;  %v1344_v28 = vmul.f32 %v1328_v13, %v1231_v7  ;;  %v1467_v36 = vmul.f32 %v1451_v0, %v4532_v55  ;;  %v1288_v37 = vmul.f32 %v1272_v33, %v1110_v14  ;;  %v1558_v13 = vsel %vm1505_vm2, %v5682_v47, %v5681_v3  ;;  %v5683_v53 = vld [vmem:[#allocation256_spill] sm:$0xff]  ;;  %v5693_v47 = vld [vmem:[#allocation22_spill] sm:$0xff] }
 0x329   : > { %1991 = vrot.lane.b32.xlu0 %v2270_v32, %s2341_s9  ;;  %v1804_v12 = vpop.permute.xlu0 %1803  ;;  %v1577_v32 = vsub.f32 %v1521_v4, %v1570_v34  ;;  %v1346_v57 = vmul.f32 %v1330_v9, %v1233_v8  ;;  %v5678_v4 = vld [vmem:[#allocation245_spill] sm:$0xff]  ;;  %v1409_v18 = vmul.f32 %v1393_v62, %v1233_v8  ;;  %v5685_v62 = vld [vmem:[#allocation274_spill] sm:$0xff]  ;;  %v1615_v0 = vsel %vm1505_vm2, %v4259_v56, %v4257_v11 }
 0x32a   : > { %v1820_v26 = vsel %vm1708_vm5, %v1804_v12, %v1806_v31  ;;  %v1395_v40 = vsel %vm1268_vm4, %v5678_v4, %v5677_v21  ;;  %v5679_v31 = vld [vmem:[#allocation216_spill] sm:$0xff]  ;;  %v5680_v12 = vld [vmem:[#allocation217_spill] sm:$0xff]  ;;  %v1352_v48 = vsub.f32 %v1288_v37, %v1344_v28  ;;  %v1509_v35 = vsel %vm1505_vm2, %v5686_v46, %v5685_v62 }
 0x32b   : > { %v1830_v34 = vmul.f32 %v1820_v26, %v1577_v32  ;;  %v1326_v32 = vsel %vm1268_vm4, %v5680_v12, %v5679_v31  ;;  %v1411_v44 = vmul.f32 %v1395_v40, %v4514_v50  ;;  %v1354_v8 = vsub.f32 %v1290_v39, %v1346_v57  ;;  %v5690_v4 = vld [vmem:[#allocation237_spill] sm:$0xff]  ;;  %v5691_v39 = vld [vmem:[#allocation278_spill] sm:$0xff] }
 0x32c   : > { %v1810_v20 = vpop.permute.xlu1 %1809  ;;  %v1473_v55 = vadd.f32 %v1465_v16, %v1409_v18  ;;  %v1342_v57 = vmul.f32 %v1326_v32, %v4534_v54  ;;  %v5687_v16 = vld [vmem:[#allocation292_spill] sm:$0xff]  ;;  %v1523_v28 = vmul.f32 %v1509_v35, %v1352_v48  ;;  %v1286_v56 = vmul.f32 %v1270_v19, %v4499_v22  ;;  %v5692_v18 = vld [vmem:[#allocation279_spill] sm:$0xff]  ;;  %v5695_v35 = vld [vmem:[#allocation282_spill] sm:$0xff] }
 0x32d   : > { %v1808_v2 = vpop.permute.xlu0 %1807  ;;  %v4880_v9 = vadd.f32 %v1830_v34, %v4801_v51  ;;  %v5684_v51 = vld [vmem:[#allocation257_spill] sm:$0xff]  ;;  %v1475_v63 = vadd.f32 %v1467_v36, %v1411_v44  ;;  %v1678_v50 = vmul.f32 %v4508_v59, %v1354_v8  ;;  %v5689_v59 = vld [vmem:[#allocation236_spill] sm:$0xff]  ;;  %v1511_v54 = vsel %vm1505_vm2, %v5692_v18, %v5691_v39 }
 0x32e   : > { %v1821_v60 = vsel %vm1708_vm5, %v1808_v2, %v1810_v20  ;;  %v1447_v15 = vsel %vm1268_vm4, %v5684_v51, %v5683_v53  ;;  %v1572_v26 = vmul.f32 %v1558_v13, %v1473_v55  ;;  %v5688_v34 = vld [vmem:[#allocation293_spill] sm:$0xff]  ;;  %v1391_v40 = vsel %vm1268_vm4, %v5690_v4, %v5689_v59  ;;  %v5694_v13 = vld [vmem:[#allocation20_spill] sm:$0xff] }
 0x32f   : > { %v1831_v1 = vmul.f32 %v1821_v60, %v4771_v23  ;;  %v1560_v27 = vsel %vm1505_vm2, %v5688_v34, %v5687_v16  ;;  %v1629_v21 = vmul.f32 %v1615_v0, %v1475_v63  ;;  %v1407_v19 = vmul.f32 %v1391_v40, %v1231_v7  ;;  %v5696_v0 = vld [vmem:[#allocation283_spill] sm:$0xff] }
 0x330   : > { %v1818_v25 = vpop.permute.xlu1 %1817  ;;  %v1574_v36 = vmul.f32 %v1560_v27, %v1475_v63  ;;  %v1579_v20 = vsub.f32 %v1523_v28, %v1572_v26  ;;  %v1525_v32 = vmul.f32 %v1511_v54, %v1354_v8  ;;  %v1612_v60 = vsel %vm1505_vm2, %v5694_v13, %v5693_v47 }
 0x331   : > { %v1816_v33 = vpop.permute.xlu0 %1815  ;;  %v4902_v23 = vadd.f32 %v1831_v1, %v4829_v43  ;;  %v1463_v43 = vmul.f32 %v1447_v15, %v1110_v14  ;;  %v1685_v31 = vadd.f32 %v1678_v50, %v1629_v21  ;;  %v1555_v26 = vsel %vm1505_vm2, %v5696_v0, %v5695_v35 }
 0x332   : > { %v1823_v10 = vsel %vm1708_vm5, %v1816_v33, %v1818_v25  ;;  %v4922_v3 = vmul.f32 %v4667_v41, %v1579_v20  ;;  %v1581_v1 = vsub.f32 %v1525_v32, %v1574_v36  ;;  %v5697_v25 = vld [vmem:[#allocation268_spill] sm:$0xff]  ;;  %v5698_v33 = vld [vmem:[#allocation269_spill] sm:$0xff] }
 0x333   : > { %v1833_v11 = vmul.f32 %v1823_v10, %v4729_v58  ;;  %v1350_v58 = vsub.f32 %v1286_v56, %v1342_v57  ;;  %v1471_v44 = vadd.f32 %v1463_v43, %v1407_v19  ;;  %v1569_v57 = vmul.f32 %v1555_v26, %v4564_v30  ;;  %v5699_v10 = vld [vmem:[#allocation35_spill] sm:$0xff] }
 0x334   : > { %v1735_v2 = vpop.permute.xlu1 %1734  ;;  %v4934_v41 = vmul.f32 %v4715_v49, %v1581_v1  ;;  %v1506_v49 = vsel %vm1505_vm2, %v5698_v33, %v5697_v25 }
 0x335   : > { %v1733_v37 = vpop.permute.xlu0 %1732  ;;  %v4918_v12 = vadd.f32 %v1833_v11, %v4847_v5  ;;  %v1675_v55 = vmul.f32 %v4412_v17, %v1350_v58  ;;  %v1626_v8 = vmul.f32 %v1612_v60, %v1471_v44  ;;  %v1520_v28 = vmul.f32 %v1506_v49, %v5699_v10 }
 0x336   : > { %v1746_v22 = vsel %vm1708_vm5, %v1733_v37, %v1735_v2 }
 0x337   : > { %v4924_v14 = vmul.f32 %v1746_v22, %v1685_v31  ;;  %v1682_v46 = vadd.f32 %v1675_v55, %v1626_v8  ;;  %v1576_v59 = vsub.f32 %v1520_v28, %v1569_v57 }
 0x338   : > { %v1743_v5 = vpop.permute.xlu1 %1742 }
 0x339   : > { %v1741_v53 = vpop.permute.xlu0 %1740  ;;  %v1761_v51 = vsub.f32 %v4922_v3, %v4924_v14 }
 0x33a   : > { %v1748_v7 = vsel %vm1708_vm5, %v1741_v53, %v1743_v5 }
 0x33b   : > { %v4937_v15 = vmul.f32 %v1748_v7, %v4600_v29 }
 0x33c   : > { %v1767_v48 = vpop.permute.xlu1 %1766 }
 0x33d   : > { %v1765_v62 = vpop.permute.xlu0 %1764  ;;  %v1763_v17 = vsub.f32 %v4934_v41, %v4937_v15 }
 0x33e   : > { %v1784_v63 = vsel %vm1708_vm5, %v1765_v62, %v1767_v48 }
 0x33f   : > { %v1794_v50 = vmul.f32 %v1784_v63, %v1682_v46 }
 0x340   : > { %v1779_v16 = vpop.permute.xlu1 %1778 }
 0x341   : > { %v1777_v34 = vpop.permute.xlu0 %1776 }
 0x342   : > { %v1787_v27 = vsel %vm1708_vm5, %v1777_v34, %v1779_v16 }
 0x343   : > { %v1797_v21 = vmul.f32 %v1787_v27, %v4600_v29 }
 0x344   : > { %v1802_v11 = vpop.permute.xlu1 %1801 }
 0x345   : > { %v1800_v56 = vpop.permute.xlu0 %1799 }
 0x346   : > { %v1819_v4 = vsel %vm1708_vm5, %v1800_v56, %v1802_v11 }
 0x347   : > { %v1829_v40 = vmul.f32 %v1819_v4, %v1576_v59 }
 0x348   : > { %v1814_v43 = vpop.permute.xlu1 %1813 }
 0x349   : > { %v1812_v39 = vpop.permute.xlu0 %1811  ;;  %v1834_v18 = vadd.f32 %v1829_v40, %v1794_v50 }
 0x34a   : > { %v1822_v54 = vsel %vm1708_vm5, %v1812_v39, %v1814_v43 }
 0x34b   : > { %v1832_v30 = vmul.f32 %v1822_v54, %v1581_v1 }
 0x34c   : > { %v1842_v36 = vpop.permute.xlu1 %1841 }
 0x34d   : > { %v1840_v20 = vpop.permute.xlu0 %1839  ;;  %v1837_v2 = vadd.f32 %v1832_v30, %v1797_v21 }
 0x34e   : > { %v1852_v37 = vsel %vm1851_vm6, %v1840_v20, %v1842_v36 }
 0x34f   : > { %v1858_v29 = vmul.f32 %v1852_v37, %v1760_v24 }
 0x350   : > { %v1850_v31 = vpop.permute.xlu1 %1849 }
 0x351   : > { %v1848_v58 = vpop.permute.xlu0 %1847 }
 0x352   : > { %v1854_v22 = vsel %vm1851_vm6, %v1848_v58, %v1850_v31 }
 0x353   : > { %v1860_v19 = vmul.f32 %v1854_v22, %v4796_v38 }
 0x354   : > { %v1864_v32 = vpop.permute.xlu1 %1863 }
 0x355   : > { %v1862_v47 = vpop.permute.xlu0 %1861 }
 0x356   : > { %v1873_v13 = vsel %vm1851_vm6, %v1862_v47, %v1864_v32 }
 0x357   : > { %v1879_v60 = vmul.f32 %v1873_v13, %v4902_v23 }
 0x358   : > { %v1872_v44 = vpop.permute.xlu1 %1871 }
 0x359   : > { %v1870_v55 = vpop.permute.xlu0 %1869  ;;  %v1882_v1 = vsub.f32 %v1858_v29, %v1879_v60 }
 0x35a   : > { %v1875_v5 = vsel %vm1851_vm6, %v1870_v55, %v1872_v44 }
 0x35b   : > { %v1881_v61 = vmul.f32 %v1875_v5, %v4918_v12 }
 0x35c   : > { %v1888_v6 = vpop.permute.xlu1 %1887 }
 0x35d   : > { %v1886_v24 = vpop.permute.xlu0 %1885  ;;  %v4964_v53 = vsub.f32 %v1860_v19, %v1881_v61 }
 0x35e   : > { %v1897_v48 = vsel %vm1851_vm6, %v1886_v24, %v1888_v6 }
 0x35f   : > { %v1903_v23 = vmul.f32 %v1897_v48, %v4880_v9 }
 0x360   : > { %v1892_v7 = vpop.permute.xlu1 %1891 }
 0x361   : > { %v1890_v8 = vpop.permute.xlu0 %1889 }
 0x362   : > { %v1898_v26 = vsel %vm1851_vm6, %v1890_v8, %v1892_v7 }
 0x363   : > { %v1904_v49 = vmul.f32 %v1898_v26, %v4918_v12 }
 0x364   : > { %v1909_v62 = vpop.permute.xlu1 %1908 }
 0x365   : > { %v1907_v46 = vpop.permute.xlu0 %1906 }
 0x366   : > { %v1918_v35 = vsel %vm1851_vm6, %v1907_v46, %v1909_v62 }
 0x367   : > { %v1924_v0 = vmul.f32 %v1918_v35, %v1759_v45 }
 0x368   : > { %v1913_v63 = vpop.permute.xlu1 %1912 }
 0x369   : > { %v1911_v50 = vpop.permute.xlu0 %1910  ;;  %v1927_v25 = vadd.f32 %v1924_v0, %v1903_v23  ;;  %v1930_v0 = vlaneseq }
 0x36a   : > { %v1919_v33 = vsel %vm1851_vm6, %v1911_v50, %v1913_v63 }
 0x36b   : > { %v1925_v57 = vmul.f32 %v1919_v33, %v4796_v38  ;;  %v1931_v26 = vand.u32 127, %v1930_v0 }
 0x36c   : > { %v1846_v16 = vpop.permute.xlu1 %1845 }
 0x36d   : > { %v1844_v34 = vpop.permute.xlu0 %1843  ;;  %v1928_v27 = vadd.f32 %v1925_v57, %v1904_v49  ;;  %vm1980_vm9 = vcmp.ge.s32.totalorder %v1931_v26, 1  ;;  %vm2001_vm10 = vcmp.ge.s32.totalorder %v1931_v26, 2 }
 0x36e   : > { %v1853_v9 = vsel %vm1851_vm6, %v1844_v34, %v1846_v16 }
 0x36f   : > { %v1859_v52 = vmul.f32 %v1853_v9, %v1761_v51 }
 0x370   : > { %v1868_v10 = vpop.permute.xlu1 %1867 }
 0x371   : > { %v1866_v28 = vpop.permute.xlu0 %1865 }
 0x372   : > { %v1874_v42 = vsel %vm1851_vm6, %v1866_v28, %v1868_v10 }
 0x373   : > { %v1880_v45 = vmul.f32 %v1874_v42, %v1837_v2 }
 0x374   : > { %v1896_v21 = vpop.permute.xlu1 %1895 }
 0x375   : > { %v1894_v11 = vpop.permute.xlu0 %1893  ;;  %v1883_v56 = vsub.f32 %v1859_v52, %v1880_v45 }
 0x376   : > { %v1899_v12 = vsel %vm1851_vm6, %v1894_v11, %v1896_v21 }
 0x377   : > { %v1905_v40 = vmul.f32 %v1899_v12, %v1834_v18 }
 0x37a   : > { %v1917_v38 = vpop.permute.xlu1 %1916 }
 0x37b   : > { %v1915_v59 = vpop.permute.xlu0 %1914 }
 0x37c   : > { %v1920_v4 = vsel %vm1851_vm6, %v1915_v59, %v1917_v38 }
 0x37d   : > { %v1926_v43 = vmul.f32 %v1920_v4, %v1763_v17 }
 0x37e   : > { %v1935_v39 = vpop.permute.xlu1 %1934 }
 0x37f   : > { %v1933_v54 = vpop.permute.xlu0 %1932  ;;  %v1929_v3 = vadd.f32 %v1926_v43, %v1905_v40 }
 0x380   : > { %v1941_v14 = vsel %vm1940_vm7, %v1933_v54, %v1935_v39 }
 0x381   : > { %v1945_v20 = vmul.f32 %v1941_v14, %v1882_v1 }
 0x382   : > { %v1950_v51 = vpop.permute.xlu1 %1949 }
 0x383   : > { %v1948_v30 = vpop.permute.xlu0 %1947 }
 0x384   : > { %v1955_v36 = vsel %vm1940_vm7, %v1948_v30, %v1950_v51 }
 0x385   : > { %v1959_v2 = vmul.f32 %v1955_v36, %v1928_v27 }
 0x386   : > { %v1966_v37 = vpop.permute.xlu1 %1965 }
 0x387   : > { %v1964_v29 = vpop.permute.xlu0 %1963  ;;  %v1961_v31 = vsub.f32 %v1945_v20, %v1959_v2 }
 0x388   : > { %v1967_v44 = vsel %vm1940_vm7, %v1964_v29, %v1966_v37 }
 0x389   : > { %v1969_v6 = vmul.f32 %v1967_v44, %v1927_v25 }
 0x38a   : > { %v1973_v18 = vpop.permute.xlu1 %1972 }
 0x38b   : > { %v1971_v58 = vpop.permute.xlu0 %1970 }
 0x38c   : > { %v1974_v32 = vsel %vm1940_vm7, %v1971_v58, %v1973_v18 }
 0x38d   : > { %v1976_v55 = vmul.f32 %v1974_v32, %v4964_v53 }
 0x38e   : > { %v1939_v22 = vpop.permute.xlu1 %1938 }
 0x38f   : > { %v1937_v41 = vpop.permute.xlu0 %1936  ;;  %v1977_v48 = vadd.f32 %v1976_v55, %v1969_v6 }
 0x390   : > { %v1942_v15 = vsel %vm1940_vm7, %v1937_v41, %v1939_v22 }
 0x391   : > { %v1946_v13 = vmul.f32 %v1942_v15, %v1883_v56 }
 0x392   : > { %v1954_v17 = vpop.permute.xlu1 %1953 }
 0x393   : > { %v1952_v19 = vpop.permute.xlu0 %1951 }
 0x394   : > { %v1956_v47 = vsel %vm1940_vm7, %v1952_v19, %v1954_v17 }
 0x395   : > { %v1960_v60 = vmul.f32 %v1956_v47, %v1929_v3 }
 0x396   : > { %v1986_v5 = vpop.permute.xlu1 %1985 }
 0x397   : > { %v1962_v1 = vsub.f32 %v1946_v13, %v1960_v60  ;;  %v1984_v61 = vpop.permute.xlu0 %1983 }
 0x398   : > { %v1988_v24 = vsel %vm1987_vm8, %v1984_v61, %v1986_v5 }
 0x399   : > { %1978 = vrot.lane.b32.xlu0 %v1962_v1, %s2342_s13  ;;  %v1990_v46 = vmul.f32 %v1988_v24, %v1961_v31 }
 0x39a   : > { %v1994_v7 = vpop.permute.xlu1 %1993 }
 0x39b   : > { %v1992_v8 = vpop.permute.xlu0 %1991 }
 0x39c   : > { %v1995_v62 = vsel %vm1987_vm8, %v1992_v8, %v1994_v7 }
 0x39d   : > { %v1997_v35 = vmul.f32 %v1995_v62, %v1977_v48 }
 0x39f   : > { %v1998_v23 = vsub.f32 %v1990_v46, %v1997_v35 }
 0x3a1   : > { %1999 = vrot.lane.b32.xlu1 %v1998_v23, %s2343_s16 }
 0x40b   : > { %v1979_v63 = vpop.permute.xlu0 %1978 }
 0x40c   : > { %v1981_v50 = vsel %vm1980_vm9, %v1979_v63, 0.0 }
 0x40d   : > { %v1982_v25 = vadd.f32 %v1981_v50, %v4964_v53 }
 0x413   : > { %v2000_v33 = vpop.permute.xlu1 %1999 }
 0x414   : > { %v2002_v49 = vsel %vm2001_vm10, %v2000_v33, 0.0 }
 0x415   : > { %v2003_v57 = vadd.f32 %v2002_v49, %v1982_v25 }
 0x417   : > { %2004 = vst [vmem:[%s287_s6] sm:$0xff] %v2003_v57 }
 0x418   : > { %2284 = shalt.err (!%p2281_p4)
}
 0x419   : > { %s2285_s23 = scalar_lea.hbm %s2017_s11, 128  ;;  %s2289_s16 = scalar_lea.hbm %s5033_s5, 256 }
 0x41a   : > { %p2286_p7 = scmp.ne.s32.totalorder %s2017_s11, %s2285_s23  ;;  %p2290_p10 = scmp.lt.s32.totalorder %s2017_s11, %s5033_s5 }
 0x41b   : > { %p2291_p11 = scmp.lt.s32.totalorder %s2289_s16, %s2285_s23 }
 0x41c   : > { %p2287_p8 = pnand %p2286_p7, %p2413_p5 }
 0x41d   : > { %p2292_p12 = por %p2291_p11, %p2290_p10 }
 0x41e   : > { %p2288_p9 = pneg %p2287_p8 }
 0x420   : > { %p2293_p13 = pnand %p2292_p12, %p2288_p9 }
 0x422   : > { %2296 = shalt.err (!%p2293_p13)
}
 0x423   : > { %2152 = dma.vmem_to_hbm [thread:$0]  (%p2413_p5), %s2020_s7, 128, %s2017_s11, %s2006_s12  }
 0x424 PF: > { %p2158_p0 = scmp.ge.s32.totalorder %s2331_s21, 2  ;;  %s2031_s30 = sand.u32 1, %s2319_s18  }
 0x425   : > { %s2032_s6 = scalar_lea.sflag [#allocation4], %s2031_s30 }
 0x426   : > { %p2155_p1 = pnand %p2158_p0, %p2417_p6 }
 0x428   : > { %p2156_p2 = pneg %p2155_p1 }
 0x42a   : > { %2314 = dma.done.wait (%p2156_p2), %s2032_s6, 128  }
 0x42b   : > { %2316 = vsyncadd (%p2156_p2), %s2032_s6, 4294967168  ;;  %p15_p3 = scmp.ge.s32.totalorder %s2400_s24, 4   ;;  %s5700_s18 = smov %s2323_s19 }
 0x42c   : > { %s5701_s19 = smov %s2327_s20  ;;  %s5702_s20 = smov %s2411_s27 }
 0x42d   : > { %s5703_s21 = smov %s2400_s24  ;;  %17 = sbr.rel (!%p15_p3) target bundleno = 3 (0x3), region = 87 }
 0x432   :  { %2037 = vsyncpa [#allocation4], 1 }
 0x433   :  { %2039 = vsyncpa [#allocation4 + $0x1], 1 }

</bundles_post_ra>
